<compile_context>
chip_gen: v6e
topology: v6e:2x2x1
jax: 0.10.0
libtpu: 0.0.40
codegen_flags: <defaults>
</compile_context>

<pallas_src>
import functools

import numpy as np
import jax
import jax.numpy as jnp
from jax.experimental import pallas as pl
from jax.experimental.pallas import tpu as pltpu

_BF16 = jnp.bfloat16


# ----------------------------------------------------------------------------
# Pallas kernel: fused (GEMM + bias + activation), grouped over a leading axis.
# Operands arrive bf16 (cheap HBM/VMEM traffic) and are cast to f32 for the dot.
# ----------------------------------------------------------------------------
def _gemm_bias_act_kernel(p_ref, w_ref, bias_ref, o_ref, *, act, lane_major):
    p = p_ref[0].astype(jnp.float32)              # (M, K) patches
    w = w_ref[0].astype(jnp.float32)              # (K, N) or (N, K)
    if lane_major:
        # (N, K) x (M, K) contracting K -> (N, M): the large M sits on the lane axis,
        # so stores are full-width even when Cout < 128.
        acc = jax.lax.dot_general(w, p, (((1,), (1,)), ((), ())),
                                  preferred_element_type=jnp.float32)
    else:
        acc = jax.lax.dot_general(p, w, (((1,), (0,)), ((), ())),
                                  preferred_element_type=jnp.float32)
    acc = acc + bias_ref[0]                       # (1, N) or (N, 1) f32, broadcasts
    if act == "relu":
        acc = jnp.maximum(acc, 0.0)
    elif act == "tanh":
        acc = jnp.tanh(acc)
    o_ref[0] = acc.astype(o_ref.dtype)


def fused_gemm(patches, w, bias, act, *, lane_major, out_dtype):
    """out[g] = act(patches[g] @ w[g] + bias)   (or its transposed, lane-dense form).

    patches: (G, M, K) bf16
    w:       (G, K, N) bf16 (lane_major=False)  ->  out (G, M, N)
             (G, N, K) bf16 (lane_major=True)   ->  out (G, N, M)
    bias:    (1, 1, N) or (1, N, 1), f32
    """
    G, M, K = patches.shape
    if lane_major:
        N = w.shape[1]
        out_rows, out_cols = N, M
    else:
        N = w.shape[2]
        out_rows, out_cols = M, N
    bias = bias.astype(jnp.float32)

    kernel = functools.partial(_gemm_bias_act_kernel, act=act, lane_major=lane_major)
    nbytes = lambda a: a.size * a.dtype.itemsize
    cost = pl.CostEstimate(
        flops=2 * G * M * K * N,
        transcendentals=G * M * N if act == "tanh" else 0,
        bytes_accessed=int(nbytes(patches) + nbytes(w) + nbytes(bias)
                           + G * out_rows * out_cols * np.dtype(out_dtype).itemsize),
    )
    # One full block per grid step: every per-layer operand is far below the scoped-VMEM
    # limits of v5e/v6e/v7x, so single-step grids avoid per-step pipeline overhead on the
    # single-TensorCore chips; the decoder's G=4 phase axis stays "parallel" for v7x.
    return pl.pallas_call(
        kernel,
        out_shape=jax.ShapeDtypeStruct((G, out_rows, out_cols), out_dtype),
        grid=(G,),
        in_specs=[
            pl.BlockSpec((1, M, K), lambda g: (g, 0, 0)),
            pl.BlockSpec((1,) + w.shape[1:], lambda g: (g, 0, 0)),
            pl.BlockSpec((1,) + bias.shape[1:], lambda g: (0, 0, 0)),
        ],
        out_specs=pl.BlockSpec((1, out_rows, out_cols), lambda g: (g, 0, 0)),
        compiler_params=pltpu.CompilerParams(dimension_semantics=("parallel",)),
        cost_estimate=cost,
    )(patches, w, bias)


def _lane_major(cout, m):
    # Cout on lanes would give masked (narrow) stores, but M is wide enough to be dense.
    return cout < 128 and m >= 128


# ----------------------------------------------------------------------------
# im2col glue (XLA data movement; all FLOPs happen inside the Pallas kernels).
# TODO(synk): fold this tap gather (and the decoder pixel-shuffle) into the kernel via
# memory_space=pl.ANY + manual DMA to remove the patch HBM blow-up at large batch sizes.
# ----------------------------------------------------------------------------
def _im2col(x, kh, kw, stride, pad_h, pad_w):
    # x: (N, H, W, C) -> patches (N*Ho*Wo, kh*kw*C); column order = (tap, channel)
    x = jnp.pad(x, ((0, 0), pad_h, pad_w, (0, 0)))
    n, hp, wp, c = x.shape
    ho = (hp - kh) // stride + 1
    wo = (wp - kw) // stride + 1
    taps = []
    for i in range(kh):
        for j in range(kw):
            taps.append(x[:, i:i + stride * ho:stride, j:j + stride * wo:stride, :])
    p = jnp.stack(taps, axis=3)                       # (N, Ho, Wo, kh*kw, C)
    return p.reshape(n * ho * wo, kh * kw * c), (n, ho, wo)


def conv2d(x, w, b, *, stride, pad, act, out_dtype):
    # x: NHWC bf16; w: (Cout, Cin, kh, kw) (PyTorch layout); b: (Cout,)
    cout, cin, kh, kw = w.shape
    patches, (n, ho, wo) = _im2col(x, kh, kw, stride, (pad, pad), (pad, pad))
    w_mat = jnp.transpose(w, (2, 3, 1, 0)).reshape(kh * kw * cin, cout).astype(_BF16)
    bias = b.astype(jnp.float32)
    m = patches.shape[0]
    if _lane_major(cout, m):
        y = fused_gemm(patches[None], w_mat.T[None], bias.reshape(1, cout, 1),
                       act, lane_major=True, out_dtype=out_dtype)        # (1, Cout, M)
        return y[0].reshape(cout, n, ho, wo).transpose(1, 2, 3, 0)
    y = fused_gemm(patches[None], w_mat[None], bias.reshape(1, 1, cout),
                   act, lane_major=False, out_dtype=out_dtype)           # (1, M, Cout)
    return y[0].reshape(n, ho, wo, cout)


def conv_transpose2d(x, w, b, *, stride, pad, act, out_dtype):
    # Sub-pixel decomposition of ConvTranspose2d(k=4, s=2, p=1):
    #   y[n, 2i+a, 2j+c, :] = 2x2-window conv of x with the phase-(a, c) taps.
    # All four phases run in ONE pallas_call (leading "parallel" grid axis).
    cin, cout, kh, kw = w.shape
    assert (stride, kh, kw, pad) == (2, 4, 4, 1), "decomposition assumes k=4, s=2, p=1"
    n, h, wd, _ = x.shape
    # forward-conv-equivalent kernel: spatially flipped, laid out (kh, kw, Cin, Cout)
    wf = jnp.transpose(w[:, :, ::-1, ::-1], (2, 3, 0, 1)).astype(_BF16)
    bias = b.astype(jnp.float32)

    patch_list, wmat_list = [], []
    for a in range(2):                 # output row phase
        for c in range(2):             # output col phase
            p_ph, _ = _im2col(x, 2, 2, 1, (1 - a, a), (1 - c, c))        # (M, 4*Cin)
            w_ph = wf[a::2, c::2].reshape(4 * cin, cout)                 # (4*Cin, Cout)
            patch_list.append(p_ph)
            wmat_list.append(w_ph)
    P = jnp.stack(patch_list)          # (4, M, 4*Cin)
    W = jnp.stack(wmat_list)           # (4, 4*Cin, Cout)
    m = n * h * wd

    if _lane_major(cout, m):
        y = fused_gemm(P, jnp.transpose(W, (0, 2, 1)), bias.reshape(1, cout, 1),
                       act, lane_major=True, out_dtype=out_dtype)        # (4, Cout, M)
        y = y.reshape(2, 2, cout, n, h, wd)
        y = jnp.transpose(y, (3, 4, 0, 5, 1, 2))       # (n, h, a, w, c, Cout)
    else:
        y = fused_gemm(P, W, bias.reshape(1, 1, cout),
                       act, lane_major=False, out_dtype=out_dtype)       # (4, M, Cout)
        y = y.reshape(2, 2, n, h, wd, cout)
        y = jnp.transpose(y, (2, 3, 0, 4, 1, 5))       # (n, h, a, w, c, Cout)
    # TODO(synk): write phases interleaved from the kernel (strided output index_map) so
    # this pixel-shuffle does not cost an extra XLA pass at large batch.
    return y.reshape(n, 2 * h, 2 * wd, cout)


# ----------------------------------------------------------------------------
# Autoencoder forward (matches the PyTorch module)
# ----------------------------------------------------------------------------
def autoencoder_forward(x_nchw, params):
    x = jnp.transpose(x_nchw, (0, 2, 3, 1)).astype(_BF16)   # NCHW -> NHWC, bf16 at rest
    for w, b in params["enc"]:
        x = conv2d(x, w, b, stride=2, pad=1, act="relu", out_dtype=_BF16)
    n_dec = len(params["dec"])
    for i, (w, b) in enumerate(params["dec"]):
        last = i == n_dec - 1
        x = conv_transpose2d(x, w, b, stride=2, pad=1,
                             act="tanh" if last else "relu",
                             out_dtype=jnp.float32 if last else _BF16)
    return jnp.transpose(x, (0, 3, 1, 2))                    # back to NCHW, f32


def init_params(key, latent_size):
    enc_io = [(32, 3), (64, 32), (128, 64), (256, 128), (latent_size, 256)]
    dec_io = [(latent_size, 256), (256, 128), (128, 64), (64, 32), (32, 3)]
    params = {"enc": [], "dec": []}
    for cout, cin in enc_io:
        key, k1, k2 = jax.random.split(key, 3)
        bound = 1.0 / (cin * 3 * 3) ** 0.5
        w = jax.random.uniform(k1, (cout, cin, 3, 3), jnp.float32, -bound, bound)
        b = jax.random.uniform(k2, (cout,), jnp.float32, -bound, bound)
        params["enc"].append((w, b))
    for cin, cout in dec_io:
        key, k1, k2 = jax.random.split(key, 3)
        bound = 1.0 / (cin * 4 * 4) ** 0.5
        w = jax.random.uniform(k1, (cin, cout, 4, 4), jnp.float32, -bound, bound)
        b = jax.random.uniform(k2, (cout,), jnp.float32, -bound, bound)
        params["dec"].append((w, b))
    return params


# ----------------------------------------------------------------------------
# Reference (lax convolutions) with matching quantization: f32 convs on bf16-rounded
# activations / weights, so it runs on any backend and tracks the kernel path tightly.
# ----------------------------------------------------------------------------
def reference_forward(x, params):
    dn = ("NCHW", "OIHW", "NCHW")
    q = lambda a: a.astype(_BF16).astype(jnp.float32)
    y = x
    for w, b in params["enc"]:
        y = jax.lax.conv_general_dilated(
            q(y), q(w), (2, 2), ((1, 1), (1, 1)), dimension_numbers=dn)
        y = jnp.maximum(y + b[None, :, None, None], 0.0)
    n_dec = len(params["dec"])
    for i, (w, b) in enumerate(params["dec"]):
        wf = jnp.transpose(w, (1, 0, 2, 3))[:, :, ::-1, ::-1]   # OIHW, flipped taps
        y = jax.lax.conv_general_dilated(
            q(y), q(wf), (1, 1), ((2, 2), (2, 2)),
            lhs_dilation=(2, 2), dimension_numbers=dn)
        y = y + b[None, :, None, None]
        y = jnp.tanh(y) if i == n_dec - 1 else jnp.maximum(y, 0.0)
    return y


if __name__ == "__main__":
    latent_size = 16
    key = jax.random.PRNGKey(0)
    kp, kx = jax.random.split(key)
    params = init_params(kp, latent_size)
    x = jax.random.normal(kx, (2, 3, 32, 32), jnp.float32)    # NCHW, like PyTorch

    fwd = jax.jit(autoencoder_forward)
    out = jax.block_until_ready(fwd(x, params))
    assert out.shape == (2, 3, 32, 32), out.shape

    ref = jax.block_until_ready(jax.jit(reference_forward)(x, params))
    max_err = float(jnp.max(jnp.abs(out - ref)))
    assert max_err < 1e-2, f"max abs err vs lax reference: {max_err}"

    print("KERNEL_OK")
</pallas_src>

<mosaic_0001>
module attributes {stable_mosaic.version = 11 : i64} {
  func.func @_gemm_bias_act_kernel(%arg0: i32, %arg1: memref<1x512x27xbf16, #tpu.memory_space<vmem>>, %arg2: memref<1x32x27xbf16, #tpu.memory_space<vmem>>, %arg3: memref<1x32x1xf32, #tpu.memory_space<vmem>>, %arg4: memref<1x32x512xbf16, #tpu.memory_space<vmem>>) attributes {dimension_semantics = [#tpu.dimension_semantics<parallel>], iteration_bounds = array<i64: 1>, scalar_prefetch = 0 : i64, scratch_operands = 0 : i64, tpu.core_type = #tpu.core_type<tc>, window_params = [{transform_indices = @transform_0, window_bounds = array<i64: 1, 512, 27>}, {transform_indices = @transform_1, window_bounds = array<i64: 1, 32, 27>}, {pipeline_mode = #tpu.pipeline_mode<synchronous>, transform_indices = @transform_2, window_bounds = array<i64: 1, 32, 1>}, {transform_indices = @transform_3, window_bounds = array<i64: 1, 32, 512>}]} {
    %c0 = arith.constant 0 : index
    %c0_0 = arith.constant 0 : index
    %c0_1 = arith.constant 0 : index
    %0 = vector.load %arg1[%c0, %c0_0, %c0_1] : memref<1x512x27xbf16, #tpu.memory_space<vmem>>, vector<1x512x27xbf16>
    %1 = vector.shape_cast %0 : vector<1x512x27xbf16> to vector<512x27xbf16>
    %2 = arith.extf %1 : vector<512x27xbf16> to vector<512x27xf32>
    %c0_2 = arith.constant 0 : index
    %c0_3 = arith.constant 0 : index
    %c0_4 = arith.constant 0 : index
    %3 = vector.load %arg2[%c0_2, %c0_3, %c0_4] : memref<1x32x27xbf16, #tpu.memory_space<vmem>>, vector<1x32x27xbf16>
    %4 = vector.shape_cast %3 : vector<1x32x27xbf16> to vector<32x27xbf16>
    %5 = arith.extf %4 : vector<32x27xbf16> to vector<32x27xf32>
    %cst = arith.constant dense<0.000000e+00> : vector<32x512xf32>
    %6 = tpu.matmul %5, %2, %cst {dimension_numbers = #tpu.dot_dimension_numbers<[1], [1], [0], [0], [0, 0, 1, 0], [], []>} : vector<32x27xf32>, vector<512x27xf32>, vector<32x512xf32> -> vector<32x512xf32>
    %c0_5 = arith.constant 0 : index
    %c0_6 = arith.constant 0 : index
    %c0_7 = arith.constant 0 : index
    %7 = vector.load %arg3[%c0_5, %c0_6, %c0_7] : memref<1x32x1xf32, #tpu.memory_space<vmem>>, vector<1x32x1xf32>
    %8 = vector.shape_cast %7 : vector<1x32x1xf32> to vector<32x1xf32>
    %9 = vector.broadcast %8 : vector<32x1xf32> to vector<32x512xf32>
    %10 = arith.addf %6, %9 : vector<32x512xf32>
    %cst_8 = arith.constant 0.000000e+00 : f32
    %11 = vector.broadcast %cst_8 : f32 to vector<32x512xf32>
    %12 = arith.maximumf %10, %11 : vector<32x512xf32>
    %13 = arith.truncf %12 : vector<32x512xf32> to vector<32x512xbf16>
    %c0_9 = arith.constant 0 : index
    %c0_10 = arith.constant 0 : index
    %c0_11 = arith.constant 0 : index
    %14 = vector.load %arg4[%c0_9, %c0_10, %c0_11] : memref<1x32x512xbf16, #tpu.memory_space<vmem>>, vector<1x32x512xbf16>
    %15 = vector.shape_cast %14 : vector<1x32x512xbf16> to vector<32x512xbf16>
    %16 = vector.shape_cast %13 : vector<32x512xbf16> to vector<1x32x512xbf16>
    tpu.vector_store %arg4[%c0_9, %c0_10, %c0_11], %16 {strides = array<i32>} : memref<1x32x512xbf16, #tpu.memory_space<vmem>>, vector<1x32x512xbf16>,
    return
  }
  func.func @transform_0(%arg0: i32) -> (i32, i32, i32) {
    %c0_i32 = arith.constant 0 : i32
    %c0_i32_0 = arith.constant 0 : i32
    %c0_i32_1 = arith.constant 0 : i32
    return %arg0, %c0_i32, %c0_i32_0 : i32, i32, i32
  }
  func.func @transform_1(%arg0: i32) -> (i32, i32, i32) {
    %c0_i32 = arith.constant 0 : i32
    %c0_i32_0 = arith.constant 0 : i32
    %c0_i32_1 = arith.constant 0 : i32
    return %arg0, %c0_i32, %c0_i32_0 : i32, i32, i32
  }
  func.func @transform_2(%arg0: i32) -> (i32, i32, i32) {
    %c0_i32 = arith.constant 0 : i32
    %c0_i32_0 = arith.constant 0 : i32
    %c0_i32_1 = arith.constant 0 : i32
    %c0_i32_2 = arith.constant 0 : i32
    return %c0_i32, %c0_i32_0, %c0_i32_1 : i32, i32, i32
  }
  func.func @transform_3(%arg0: i32) -> (i32, i32, i32) {
    %c0_i32 = arith.constant 0 : i32
    %c0_i32_0 = arith.constant 0 : i32
    %c0_i32_1 = arith.constant 0 : i32
    return %arg0, %c0_i32, %c0_i32_0 : i32, i32, i32
  }
}

module attributes {stable_mosaic.version = 11 : i64} {
  func.func @_gemm_bias_act_kernel(%arg0: i32, %arg1: memref<1x128x288xbf16, #tpu.memory_space<vmem>>, %arg2: memref<1x64x288xbf16, #tpu.memory_space<vmem>>, %arg3: memref<1x64x1xf32, #tpu.memory_space<vmem>>, %arg4: memref<1x64x128xbf16, #tpu.memory_space<vmem>>) attributes {dimension_semantics = [#tpu.dimension_semantics<parallel>], iteration_bounds = array<i64: 1>, scalar_prefetch = 0 : i64, scratch_operands = 0 : i64, tpu.core_type = #tpu.core_type<tc>, window_params = [{transform_indices = @transform_0, window_bounds = array<i64: 1, 128, 288>}, {transform_indices = @transform_1, window_bounds = array<i64: 1, 64, 288>}, {pipeline_mode = #tpu.pipeline_mode<synchronous>, transform_indices = @transform_2, window_bounds = array<i64: 1, 64, 1>}, {transform_indices = @transform_3, window_bounds = array<i64: 1, 64, 128>}]} {
    %c0 = arith.constant 0 : index
    %c0_0 = arith.constant 0 : index
    %c0_1 = arith.constant 0 : index
    %0 = vector.load %arg1[%c0, %c0_0, %c0_1] : memref<1x128x288xbf16, #tpu.memory_space<vmem>>, vector<1x128x288xbf16>
    %1 = vector.shape_cast %0 : vector<1x128x288xbf16> to vector<128x288xbf16>
    %2 = arith.extf %1 : vector<128x288xbf16> to vector<128x288xf32>
    %c0_2 = arith.constant 0 : index
    %c0_3 = arith.constant 0 : index
    %c0_4 = arith.constant 0 : index
    %3 = vector.load %arg2[%c0_2, %c0_3, %c0_4] : memref<1x64x288xbf16, #tpu.memory_space<vmem>>, vector<1x64x288xbf16>
    %4 = vector.shape_cast %3 : vector<1x64x288xbf16> to vector<64x288xbf16>
    %5 = arith.extf %4 : vector<64x288xbf16> to vector<64x288xf32>
    %cst = arith.constant dense<0.000000e+00> : vector<64x128xf32>
    %6 = tpu.matmul %5, %2, %cst {dimension_numbers = #tpu.dot_dimension_numbers<[1], [1], [0], [0], [0, 0, 1, 0], [], []>} : vector<64x288xf32>, vector<128x288xf32>, vector<64x128xf32> -> vector<64x128xf32>
    %c0_5 = arith.constant 0 : index
    %c0_6 = arith.constant 0 : index
    %c0_7 = arith.constant 0 : index
    %7 = vector.load %arg3[%c0_5, %c0_6, %c0_7] : memref<1x64x1xf32, #tpu.memory_space<vmem>>, vector<1x64x1xf32>
    %8 = vector.shape_cast %7 : vector<1x64x1xf32> to vector<64x1xf32>
    %9 = vector.broadcast %8 : vector<64x1xf32> to vector<64x128xf32>
    %10 = arith.addf %6, %9 : vector<64x128xf32>
    %cst_8 = arith.constant 0.000000e+00 : f32
    %11 = vector.broadcast %cst_8 : f32 to vector<64x128xf32>
    %12 = arith.maximumf %10, %11 : vector<64x128xf32>
    %13 = arith.truncf %12 : vector<64x128xf32> to vector<64x128xbf16>
    %c0_9 = arith.constant 0 : index
    %c0_10 = arith.constant 0 : index
    %c0_11 = arith.constant 0 : index
    %14 = vector.load %arg4[%c0_9, %c0_10, %c0_11] : memref<1x64x128xbf16, #tpu.memory_space<vmem>>, vector<1x64x128xbf16>
    %15 = vector.shape_cast %14 : vector<1x64x128xbf16> to vector<64x128xbf16>
    %16 = vector.shape_cast %13 : vector<64x128xbf16> to vector<1x64x128xbf16>
    tpu.vector_store %arg4[%c0_9, %c0_10, %c0_11], %16 {strides = array<i32>} : memref<1x64x128xbf16, #tpu.memory_space<vmem>>, vector<1x64x128xbf16>,
    return
  }
  func.func @transform_0(%arg0: i32) -> (i32, i32, i32) {
    %c0_i32 = arith.constant 0 : i32
    %c0_i32_0 = arith.constant 0 : i32
    %c0_i32_1 = arith.constant 0 : i32
    return %arg0, %c0_i32, %c0_i32_0 : i32, i32, i32
  }
  func.func @transform_1(%arg0: i32) -> (i32, i32, i32) {
    %c0_i32 = arith.constant 0 : i32
    %c0_i32_0 = arith.constant 0 : i32
    %c0_i32_1 = arith.constant 0 : i32
    return %arg0, %c0_i32, %c0_i32_0 : i32, i32, i32
  }
  func.func @transform_2(%arg0: i32) -> (i32, i32, i32) {
    %c0_i32 = arith.constant 0 : i32
    %c0_i32_0 = arith.constant 0 : i32
    %c0_i32_1 = arith.constant 0 : i32
    %c0_i32_2 = arith.constant 0 : i32
    return %c0_i32, %c0_i32_0, %c0_i32_1 : i32, i32, i32
  }
  func.func @transform_3(%arg0: i32) -> (i32, i32, i32) {
    %c0_i32 = arith.constant 0 : i32
    %c0_i32_0 = arith.constant 0 : i32
    %c0_i32_1 = arith.constant 0 : i32
    return %arg0, %c0_i32, %c0_i32_0 : i32, i32, i32
  }
}

module attributes {stable_mosaic.version = 11 : i64} {
  func.func @_gemm_bias_act_kernel(%arg0: i32, %arg1: memref<1x32x576xbf16, #tpu.memory_space<vmem>>, %arg2: memref<1x576x128xbf16, #tpu.memory_space<vmem>>, %arg3: memref<1x1x128xf32, #tpu.memory_space<vmem>>, %arg4: memref<1x32x128xbf16, #tpu.memory_space<vmem>>) attributes {dimension_semantics = [#tpu.dimension_semantics<parallel>], iteration_bounds = array<i64: 1>, scalar_prefetch = 0 : i64, scratch_operands = 0 : i64, tpu.core_type = #tpu.core_type<tc>, window_params = [{transform_indices = @transform_0, window_bounds = array<i64: 1, 32, 576>}, {transform_indices = @transform_1, window_bounds = array<i64: 1, 576, 128>}, {pipeline_mode = #tpu.pipeline_mode<synchronous>, transform_indices = @transform_2, window_bounds = array<i64: 1, 1, 128>}, {transform_indices = @transform_3, window_bounds = array<i64: 1, 32, 128>}]} {
    %c0 = arith.constant 0 : index
    %c0_0 = arith.constant 0 : index
    %c0_1 = arith.constant 0 : index
    %0 = vector.load %arg1[%c0, %c0_0, %c0_1] : memref<1x32x576xbf16, #tpu.memory_space<vmem>>, vector<1x32x576xbf16>
    %1 = vector.shape_cast %0 : vector<1x32x576xbf16> to vector<32x576xbf16>
    %2 = arith.extf %1 : vector<32x576xbf16> to vector<32x576xf32>
    %c0_2 = arith.constant 0 : index
    %c0_3 = arith.constant 0 : index
    %c0_4 = arith.constant 0 : index
    %3 = vector.load %arg2[%c0_2, %c0_3, %c0_4] : memref<1x576x128xbf16, #tpu.memory_space<vmem>>, vector<1x576x128xbf16>
    %4 = vector.shape_cast %3 : vector<1x576x128xbf16> to vector<576x128xbf16>
    %5 = arith.extf %4 : vector<576x128xbf16> to vector<576x128xf32>
    %cst = arith.constant dense<0.000000e+00> : vector<32x128xf32>
    %6 = tpu.matmul %2, %5, %cst {dimension_numbers = #tpu.dot_dimension_numbers<[1], [0], [0], [1], [0, 0, 1, 1], [], []>} : vector<32x576xf32>, vector<576x128xf32>, vector<32x128xf32> -> vector<32x128xf32>
    %c0_5 = arith.constant 0 : index
    %c0_6 = arith.constant 0 : index
    %c0_7 = arith.constant 0 : index
    %7 = vector.load %arg3[%c0_5, %c0_6, %c0_7] : memref<1x1x128xf32, #tpu.memory_space<vmem>>, vector<1x1x128xf32>
    %8 = vector.shape_cast %7 : vector<1x1x128xf32> to vector<1x128xf32>
    %9 = vector.broadcast %8 : vector<1x128xf32> to vector<32x128xf32>
    %10 = arith.addf %6, %9 : vector<32x128xf32>
    %cst_8 = arith.constant 0.000000e+00 : f32
    %11 = vector.broadcast %cst_8 : f32 to vector<32x128xf32>
    %12 = arith.maximumf %10, %11 : vector<32x128xf32>
    %13 = arith.truncf %12 : vector<32x128xf32> to vector<32x128xbf16>
    %c0_9 = arith.constant 0 : index
    %c0_10 = arith.constant 0 : index
    %c0_11 = arith.constant 0 : index
    %14 = vector.load %arg4[%c0_9, %c0_10, %c0_11] : memref<1x32x128xbf16, #tpu.memory_space<vmem>>, vector<1x32x128xbf16>
    %15 = vector.shape_cast %14 : vector<1x32x128xbf16> to vector<32x128xbf16>
    %16 = vector.shape_cast %13 : vector<32x128xbf16> to vector<1x32x128xbf16>
    tpu.vector_store %arg4[%c0_9, %c0_10, %c0_11], %16 {strides = array<i32>} : memref<1x32x128xbf16, #tpu.memory_space<vmem>>, vector<1x32x128xbf16>,
    return
  }
  func.func @transform_0(%arg0: i32) -> (i32, i32, i32) {
    %c0_i32 = arith.constant 0 : i32
    %c0_i32_0 = arith.constant 0 : i32
    %c0_i32_1 = arith.constant 0 : i32
    return %arg0, %c0_i32, %c0_i32_0 : i32, i32, i32
  }
  func.func @transform_1(%arg0: i32) -> (i32, i32, i32) {
    %c0_i32 = arith.constant 0 : i32
    %c0_i32_0 = arith.constant 0 : i32
    %c0_i32_1 = arith.constant 0 : i32
    return %arg0, %c0_i32, %c0_i32_0 : i32, i32, i32
  }
  func.func @transform_2(%arg0: i32) -> (i32, i32, i32) {
    %c0_i32 = arith.constant 0 : i32
    %c0_i32_0 = arith.constant 0 : i32
    %c0_i32_1 = arith.constant 0 : i32
    %c0_i32_2 = arith.constant 0 : i32
    return %c0_i32, %c0_i32_0, %c0_i32_1 : i32, i32, i32
  }
  func.func @transform_3(%arg0: i32) -> (i32, i32, i32) {
    %c0_i32 = arith.constant 0 : i32
    %c0_i32_0 = arith.constant 0 : i32
    %c0_i32_1 = arith.constant 0 : i32
    return %arg0, %c0_i32, %c0_i32_0 : i32, i32, i32
  }
}

module attributes {stable_mosaic.version = 11 : i64} {
  func.func @_gemm_bias_act_kernel(%arg0: i32, %arg1: memref<1x8x1152xbf16, #tpu.memory_space<vmem>>, %arg2: memref<1x1152x256xbf16, #tpu.memory_space<vmem>>, %arg3: memref<1x1x256xf32, #tpu.memory_space<vmem>>, %arg4: memref<1x8x256xbf16, #tpu.memory_space<vmem>>) attributes {dimension_semantics = [#tpu.dimension_semantics<parallel>], iteration_bounds = array<i64: 1>, scalar_prefetch = 0 : i64, scratch_operands = 0 : i64, tpu.core_type = #tpu.core_type<tc>, window_params = [{transform_indices = @transform_0, window_bounds = array<i64: 1, 8, 1152>}, {transform_indices = @transform_1, window_bounds = array<i64: 1, 1152, 256>}, {pipeline_mode = #tpu.pipeline_mode<synchronous>, transform_indices = @transform_2, window_bounds = array<i64: 1, 1, 256>}, {transform_indices = @transform_3, window_bounds = array<i64: 1, 8, 256>}]} {
    %c0 = arith.constant 0 : index
    %c0_0 = arith.constant 0 : index
    %c0_1 = arith.constant 0 : index
    %0 = vector.load %arg1[%c0, %c0_0, %c0_1] : memref<1x8x1152xbf16, #tpu.memory_space<vmem>>, vector<1x8x1152xbf16>
    %1 = vector.shape_cast %0 : vector<1x8x1152xbf16> to vector<8x1152xbf16>
    %2 = arith.extf %1 : vector<8x1152xbf16> to vector<8x1152xf32>
    %c0_2 = arith.constant 0 : index
    %c0_3 = arith.constant 0 : index
    %c0_4 = arith.constant 0 : index
    %3 = vector.load %arg2[%c0_2, %c0_3, %c0_4] : memref<1x1152x256xbf16, #tpu.memory_space<vmem>>, vector<1x1152x256xbf16>
    %4 = vector.shape_cast %3 : vector<1x1152x256xbf16> to vector<1152x256xbf16>
    %5 = arith.extf %4 : vector<1152x256xbf16> to vector<1152x256xf32>
    %cst = arith.constant dense<0.000000e+00> : vector<8x256xf32>
    %6 = tpu.matmul %2, %5, %cst {dimension_numbers = #tpu.dot_dimension_numbers<[1], [0], [0], [1], [0, 0, 1, 1], [], []>} : vector<8x1152xf32>, vector<1152x256xf32>, vector<8x256xf32> -> vector<8x256xf32>
    %c0_5 = arith.constant 0 : index
    %c0_6 = arith.constant 0 : index
    %c0_7 = arith.constant 0 : index
    %7 = vector.load %arg3[%c0_5, %c0_6, %c0_7] : memref<1x1x256xf32, #tpu.memory_space<vmem>>, vector<1x1x256xf32>
    %8 = vector.shape_cast %7 : vector<1x1x256xf32> to vector<1x256xf32>
    %9 = vector.broadcast %8 : vector<1x256xf32> to vector<8x256xf32>
    %10 = arith.addf %6, %9 : vector<8x256xf32>
    %cst_8 = arith.constant 0.000000e+00 : f32
    %11 = vector.broadcast %cst_8 : f32 to vector<8x256xf32>
    %12 = arith.maximumf %10, %11 : vector<8x256xf32>
    %13 = arith.truncf %12 : vector<8x256xf32> to vector<8x256xbf16>
    %c0_9 = arith.constant 0 : index
    %c0_10 = arith.constant 0 : index
    %c0_11 = arith.constant 0 : index
    %14 = vector.load %arg4[%c0_9, %c0_10, %c0_11] : memref<1x8x256xbf16, #tpu.memory_space<vmem>>, vector<1x8x256xbf16>
    %15 = vector.shape_cast %14 : vector<1x8x256xbf16> to vector<8x256xbf16>
    %16 = vector.shape_cast %13 : vector<8x256xbf16> to vector<1x8x256xbf16>
    tpu.vector_store %arg4[%c0_9, %c0_10, %c0_11], %16 {strides = array<i32>} : memref<1x8x256xbf16, #tpu.memory_space<vmem>>, vector<1x8x256xbf16>,
    return
  }
  func.func @transform_0(%arg0: i32) -> (i32, i32, i32) {
    %c0_i32 = arith.constant 0 : i32
    %c0_i32_0 = arith.constant 0 : i32
    %c0_i32_1 = arith.constant 0 : i32
    return %arg0, %c0_i32, %c0_i32_0 : i32, i32, i32
  }
  func.func @transform_1(%arg0: i32) -> (i32, i32, i32) {
    %c0_i32 = arith.constant 0 : i32
    %c0_i32_0 = arith.constant 0 : i32
    %c0_i32_1 = arith.constant 0 : i32
    return %arg0, %c0_i32, %c0_i32_0 : i32, i32, i32
  }
  func.func @transform_2(%arg0: i32) -> (i32, i32, i32) {
    %c0_i32 = arith.constant 0 : i32
    %c0_i32_0 = arith.constant 0 : i32
    %c0_i32_1 = arith.constant 0 : i32
    %c0_i32_2 = arith.constant 0 : i32
    return %c0_i32, %c0_i32_0, %c0_i32_1 : i32, i32, i32
  }
  func.func @transform_3(%arg0: i32) -> (i32, i32, i32) {
    %c0_i32 = arith.constant 0 : i32
    %c0_i32_0 = arith.constant 0 : i32
    %c0_i32_1 = arith.constant 0 : i32
    return %arg0, %c0_i32, %c0_i32_0 : i32, i32, i32
  }
}

module attributes {stable_mosaic.version = 11 : i64} {
  func.func @_gemm_bias_act_kernel(%arg0: i32, %arg1: memref<1x2x2304xbf16, #tpu.memory_space<vmem>>, %arg2: memref<1x2304x16xbf16, #tpu.memory_space<vmem>>, %arg3: memref<1x1x16xf32, #tpu.memory_space<vmem>>, %arg4: memref<1x2x16xbf16, #tpu.memory_space<vmem>>) attributes {dimension_semantics = [#tpu.dimension_semantics<parallel>], iteration_bounds = array<i64: 1>, scalar_prefetch = 0 : i64, scratch_operands = 0 : i64, tpu.core_type = #tpu.core_type<tc>, window_params = [{transform_indices = @transform_0, window_bounds = array<i64: 1, 2, 2304>}, {transform_indices = @transform_1, window_bounds = array<i64: 1, 2304, 16>}, {pipeline_mode = #tpu.pipeline_mode<synchronous>, transform_indices = @transform_2, window_bounds = array<i64: 1, 1, 16>}, {transform_indices = @transform_3, window_bounds = array<i64: 1, 2, 16>}]} {
    %c0 = arith.constant 0 : index
    %c0_0 = arith.constant 0 : index
    %c0_1 = arith.constant 0 : index
    %0 = vector.load %arg1[%c0, %c0_0, %c0_1] : memref<1x2x2304xbf16, #tpu.memory_space<vmem>>, vector<1x2x2304xbf16>
    %1 = vector.shape_cast %0 : vector<1x2x2304xbf16> to vector<2x2304xbf16>
    %2 = arith.extf %1 : vector<2x2304xbf16> to vector<2x2304xf32>
    %c0_2 = arith.constant 0 : index
    %c0_3 = arith.constant 0 : index
    %c0_4 = arith.constant 0 : index
    %3 = vector.load %arg2[%c0_2, %c0_3, %c0_4] : memref<1x2304x16xbf16, #tpu.memory_space<vmem>>, vector<1x2304x16xbf16>
    %4 = vector.shape_cast %3 : vector<1x2304x16xbf16> to vector<2304x16xbf16>
    %5 = arith.extf %4 : vector<2304x16xbf16> to vector<2304x16xf32>
    %cst = arith.constant dense<0.000000e+00> : vector<2x16xf32>
    %6 = tpu.matmul %2, %5, %cst {dimension_numbers = #tpu.dot_dimension_numbers<[1], [0], [0], [1], [0, 0, 1, 1], [], []>} : vector<2x2304xf32>, vector<2304x16xf32>, vector<2x16xf32> -> vector<2x16xf32>
    %c0_5 = arith.constant 0 : index
    %c0_6 = arith.constant 0 : index
    %c0_7 = arith.constant 0 : index
    %7 = vector.load %arg3[%c0_5, %c0_6, %c0_7] : memref<1x1x16xf32, #tpu.memory_space<vmem>>, vector<1x1x16xf32>
    %8 = vector.shape_cast %7 : vector<1x1x16xf32> to vector<1x16xf32>
    %9 = vector.broadcast %8 : vector<1x16xf32> to vector<2x16xf32>
    %10 = arith.addf %6, %9 : vector<2x16xf32>
    %cst_8 = arith.constant 0.000000e+00 : f32
    %11 = vector.broadcast %cst_8 : f32 to vector<2x16xf32>
    %12 = arith.maximumf %10, %11 : vector<2x16xf32>
    %13 = arith.truncf %12 : vector<2x16xf32> to vector<2x16xbf16>
    %c0_9 = arith.constant 0 : index
    %c0_10 = arith.constant 0 : index
    %c0_11 = arith.constant 0 : index
    %14 = vector.load %arg4[%c0_9, %c0_10, %c0_11] : memref<1x2x16xbf16, #tpu.memory_space<vmem>>, vector<1x2x16xbf16>
    %15 = vector.shape_cast %14 : vector<1x2x16xbf16> to vector<2x16xbf16>
    %16 = vector.shape_cast %13 : vector<2x16xbf16> to vector<1x2x16xbf16>
    tpu.vector_store %arg4[%c0_9, %c0_10, %c0_11], %16 {strides = array<i32>} : memref<1x2x16xbf16, #tpu.memory_space<vmem>>, vector<1x2x16xbf16>,
    return
  }
  func.func @transform_0(%arg0: i32) -> (i32, i32, i32) {
    %c0_i32 = arith.constant 0 : i32
    %c0_i32_0 = arith.constant 0 : i32
    %c0_i32_1 = arith.constant 0 : i32
    return %arg0, %c0_i32, %c0_i32_0 : i32, i32, i32
  }
  func.func @transform_1(%arg0: i32) -> (i32, i32, i32) {
    %c0_i32 = arith.constant 0 : i32
    %c0_i32_0 = arith.constant 0 : i32
    %c0_i32_1 = arith.constant 0 : i32
    return %arg0, %c0_i32, %c0_i32_0 : i32, i32, i32
  }
  func.func @transform_2(%arg0: i32) -> (i32, i32, i32) {
    %c0_i32 = arith.constant 0 : i32
    %c0_i32_0 = arith.constant 0 : i32
    %c0_i32_1 = arith.constant 0 : i32
    %c0_i32_2 = arith.constant 0 : i32
    return %c0_i32, %c0_i32_0, %c0_i32_1 : i32, i32, i32
  }
  func.func @transform_3(%arg0: i32) -> (i32, i32, i32) {
    %c0_i32 = arith.constant 0 : i32
    %c0_i32_0 = arith.constant 0 : i32
    %c0_i32_1 = arith.constant 0 : i32
    return %arg0, %c0_i32, %c0_i32_0 : i32, i32, i32
  }
}

module attributes {stable_mosaic.version = 11 : i64} {
  func.func @_gemm_bias_act_kernel(%arg0: i32, %arg1: memref<1x2x64xbf16, #tpu.memory_space<vmem>>, %arg2: memref<1x64x256xbf16, #tpu.memory_space<vmem>>, %arg3: memref<1x1x256xf32, #tpu.memory_space<vmem>>, %arg4: memref<1x2x256xbf16, #tpu.memory_space<vmem>>) attributes {dimension_semantics = [#tpu.dimension_semantics<parallel>], iteration_bounds = array<i64: 4>, scalar_prefetch = 0 : i64, scratch_operands = 0 : i64, tpu.core_type = #tpu.core_type<tc>, window_params = [{transform_indices = @transform_0, window_bounds = array<i64: 1, 2, 64>}, {transform_indices = @transform_1, window_bounds = array<i64: 1, 64, 256>}, {pipeline_mode = #tpu.pipeline_mode<synchronous>, transform_indices = @transform_2, window_bounds = array<i64: 1, 1, 256>}, {transform_indices = @transform_3, window_bounds = array<i64: 1, 2, 256>}]} {
    %c0 = arith.constant 0 : index
    %c0_0 = arith.constant 0 : index
    %c0_1 = arith.constant 0 : index
    %0 = vector.load %arg1[%c0, %c0_0, %c0_1] : memref<1x2x64xbf16, #tpu.memory_space<vmem>>, vector<1x2x64xbf16>
    %1 = vector.shape_cast %0 : vector<1x2x64xbf16> to vector<2x64xbf16>
    %2 = arith.extf %1 : vector<2x64xbf16> to vector<2x64xf32>
    %c0_2 = arith.constant 0 : index
    %c0_3 = arith.constant 0 : index
    %c0_4 = arith.constant 0 : index
    %3 = vector.load %arg2[%c0_2, %c0_3, %c0_4] : memref<1x64x256xbf16, #tpu.memory_space<vmem>>, vector<1x64x256xbf16>
    %4 = vector.shape_cast %3 : vector<1x64x256xbf16> to vector<64x256xbf16>
    %5 = arith.extf %4 : vector<64x256xbf16> to vector<64x256xf32>
    %cst = arith.constant dense<0.000000e+00> : vector<2x256xf32>
    %6 = tpu.matmul %2, %5, %cst {dimension_numbers = #tpu.dot_dimension_numbers<[1], [0], [0], [1], [0, 0, 1, 1], [], []>} : vector<2x64xf32>, vector<64x256xf32>, vector<2x256xf32> -> vector<2x256xf32>
    %c0_5 = arith.constant 0 : index
    %c0_6 = arith.constant 0 : index
    %c0_7 = arith.constant 0 : index
    %7 = vector.load %arg3[%c0_5, %c0_6, %c0_7] : memref<1x1x256xf32, #tpu.memory_space<vmem>>, vector<1x1x256xf32>
    %8 = vector.shape_cast %7 : vector<1x1x256xf32> to vector<1x256xf32>
    %9 = vector.broadcast %8 : vector<1x256xf32> to vector<2x256xf32>
    %10 = arith.addf %6, %9 : vector<2x256xf32>
    %cst_8 = arith.constant 0.000000e+00 : f32
    %11 = vector.broadcast %cst_8 : f32 to vector<2x256xf32>
    %12 = arith.maximumf %10, %11 : vector<2x256xf32>
    %13 = arith.truncf %12 : vector<2x256xf32> to vector<2x256xbf16>
    %c0_9 = arith.constant 0 : index
    %c0_10 = arith.constant 0 : index
    %c0_11 = arith.constant 0 : index
    %14 = vector.load %arg4[%c0_9, %c0_10, %c0_11] : memref<1x2x256xbf16, #tpu.memory_space<vmem>>, vector<1x2x256xbf16>
    %15 = vector.shape_cast %14 : vector<1x2x256xbf16> to vector<2x256xbf16>
    %16 = vector.shape_cast %13 : vector<2x256xbf16> to vector<1x2x256xbf16>
    tpu.vector_store %arg4[%c0_9, %c0_10, %c0_11], %16 {strides = array<i32>} : memref<1x2x256xbf16, #tpu.memory_space<vmem>>, vector<1x2x256xbf16>,
    return
  }
  func.func @transform_0(%arg0: i32) -> (i32, i32, i32) {
    %c0_i32 = arith.constant 0 : i32
    %c0_i32_0 = arith.constant 0 : i32
    %c0_i32_1 = arith.constant 0 : i32
    return %arg0, %c0_i32, %c0_i32_0 : i32, i32, i32
  }
  func.func @transform_1(%arg0: i32) -> (i32, i32, i32) {
    %c0_i32 = arith.constant 0 : i32
    %c0_i32_0 = arith.constant 0 : i32
    %c0_i32_1 = arith.constant 0 : i32
    return %arg0, %c0_i32, %c0_i32_0 : i32, i32, i32
  }
  func.func @transform_2(%arg0: i32) -> (i32, i32, i32) {
    %c0_i32 = arith.constant 0 : i32
    %c0_i32_0 = arith.constant 0 : i32
    %c0_i32_1 = arith.constant 0 : i32
    %c0_i32_2 = arith.constant 0 : i32
    return %c0_i32, %c0_i32_0, %c0_i32_1 : i32, i32, i32
  }
  func.func @transform_3(%arg0: i32) -> (i32, i32, i32) {
    %c0_i32 = arith.constant 0 : i32
    %c0_i32_0 = arith.constant 0 : i32
    %c0_i32_1 = arith.constant 0 : i32
    return %arg0, %c0_i32, %c0_i32_0 : i32, i32, i32
  }
}

module attributes {stable_mosaic.version = 11 : i64} {
  func.func @_gemm_bias_act_kernel(%arg0: i32, %arg1: memref<1x8x1024xbf16, #tpu.memory_space<vmem>>, %arg2: memref<1x1024x128xbf16, #tpu.memory_space<vmem>>, %arg3: memref<1x1x128xf32, #tpu.memory_space<vmem>>, %arg4: memref<1x8x128xbf16, #tpu.memory_space<vmem>>) attributes {dimension_semantics = [#tpu.dimension_semantics<parallel>], iteration_bounds = array<i64: 4>, scalar_prefetch = 0 : i64, scratch_operands = 0 : i64, tpu.core_type = #tpu.core_type<tc>, window_params = [{transform_indices = @transform_0, window_bounds = array<i64: 1, 8, 1024>}, {transform_indices = @transform_1, window_bounds = array<i64: 1, 1024, 128>}, {pipeline_mode = #tpu.pipeline_mode<synchronous>, transform_indices = @transform_2, window_bounds = array<i64: 1, 1, 128>}, {transform_indices = @transform_3, window_bounds = array<i64: 1, 8, 128>}]} {
    %c0 = arith.constant 0 : index
    %c0_0 = arith.constant 0 : index
    %c0_1 = arith.constant 0 : index
    %0 = vector.load %arg1[%c0, %c0_0, %c0_1] : memref<1x8x1024xbf16, #tpu.memory_space<vmem>>, vector<1x8x1024xbf16>
    %1 = vector.shape_cast %0 : vector<1x8x1024xbf16> to vector<8x1024xbf16>
    %2 = arith.extf %1 : vector<8x1024xbf16> to vector<8x1024xf32>
    %c0_2 = arith.constant 0 : index
    %c0_3 = arith.constant 0 : index
    %c0_4 = arith.constant 0 : index
    %3 = vector.load %arg2[%c0_2, %c0_3, %c0_4] : memref<1x1024x128xbf16, #tpu.memory_space<vmem>>, vector<1x1024x128xbf16>
    %4 = vector.shape_cast %3 : vector<1x1024x128xbf16> to vector<1024x128xbf16>
    %5 = arith.extf %4 : vector<1024x128xbf16> to vector<1024x128xf32>
    %cst = arith.constant dense<0.000000e+00> : vector<8x128xf32>
    %6 = tpu.matmul %2, %5, %cst {dimension_numbers = #tpu.dot_dimension_numbers<[1], [0], [0], [1], [0, 0, 1, 1], [], []>} : vector<8x1024xf32>, vector<1024x128xf32>, vector<8x128xf32> -> vector<8x128xf32>
    %c0_5 = arith.constant 0 : index
    %c0_6 = arith.constant 0 : index
    %c0_7 = arith.constant 0 : index
    %7 = vector.load %arg3[%c0_5, %c0_6, %c0_7] : memref<1x1x128xf32, #tpu.memory_space<vmem>>, vector<1x1x128xf32>
    %8 = vector.shape_cast %7 : vector<1x1x128xf32> to vector<1x128xf32>
    %9 = vector.broadcast %8 : vector<1x128xf32> to vector<8x128xf32>
    %10 = arith.addf %6, %9 : vector<8x128xf32>
    %cst_8 = arith.constant 0.000000e+00 : f32
    %11 = vector.broadcast %cst_8 : f32 to vector<8x128xf32>
    %12 = arith.maximumf %10, %11 : vector<8x128xf32>
    %13 = arith.truncf %12 : vector<8x128xf32> to vector<8x128xbf16>
    %c0_9 = arith.constant 0 : index
    %c0_10 = arith.constant 0 : index
    %c0_11 = arith.constant 0 : index
    %14 = vector.load %arg4[%c0_9, %c0_10, %c0_11] : memref<1x8x128xbf16, #tpu.memory_space<vmem>>, vector<1x8x128xbf16>
    %15 = vector.shape_cast %14 : vector<1x8x128xbf16> to vector<8x128xbf16>
    %16 = vector.shape_cast %13 : vector<8x128xbf16> to vector<1x8x128xbf16>
    tpu.vector_store %arg4[%c0_9, %c0_10, %c0_11], %16 {strides = array<i32>} : memref<1x8x128xbf16, #tpu.memory_space<vmem>>, vector<1x8x128xbf16>,
    return
  }
  func.func @transform_0(%arg0: i32) -> (i32, i32, i32) {
    %c0_i32 = arith.constant 0 : i32
    %c0_i32_0 = arith.constant 0 : i32
    %c0_i32_1 = arith.constant 0 : i32
    return %arg0, %c0_i32, %c0_i32_0 : i32, i32, i32
  }
  func.func @transform_1(%arg0: i32) -> (i32, i32, i32) {
    %c0_i32 = arith.constant 0 : i32
    %c0_i32_0 = arith.constant 0 : i32
    %c0_i32_1 = arith.constant 0 : i32
    return %arg0, %c0_i32, %c0_i32_0 : i32, i32, i32
  }
  func.func @transform_2(%arg0: i32) -> (i32, i32, i32) {
    %c0_i32 = arith.constant 0 : i32
    %c0_i32_0 = arith.constant 0 : i32
    %c0_i32_1 = arith.constant 0 : i32
    %c0_i32_2 = arith.constant 0 : i32
    return %c0_i32, %c0_i32_0, %c0_i32_1 : i32, i32, i32
  }
  func.func @transform_3(%arg0: i32) -> (i32, i32, i32) {
    %c0_i32 = arith.constant 0 : i32
    %c0_i32_0 = arith.constant 0 : i32
    %c0_i32_1 = arith.constant 0 : i32
    return %arg0, %c0_i32, %c0_i32_0 : i32, i32, i32
  }
}

module attributes {stable_mosaic.version = 11 : i64} {
  func.func @_gemm_bias_act_kernel(%arg0: i32, %arg1: memref<1x32x512xbf16, #tpu.memory_space<vmem>>, %arg2: memref<1x512x64xbf16, #tpu.memory_space<vmem>>, %arg3: memref<1x1x64xf32, #tpu.memory_space<vmem>>, %arg4: memref<1x32x64xbf16, #tpu.memory_space<vmem>>) attributes {dimension_semantics = [#tpu.dimension_semantics<parallel>], iteration_bounds = array<i64: 4>, scalar_prefetch = 0 : i64, scratch_operands = 0 : i64, tpu.core_type = #tpu.core_type<tc>, window_params = [{transform_indices = @transform_0, window_bounds = array<i64: 1, 32, 512>}, {transform_indices = @transform_1, window_bounds = array<i64: 1, 512, 64>}, {pipeline_mode = #tpu.pipeline_mode<synchronous>, transform_indices = @transform_2, window_bounds = array<i64: 1, 1, 64>}, {transform_indices = @transform_3, window_bounds = array<i64: 1, 32, 64>}]} {
    %c0 = arith.constant 0 : index
    %c0_0 = arith.constant 0 : index
    %c0_1 = arith.constant 0 : index
    %0 = vector.load %arg1[%c0, %c0_0, %c0_1] : memref<1x32x512xbf16, #tpu.memory_space<vmem>>, vector<1x32x512xbf16>
    %1 = vector.shape_cast %0 : vector<1x32x512xbf16> to vector<32x512xbf16>
    %2 = arith.extf %1 : vector<32x512xbf16> to vector<32x512xf32>
    %c0_2 = arith.constant 0 : index
    %c0_3 = arith.constant 0 : index
    %c0_4 = arith.constant 0 : index
    %3 = vector.load %arg2[%c0_2, %c0_3, %c0_4] : memref<1x512x64xbf16, #tpu.memory_space<vmem>>, vector<1x512x64xbf16>
    %4 = vector.shape_cast %3 : vector<1x512x64xbf16> to vector<512x64xbf16>
    %5 = arith.extf %4 : vector<512x64xbf16> to vector<512x64xf32>
    %cst = arith.constant dense<0.000000e+00> : vector<32x64xf32>
    %6 = tpu.matmul %2, %5, %cst {dimension_numbers = #tpu.dot_dimension_numbers<[1], [0], [0], [1], [0, 0, 1, 1], [], []>} : vector<32x512xf32>, vector<512x64xf32>, vector<32x64xf32> -> vector<32x64xf32>
    %c0_5 = arith.constant 0 : index
    %c0_6 = arith.constant 0 : index
    %c0_7 = arith.constant 0 : index
    %7 = vector.load %arg3[%c0_5, %c0_6, %c0_7] : memref<1x1x64xf32, #tpu.memory_space<vmem>>, vector<1x1x64xf32>
    %8 = vector.shape_cast %7 : vector<1x1x64xf32> to vector<1x64xf32>
    %9 = vector.broadcast %8 : vector<1x64xf32> to vector<32x64xf32>
    %10 = arith.addf %6, %9 : vector<32x64xf32>
    %cst_8 = arith.constant 0.000000e+00 : f32
    %11 = vector.broadcast %cst_8 : f32 to vector<32x64xf32>
    %12 = arith.maximumf %10, %11 : vector<32x64xf32>
    %13 = arith.truncf %12 : vector<32x64xf32> to vector<32x64xbf16>
    %c0_9 = arith.constant 0 : index
    %c0_10 = arith.constant 0 : index
    %c0_11 = arith.constant 0 : index
    %14 = vector.load %arg4[%c0_9, %c0_10, %c0_11] : memref<1x32x64xbf16, #tpu.memory_space<vmem>>, vector<1x32x64xbf16>
    %15 = vector.shape_cast %14 : vector<1x32x64xbf16> to vector<32x64xbf16>
    %16 = vector.shape_cast %13 : vector<32x64xbf16> to vector<1x32x64xbf16>
    tpu.vector_store %arg4[%c0_9, %c0_10, %c0_11], %16 {strides = array<i32>} : memref<1x32x64xbf16, #tpu.memory_space<vmem>>, vector<1x32x64xbf16>,
    return
  }
  func.func @transform_0(%arg0: i32) -> (i32, i32, i32) {
    %c0_i32 = arith.constant 0 : i32
    %c0_i32_0 = arith.constant 0 : i32
    %c0_i32_1 = arith.constant 0 : i32
    return %arg0, %c0_i32, %c0_i32_0 : i32, i32, i32
  }
  func.func @transform_1(%arg0: i32) -> (i32, i32, i32) {
    %c0_i32 = arith.constant 0 : i32
    %c0_i32_0 = arith.constant 0 : i32
    %c0_i32_1 = arith.constant 0 : i32
    return %arg0, %c0_i32, %c0_i32_0 : i32, i32, i32
  }
  func.func @transform_2(%arg0: i32) -> (i32, i32, i32) {
    %c0_i32 = arith.constant 0 : i32
    %c0_i32_0 = arith.constant 0 : i32
    %c0_i32_1 = arith.constant 0 : i32
    %c0_i32_2 = arith.constant 0 : i32
    return %c0_i32, %c0_i32_0, %c0_i32_1 : i32, i32, i32
  }
  func.func @transform_3(%arg0: i32) -> (i32, i32, i32) {
    %c0_i32 = arith.constant 0 : i32
    %c0_i32_0 = arith.constant 0 : i32
    %c0_i32_1 = arith.constant 0 : i32
    return %arg0, %c0_i32, %c0_i32_0 : i32, i32, i32
  }
}

module attributes {stable_mosaic.version = 11 : i64} {
  func.func @_gemm_bias_act_kernel(%arg0: i32, %arg1: memref<1x128x256xbf16, #tpu.memory_space<vmem>>, %arg2: memref<1x32x256xbf16, #tpu.memory_space<vmem>>, %arg3: memref<1x32x1xf32, #tpu.memory_space<vmem>>, %arg4: memref<1x32x128xbf16, #tpu.memory_space<vmem>>) attributes {dimension_semantics = [#tpu.dimension_semantics<parallel>], iteration_bounds = array<i64: 4>, scalar_prefetch = 0 : i64, scratch_operands = 0 : i64, tpu.core_type = #tpu.core_type<tc>, window_params = [{transform_indices = @transform_0, window_bounds = array<i64: 1, 128, 256>}, {transform_indices = @transform_1, window_bounds = array<i64: 1, 32, 256>}, {pipeline_mode = #tpu.pipeline_mode<synchronous>, transform_indices = @transform_2, window_bounds = array<i64: 1, 32, 1>}, {transform_indices = @transform_3, window_bounds = array<i64: 1, 32, 128>}]} {
    %c0 = arith.constant 0 : index
    %c0_0 = arith.constant 0 : index
    %c0_1 = arith.constant 0 : index
    %0 = vector.load %arg1[%c0, %c0_0, %c0_1] : memref<1x128x256xbf16, #tpu.memory_space<vmem>>, vector<1x128x256xbf16>
    %1 = vector.shape_cast %0 : vector<1x128x256xbf16> to vector<128x256xbf16>
    %2 = arith.extf %1 : vector<128x256xbf16> to vector<128x256xf32>
    %c0_2 = arith.constant 0 : index
    %c0_3 = arith.constant 0 : index
    %c0_4 = arith.constant 0 : index
    %3 = vector.load %arg2[%c0_2, %c0_3, %c0_4] : memref<1x32x256xbf16, #tpu.memory_space<vmem>>, vector<1x32x256xbf16>
    %4 = vector.shape_cast %3 : vector<1x32x256xbf16> to vector<32x256xbf16>
    %5 = arith.extf %4 : vector<32x256xbf16> to vector<32x256xf32>
    %cst = arith.constant dense<0.000000e+00> : vector<32x128xf32>
    %6 = tpu.matmul %5, %2, %cst {dimension_numbers = #tpu.dot_dimension_numbers<[1], [1], [0], [0], [0, 0, 1, 0], [], []>} : vector<32x256xf32>, vector<128x256xf32>, vector<32x128xf32> -> vector<32x128xf32>
    %c0_5 = arith.constant 0 : index
    %c0_6 = arith.constant 0 : index
    %c0_7 = arith.constant 0 : index
    %7 = vector.load %arg3[%c0_5, %c0_6, %c0_7] : memref<1x32x1xf32, #tpu.memory_space<vmem>>, vector<1x32x1xf32>
    %8 = vector.shape_cast %7 : vector<1x32x1xf32> to vector<32x1xf32>
    %9 = vector.broadcast %8 : vector<32x1xf32> to vector<32x128xf32>
    %10 = arith.addf %6, %9 : vector<32x128xf32>
    %cst_8 = arith.constant 0.000000e+00 : f32
    %11 = vector.broadcast %cst_8 : f32 to vector<32x128xf32>
    %12 = arith.maximumf %10, %11 : vector<32x128xf32>
    %13 = arith.truncf %12 : vector<32x128xf32> to vector<32x128xbf16>
    %c0_9 = arith.constant 0 : index
    %c0_10 = arith.constant 0 : index
    %c0_11 = arith.constant 0 : index
    %14 = vector.load %arg4[%c0_9, %c0_10, %c0_11] : memref<1x32x128xbf16, #tpu.memory_space<vmem>>, vector<1x32x128xbf16>
    %15 = vector.shape_cast %14 : vector<1x32x128xbf16> to vector<32x128xbf16>
    %16 = vector.shape_cast %13 : vector<32x128xbf16> to vector<1x32x128xbf16>
    tpu.vector_store %arg4[%c0_9, %c0_10, %c0_11], %16 {strides = array<i32>} : memref<1x32x128xbf16, #tpu.memory_space<vmem>>, vector<1x32x128xbf16>,
    return
  }
  func.func @transform_0(%arg0: i32) -> (i32, i32, i32) {
    %c0_i32 = arith.constant 0 : i32
    %c0_i32_0 = arith.constant 0 : i32
    %c0_i32_1 = arith.constant 0 : i32
    return %arg0, %c0_i32, %c0_i32_0 : i32, i32, i32
  }
  func.func @transform_1(%arg0: i32) -> (i32, i32, i32) {
    %c0_i32 = arith.constant 0 : i32
    %c0_i32_0 = arith.constant 0 : i32
    %c0_i32_1 = arith.constant 0 : i32
    return %arg0, %c0_i32, %c0_i32_0 : i32, i32, i32
  }
  func.func @transform_2(%arg0: i32) -> (i32, i32, i32) {
    %c0_i32 = arith.constant 0 : i32
    %c0_i32_0 = arith.constant 0 : i32
    %c0_i32_1 = arith.constant 0 : i32
    %c0_i32_2 = arith.constant 0 : i32
    return %c0_i32, %c0_i32_0, %c0_i32_1 : i32, i32, i32
  }
  func.func @transform_3(%arg0: i32) -> (i32, i32, i32) {
    %c0_i32 = arith.constant 0 : i32
    %c0_i32_0 = arith.constant 0 : i32
    %c0_i32_1 = arith.constant 0 : i32
    return %arg0, %c0_i32, %c0_i32_0 : i32, i32, i32
  }
}

module attributes {stable_mosaic.version = 11 : i64} {
  func.func @_gemm_bias_act_kernel(%arg0: i32, %arg1: memref<1x512x128xbf16, #tpu.memory_space<vmem>>, %arg2: memref<1x3x128xbf16, #tpu.memory_space<vmem>>, %arg3: memref<1x3x1xf32, #tpu.memory_space<vmem>>, %arg4: memref<1x3x512xf32, #tpu.memory_space<vmem>>) attributes {dimension_semantics = [#tpu.dimension_semantics<parallel>], iteration_bounds = array<i64: 4>, scalar_prefetch = 0 : i64, scratch_operands = 0 : i64, tpu.core_type = #tpu.core_type<tc>, window_params = [{transform_indices = @transform_0, window_bounds = array<i64: 1, 512, 128>}, {transform_indices = @transform_1, window_bounds = array<i64: 1, 3, 128>}, {pipeline_mode = #tpu.pipeline_mode<synchronous>, transform_indices = @transform_2, window_bounds = array<i64: 1, 3, 1>}, {transform_indices = @transform_3, window_bounds = array<i64: 1, 3, 512>}]} {
    %c0 = arith.constant 0 : index
    %c0_0 = arith.constant 0 : index
    %c0_1 = arith.constant 0 : index
    %0 = vector.load %arg1[%c0, %c0_0, %c0_1] : memref<1x512x128xbf16, #tpu.memory_space<vmem>>, vector<1x512x128xbf16>
    %1 = vector.shape_cast %0 : vector<1x512x128xbf16> to vector<512x128xbf16>
    %2 = arith.extf %1 : vector<512x128xbf16> to vector<512x128xf32>
    %c0_2 = arith.constant 0 : index
    %c0_3 = arith.constant 0 : index
    %c0_4 = arith.constant 0 : index
    %3 = vector.load %arg2[%c0_2, %c0_3, %c0_4] : memref<1x3x128xbf16, #tpu.memory_space<vmem>>, vector<1x3x128xbf16>
    %4 = vector.shape_cast %3 : vector<1x3x128xbf16> to vector<3x128xbf16>
    %5 = arith.extf %4 : vector<3x128xbf16> to vector<3x128xf32>
    %cst = arith.constant dense<0.000000e+00> : vector<3x512xf32>
    %6 = tpu.matmul %5, %2, %cst {dimension_numbers = #tpu.dot_dimension_numbers<[1], [1], [0], [0], [0, 0, 1, 0], [], []>} : vector<3x128xf32>, vector<512x128xf32>, vector<3x512xf32> -> vector<3x512xf32>
    %c0_5 = arith.constant 0 : index
    %c0_6 = arith.constant 0 : index
    %c0_7 = arith.constant 0 : index
    %7 = vector.load %arg3[%c0_5, %c0_6, %c0_7] : memref<1x3x1xf32, #tpu.memory_space<vmem>>, vector<1x3x1xf32>
    %8 = vector.shape_cast %7 : vector<1x3x1xf32> to vector<3x1xf32>
    %9 = vector.broadcast %8 : vector<3x1xf32> to vector<3x512xf32>
    %10 = arith.addf %6, %9 : vector<3x512xf32>
    %11 = math.tanh %10 : vector<3x512xf32>
    %c0_8 = arith.constant 0 : index
    %c0_9 = arith.constant 0 : index
    %c0_10 = arith.constant 0 : index
    %12 = vector.load %arg4[%c0_8, %c0_9, %c0_10] : memref<1x3x512xf32, #tpu.memory_space<vmem>>, vector<1x3x512xf32>
    %13 = vector.shape_cast %12 : vector<1x3x512xf32> to vector<3x512xf32>
    %14 = vector.shape_cast %11 : vector<3x512xf32> to vector<1x3x512xf32>
    tpu.vector_store %arg4[%c0_8, %c0_9, %c0_10], %14 {strides = array<i32>} : memref<1x3x512xf32, #tpu.memory_space<vmem>>, vector<1x3x512xf32>,
    return
  }
  func.func @transform_0(%arg0: i32) -> (i32, i32, i32) {
    %c0_i32 = arith.constant 0 : i32
    %c0_i32_0 = arith.constant 0 : i32
    %c0_i32_1 = arith.constant 0 : i32
    return %arg0, %c0_i32, %c0_i32_0 : i32, i32, i32
  }
  func.func @transform_1(%arg0: i32) -> (i32, i32, i32) {
    %c0_i32 = arith.constant 0 : i32
    %c0_i32_0 = arith.constant 0 : i32
    %c0_i32_1 = arith.constant 0 : i32
    return %arg0, %c0_i32, %c0_i32_0 : i32, i32, i32
  }
  func.func @transform_2(%arg0: i32) -> (i32, i32, i32) {
    %c0_i32 = arith.constant 0 : i32
    %c0_i32_0 = arith.constant 0 : i32
    %c0_i32_1 = arith.constant 0 : i32
    %c0_i32_2 = arith.constant 0 : i32
    return %c0_i32, %c0_i32_0, %c0_i32_1 : i32, i32, i32
  }
  func.func @transform_3(%arg0: i32) -> (i32, i32, i32) {
    %c0_i32 = arith.constant 0 : i32
    %c0_i32_0 = arith.constant 0 : i32
    %c0_i32_1 = arith.constant 0 : i32
    return %arg0, %c0_i32, %c0_i32_0 : i32, i32, i32
  }
}

</mosaic_0001>

<bundles_post_ra>
// kernel: autoencoder_forward.10
= control target key start
LH: loop header
LB: loop body
LE: loop exit
PB: predicated region body
PF: predicated region fallthrough
CT: control target
= control target key end

     0   :  { %vm174_vm0 = vcmask 220160   ;;  %v972_v3 = vmov 0   ;;  %s1221_s0 = inlined_call_operand.vmem [shape: bf16[1,512,27], index: 0, kind: input, shape index: {}]   ;;  %s1222_s2 = inlined_call_operand.vmem [shape: f32[1,32,1], index: 2, kind: input, shape index: {}]   ;;  %s1223_s1 = inlined_call_operand.vmem [shape: bf16[1,32,27], index: 1, kind: input, shape index: {}]   ;;  %s1224_s3 = inlined_call_operand.vmem [shape: bf16[1,32,512], index: 3, kind: output, shape index: {}]  }
   0x1   :  { %v871_v0 = vld [vmem:[%s1221_s0 + $0x78] sm:$0xff]   ;;  %970 = vset.pattern.permute.xlu0 %v972_v3  ;;  %971 = vset.pattern.permute.xlu1 %v972_v3  ;;  %v870_v11 = vld [vmem:[%s1221_s0 + $0x70] sm:$0xff]   ;;  %v869_v23 = vld [vmem:[%s1221_s0 + $0x68] sm:$0xff]  }
   0x2   :  { %v887_v1 = vld [vmem:[%s1221_s0 + $0xf8] sm:$0xff]   ;;  %v783_v4 = vunpack.c.l.bf16 %v871_v0  ;;  %v784_v5 = vunpack.c.h.bf16 %v871_v0  ;;  %v886_v12 = vld [vmem:[%s1221_s0 + $0xf0] sm:$0xff]   ;;  %v780_v15 = vunpack.c.h.bf16 %v870_v11  ;;  %v779_v21 = vunpack.c.l.bf16 %v870_v11  ;;  %v885_v24 = vld [vmem:[%s1221_s0 + $0xe8] sm:$0xff]  }
   0x3   :  { %v863_v2 = vld [vmem:[%s1221_s0 + $0x38] sm:$0xff]   ;;  %v847_v6 = vunpack.c.l.bf16 %v887_v1  ;;  %v848_v7 = vunpack.c.h.bf16 %v887_v1  ;;  %v844_v16 = vunpack.c.h.bf16 %v886_v12  ;;  %v862_v17 = vld [vmem:[%s1221_s0 + $0x30] sm:$0xff]   ;;  %v843_v22 = vunpack.c.l.bf16 %v886_v12  ;;  %v150_v25 = vld [vmem:[%s1222_s2] sm:$0xff] }
   0x4   :  { %v879_v8 = vld [vmem:[%s1221_s0 + $0xb8] sm:$0xff]   ;;  %v752_v9 = vunpack.c.h.bf16 %v863_v2  ;;  %889 = vmatprep.subr.msk.mxu0 %vm174_vm0, %v784_v5  ;;  %v751_v13 = vunpack.c.l.bf16 %v863_v2  ;;  %v878_v18 = vld [vmem:[%s1221_s0 + $0xb0] sm:$0xff]   ;;  %v748_v19 = vunpack.c.h.bf16 %v862_v17  ;;  %v747_v26 = vunpack.c.l.bf16 %v862_v17  ;;  %v861_v31 = vld [vmem:[%s1221_s0 + $0x28] sm:$0xff]   ;;  %156 = vperm.xlu0 %970, %v150_v25  }
   0x5   :  { %v816_v10 = vunpack.c.h.bf16 %v879_v8  ;;  %929 = vmatprep.subr.msk.mxu1 %vm174_vm0, %v848_v7  ;;  %v815_v14 = vunpack.c.l.bf16 %v879_v8  ;;  %v812_v20 = vunpack.c.h.bf16 %v878_v18  ;;  %v811_v27 = vunpack.c.l.bf16 %v878_v18  ;;  %v152_v28 = vld [vmem:[%s1222_s2 + $0x10] sm:$0xff]  ;;  %v877_v32 = vld [vmem:[%s1221_s0 + $0xa8] sm:$0xff]   ;;  %v1052_v33 = vld [vmem:[%s1223_s1] sm:$0xff]  }
   0x6   :  { %890 = vmatpush3.xpose.msk.msra.mxu0 %vm174_vm0, %v752_v9  ;;  %v776_v29 = vunpack.c.h.bf16 %v869_v23  ;;  %v840_v30 = vunpack.c.h.bf16 %v885_v24  ;;  %166 = vperm.xlu1 %971, %v152_v28   ;;  %v151_v34 = vld [vmem:[%s1222_s2 + $0x8] sm:$0xff]  ;;  %v153_v35 = vld [vmem:[%s1222_s2 + $0x18] sm:$0xff]  ;;  %v744_v36 = vunpack.c.h.bf16 %v861_v31  ;;  %v808_v37 = vunpack.c.h.bf16 %v877_v32  ;;  %v868_v41 = vld [vmem:[%s1221_s0 + $0x60] sm:$0xff]  }
   0x7   :  { %930 = vmatpush3.xpose.msk.msra.mxu1 %vm174_vm0, %v816_v10  ;;  %891 = vmatprep.subr.msk.mxu0 %vm174_vm0, %v783_v4  ;;  %v775_v38 = vunpack.c.l.bf16 %v869_v23  ;;  %v839_v39 = vunpack.c.l.bf16 %v885_v24  ;;  %v1065_v40 = vunpack.c.l.bf16 %v1052_v33  ;;  %v884_v42 = vld [vmem:[%s1221_s0 + $0xe0] sm:$0xff]   ;;  %v743_v43 = vunpack.c.l.bf16 %v861_v31  ;;  %v867_v53 = vld [vmem:[%s1221_s0 + $0x58] sm:$0xff]   ;;  %v866_v1 = vld [vmem:[%s1221_s0 + $0x50] sm:$0xff]  }
   0x8   :  { %931 = vmatprep.subr.msk.mxu1 %vm174_vm0, %v847_v6  ;;  %161 = vperm.xlu0 %970, %v151_v34   ;;  %v807_v44 = vunpack.c.l.bf16 %v877_v32  ;;  %v772_v45 = vunpack.c.h.bf16 %v868_v41  ;;  %v836_v46 = vunpack.c.h.bf16 %v884_v42  ;;  %v860_v47 = vld [vmem:[%s1221_s0 + $0x20] sm:$0xff]   ;;  %v771_v51 = vunpack.c.l.bf16 %v868_v41  ;;  %v883_v54 = vld [vmem:[%s1221_s0 + $0xd8] sm:$0xff]   ;;  %v882_v2 = vld [vmem:[%s1221_s0 + $0xd0] sm:$0xff]  }
   0x9   :  { %921 = vmatprep.mubr.msk.f32.mxu0 %vm174_vm0, %v1065_v40  ;;  %961 = vmatprep.mubr.msk.f32.mxu1 %vm174_vm0, %v1065_v40  ;;  %v876_v48 = vld [vmem:[%s1221_s0 + $0xa0] sm:$0xff]   ;;  %v740_v49 = vunpack.c.h.bf16 %v860_v47  ;;  %v835_v52 = vunpack.c.l.bf16 %v884_v42  ;;  %v739_v55 = vunpack.c.l.bf16 %v860_v47  ;;  %v768_v57 = vunpack.c.h.bf16 %v867_v53  ;;  %v859_v59 = vld [vmem:[%s1221_s0 + $0x18] sm:$0xff]   ;;  %v858_v7 = vld [vmem:[%s1221_s0 + $0x10] sm:$0xff]  }
   0xa   :  { %892 = vmatpush3.xpose.msk.msra.mxu0 %vm174_vm0, %v751_v13  ;;  %171 = vperm.xlu1 %971, %v153_v35   ;;  %v804_v50 = vunpack.c.h.bf16 %v876_v48  ;;  %v803_v56 = vunpack.c.l.bf16 %v876_v48  ;;  %v832_v58 = vunpack.c.h.bf16 %v883_v54  ;;  %v875_v60 = vld [vmem:[%s1221_s0 + $0x98] sm:$0xff]   ;;  %v736_v61 = vunpack.c.h.bf16 %v859_v59  ;;  %v874_v8 = vld [vmem:[%s1221_s0 + $0x90] sm:$0xff]   ;;  %v865_v13 = vld [vmem:[%s1221_s0 + $0x48] sm:$0xff]  }
   0xb   :  { %932 = vmatpush3.xpose.msk.msra.mxu1 %vm174_vm0, %v815_v14  ;;  %893 = vmatprep.subr.msk.mxu0 %vm174_vm0, %v780_v15  ;;  %v800_v62 = vunpack.c.h.bf16 %v875_v60  ;;  %v767_v63 = vunpack.c.l.bf16 %v867_v53  ;;  %v831_v0 = vunpack.c.l.bf16 %v883_v54  ;;  %v735_v3 = vunpack.c.l.bf16 %v859_v59  ;;  %v881_v14 = vld [vmem:[%s1221_s0 + $0xc8] sm:$0xff]   ;;  %v864_v25 = vld [vmem:[%s1221_s0 + $0x40] sm:$0xff]  }
   0xc   :  { %933 = vmatprep.subr.msk.mxu1 %vm174_vm0, %v844_v16  ;;  %v799_v4 = vunpack.c.l.bf16 %v875_v60  ;;  %v764_v5 = vunpack.c.h.bf16 %v866_v1  ;;  %v828_v6 = vunpack.c.h.bf16 %v882_v2  ;;  %v732_v9 = vunpack.c.h.bf16 %v858_v7  ;;  %v722_v31 = vld [vmem:[%s1221_s0] sm:$0xff]   ;;  %v888_v42 = vld [vmem:[%s1223_s1 + $0x8] sm:$0xff]  }
   0xd   :  { %v796_v10 = vunpack.c.h.bf16 %v874_v8  ;;  %v763_v11 = vunpack.c.l.bf16 %v866_v1  ;;  %v827_v12 = vunpack.c.l.bf16 %v882_v2  ;;  %v731_v15 = vunpack.c.l.bf16 %v858_v7  ;;  %v872_v32 = vld [vmem:[%s1221_s0 + $0x80] sm:$0xff]  }
   0xe   :  { %894 = vmatpush3.xpose.msk.msra.mxu0 %vm174_vm0, %v748_v19  ;;  %v795_v16 = vunpack.c.l.bf16 %v874_v8  ;;  %v760_v17 = vunpack.c.h.bf16 %v865_v13  ;;  %v824_v18 = vunpack.c.h.bf16 %v881_v14  ;;  %v857_v19 = vld [vmem:[%s1221_s0 + $0x8] sm:$0xff]   ;;  %v759_v23 = vunpack.c.l.bf16 %v865_v13 }
   0xf   :  { %934 = vmatpush3.xpose.msk.msra.mxu1 %vm174_vm0, %v812_v20  ;;  %895 = vmatprep.subr.msk.mxu0 %vm174_vm0, %v779_v21  ;;  %v873_v20 = vld [vmem:[%s1221_s0 + $0x88] sm:$0xff]   ;;  %v728_v21 = vunpack.c.h.bf16 %v857_v19  ;;  %v823_v24 = vunpack.c.l.bf16 %v881_v14  ;;  %v724_v34 = vunpack.c.h.bf16 %v722_v31  ;;  %v788_v35 = vunpack.c.h.bf16 %v872_v32 }
  0x10   :  { %935 = vmatprep.subr.msk.mxu1 %vm174_vm0, %v843_v22  ;;  %v792_v22 = vunpack.c.h.bf16 %v873_v20  ;;  %v791_v28 = vunpack.c.l.bf16 %v873_v20  ;;  %v852_v41 = vunpack.c.h.bf16 %v1052_v33  ;;  %v856_v33 = vunpack.c.h.bf16 %v888_v42 }
  0x12   :  { %896 = vmatpush3.xpose.msk.msra.mxu0 %vm174_vm0, %v747_v26  ;;  %v880_v26 = vld [vmem:[%s1221_s0 + $0xc0] sm:$0xff]  }
  0x13   :  { %936 = vmatpush3.xpose.msk.msra.mxu1 %vm174_vm0, %v811_v27  ;;  %897 = vmatprep.subr.msk.mxu0 %vm174_vm0, %v776_v29  ;;  %v727_v27 = vunpack.c.l.bf16 %v857_v19  ;;  %v756_v29 = vunpack.c.h.bf16 %v864_v25 }
  0x14   :  { %937 = vmatprep.subr.msk.mxu1 %vm174_vm0, %v840_v30  ;;  %v820_v30 = vunpack.c.h.bf16 %v880_v26 }
  0x16   :  { %898 = vmatpush3.xpose.msk.msra.mxu0 %vm174_vm0, %v744_v36  ;;  %v755_v36 = vunpack.c.l.bf16 %v864_v25 }
  0x17   :  { %938 = vmatpush3.xpose.msk.msra.mxu1 %vm174_vm0, %v808_v37  ;;  %899 = vmatprep.subr.msk.mxu0 %vm174_vm0, %v775_v38  ;;  %v819_v37 = vunpack.c.l.bf16 %v880_v26  ;;  %v723_v38 = vunpack.c.l.bf16 %v722_v31 }
  0x18   :  { %939 = vmatprep.subr.msk.mxu1 %vm174_vm0, %v839_v39  ;;  %v787_v39 = vunpack.c.l.bf16 %v872_v32 }
  0x1a   :  { %900 = vmatpush3.xpose.msk.msra.mxu0 %vm174_vm0, %v743_v43  ;;  %v855_v43 = vunpack.c.l.bf16 %v888_v42 }
  0x1b   :  { %940 = vmatpush3.xpose.msk.msra.mxu1 %vm174_vm0, %v807_v44  ;;  %901 = vmatprep.subr.msk.mxu0 %vm174_vm0, %v772_v45 }
  0x1c   :  { %941 = vmatprep.subr.msk.mxu1 %vm174_vm0, %v836_v46 }
  0x1e   :  { %902 = vmatpush3.xpose.msk.msra.mxu0 %vm174_vm0, %v740_v49 }
  0x1f   :  { %942 = vmatpush3.xpose.msk.msra.mxu1 %vm174_vm0, %v804_v50  ;;  %903 = vmatprep.subr.msk.mxu0 %vm174_vm0, %v771_v51 }
  0x20   :  { %943 = vmatprep.subr.msk.mxu1 %vm174_vm0, %v835_v52 }
  0x22   :  { %904 = vmatpush3.xpose.msk.msra.mxu0 %vm174_vm0, %v739_v55 }
  0x23   :  { %944 = vmatpush3.xpose.msk.msra.mxu1 %vm174_vm0, %v803_v56  ;;  %905 = vmatprep.subr.msk.mxu0 %vm174_vm0, %v768_v57 }
  0x24   :  { %945 = vmatprep.subr.msk.mxu1 %vm174_vm0, %v832_v58 }
  0x26   :  { %906 = vmatpush3.xpose.msk.msra.mxu0 %vm174_vm0, %v736_v61 }
  0x27   :  { %946 = vmatpush3.xpose.msk.msra.mxu1 %vm174_vm0, %v800_v62  ;;  %907 = vmatprep.subr.msk.mxu0 %vm174_vm0, %v767_v63 }
  0x28   :  { %947 = vmatprep.subr.msk.mxu1 %vm174_vm0, %v831_v0 }
  0x2a   :  { %908 = vmatpush3.xpose.msk.msra.mxu0 %vm174_vm0, %v735_v3 }
  0x2b   :  { %948 = vmatpush3.xpose.msk.msra.mxu1 %vm174_vm0, %v799_v4  ;;  %909 = vmatprep.subr.msk.mxu0 %vm174_vm0, %v764_v5 }
  0x2c   :  { %949 = vmatprep.subr.msk.mxu1 %vm174_vm0, %v828_v6 }
  0x2e   :  { %910 = vmatpush3.xpose.msk.msra.mxu0 %vm174_vm0, %v732_v9 }
  0x2f   :  { %950 = vmatpush3.xpose.msk.msra.mxu1 %vm174_vm0, %v796_v10  ;;  %911 = vmatprep.subr.msk.mxu0 %vm174_vm0, %v763_v11 }
  0x30   :  { %951 = vmatprep.subr.msk.mxu1 %vm174_vm0, %v827_v12 }
  0x32   :  { %912 = vmatpush3.xpose.msk.msra.mxu0 %vm174_vm0, %v731_v15 }
  0x33   :  { %952 = vmatpush3.xpose.msk.msra.mxu1 %vm174_vm0, %v795_v16  ;;  %913 = vmatprep.subr.msk.mxu0 %vm174_vm0, %v760_v17 }
  0x34   :  { %953 = vmatprep.subr.msk.mxu1 %vm174_vm0, %v824_v18 }
  0x36   :  { %914 = vmatpush3.xpose.msk.msra.mxu0 %vm174_vm0, %v728_v21 }
  0x37   :  { %954 = vmatpush3.xpose.msk.msra.mxu1 %vm174_vm0, %v792_v22  ;;  %915 = vmatprep.subr.msk.mxu0 %vm174_vm0, %v759_v23 }
  0x38   :  { %955 = vmatprep.subr.msk.mxu1 %vm174_vm0, %v823_v24 }
  0x3a   :  { %916 = vmatpush3.xpose.msk.msra.mxu0 %vm174_vm0, %v727_v27 }
  0x3b   :  { %956 = vmatpush3.xpose.msk.msra.mxu1 %vm174_vm0, %v791_v28  ;;  %917 = vmatprep.subr.msk.mxu0 %vm174_vm0, %v756_v29 }
  0x3c   :  { %957 = vmatprep.subr.msk.mxu1 %vm174_vm0, %v820_v30 }
  0x3e   :  { %918 = vmatpush3.xpose.msk.msra.mxu0 %vm174_vm0, %v724_v34 }
  0x3f   :  { %958 = vmatpush3.xpose.msk.msra.mxu1 %vm174_vm0, %v788_v35  ;;  %919 = vmatprep.subr.msk.mxu0 %vm174_vm0, %v755_v36 }
  0x40   :  { %959 = vmatprep.subr.msk.mxu1 %vm174_vm0, %v819_v37 }
  0x42   :  { %920 = vmatpush3.xpose.msk.msra.mxu0 %vm174_vm0, %v723_v38 }
  0x43   :  { %960 = vmatpush3.xpose.msk.msra.mxu1 %vm174_vm0, %v787_v39 }
  0x45   :  { %922 = vmatmul.mubr.msk.f32.vlgmr.msra.gmra.mxu0 %vm174_vm0, %v1065_v40 }
  0x46   :  { %962 = vmatmul.mubr.msk.f32.vlgmr.msra.gmra.mxu1 %vm174_vm0, %v1065_v40  ;;  %923 = vmatprep.mubr.msk.f32.mxu0 %vm174_vm0, %v852_v41 }
  0x47   :  { %963 = vmatprep.mubr.msk.f32.mxu1 %vm174_vm0, %v852_v41 }
  0x49   :  { %924 = vmatmul.mubr.msk.f32.gmra.mxu0 %vm174_vm0, %v852_v41 }
  0x4a   :  { %964 = vmatmul.mubr.msk.f32.gmra.mxu1 %vm174_vm0, %v852_v41  ;;  %925 = vmatprep.mubr.msk.f32.mxu0 %vm174_vm0, %v855_v43 }
  0x4b   :  { %965 = vmatprep.mubr.msk.f32.mxu1 %vm174_vm0, %v855_v43 }
  0x4d   :  { %926 = vmatmul.mubr.msk.f32.gmra.mxu0 %vm174_vm0, %v855_v43 }
  0x4e   :  { %966 = vmatmul.mubr.msk.f32.gmra.mxu1 %vm174_vm0, %v855_v43  ;;  %927 = vmatprep.mubr.msk.f32.mxu0 %vm174_vm0, %v856_v33 }
  0x4f   :  { %967 = vmatprep.mubr.msk.f32.mxu1 %vm174_vm0, %v856_v33 }
  0x51   :  { %928 = vmatmul.mubr.msk.f32.gmra.mxu0 %vm174_vm0, %v856_v33 }
  0x52   :  { %968 = vmatmul.mubr.msk.f32.gmra.mxu1 %vm174_vm0, %v856_v33 }
  0x7f   :  { %v157_v40 = vpop.permute.xlu0 %156 }
  0x81   :  { %v167_v1 = vpop.permute.xlu1 %166 }
  0x83   :  { %v162_v52 = vpop.permute.xlu0 %161 }
  0x85   :  { %v172_v22 = vpop.permute.xlu1 %171 }
 0x105   :  { %v445_v44 = vpop.f32.mrf.mxu0 }
 0x106   :  { %v534_v45 = vpop.f32.mrf.mxu1  ;;  %v446_v46 = vadd.f32 %v445_v44, %v157_v40 }
 0x107   :  { %v535_v47 = vadd.f32 %v534_v45, %v157_v40  ;;  %v447_v48 = vpop.f32.mrf.mxu0 }
 0x108   :  { %v536_v49 = vpop.f32.mrf.mxu1  ;;  %v448_v50 = vadd.f32 %v447_v48, %v157_v40  ;;  %v557_v55 = vmax.f32 %v446_v46, 0.0 }
 0x109   :  { %v537_v51 = vadd.f32 %v536_v49, %v157_v40  ;;  %v451_v53 = vpop.f32.mrf.mxu0  ;;  %v559_v56 = vmax.f32 %v535_v47, 0.0 }
 0x10a   :  { %v540_v54 = vpop.f32.mrf.mxu1  ;;  %v558_v57 = vmax.f32 %v448_v50, 0.0  ;;  %v452_v59 = vadd.f32 %v451_v53, %v162_v52 }
 0x10b   :  { %v560_v58 = vmax.f32 %v537_v51, 0.0  ;;  %v541_v60 = vadd.f32 %v540_v54, %v162_v52  ;;  %v453_v61 = vpop.f32.mrf.mxu0 }
 0x10c   :  { %v542_v62 = vpop.f32.mrf.mxu1  ;;  %v713_v63 = vpack.c.bf16 %v558_v57, %v557_v55  ;;  %v454_v2 = vadd.f32 %v453_v61, %v162_v52  ;;  %v561_v8 = vmax.f32 %v452_v59, 0.0 }
 0x10d   :  { %v714_v0 = vpack.c.bf16 %v560_v58, %v559_v56  ;;  %v543_v3 = vadd.f32 %v542_v62, %v162_v52  ;;  %v457_v4 = vpop.f32.mrf.mxu0  ;;  %v563_v9 = vmax.f32 %v541_v60, 0.0 }
 0x10e   :  { %v546_v5 = vpop.f32.mrf.mxu1  ;;  %621 = vst [vmem:[%s1224_s3] sm:$0xff] %v713_v63  ;;  %v458_v6 = vadd.f32 %v457_v4, %v167_v1  ;;  %v562_v10 = vmax.f32 %v454_v2, 0.0 }
 0x10f   :  { %622 = vst [vmem:[%s1224_s3 + $0x8] sm:$0xff] %v714_v0  ;;  %v547_v7 = vadd.f32 %v546_v5, %v167_v1  ;;  %v564_v11 = vmax.f32 %v543_v3, 0.0  ;;  %v459_v12 = vpop.f32.mrf.mxu0 }
 0x110   :  { %v548_v13 = vpop.f32.mrf.mxu1  ;;  %v460_v14 = vadd.f32 %v459_v12, %v167_v1  ;;  %v715_v16 = vpack.c.bf16 %v562_v10, %v561_v8  ;;  %v565_v20 = vmax.f32 %v458_v6, 0.0 }
 0x111   :  { %v549_v15 = vadd.f32 %v548_v13, %v167_v1  ;;  %v716_v17 = vpack.c.bf16 %v564_v11, %v563_v9  ;;  %v463_v18 = vpop.f32.mrf.mxu0  ;;  %v567_v21 = vmax.f32 %v547_v7, 0.0 }
 0x112   :  { %v552_v19 = vpop.f32.mrf.mxu1  ;;  %v566_v23 = vmax.f32 %v460_v14, 0.0  ;;  %623 = vst [vmem:[%s1224_s3 + $0x10] sm:$0xff] %v715_v16  ;;  %v464_v25 = vadd.f32 %v463_v18, %v172_v22 }
 0x113   :  { %v568_v24 = vmax.f32 %v549_v15, 0.0  ;;  %624 = vst [vmem:[%s1224_s3 + $0x18] sm:$0xff] %v716_v17  ;;  %v553_v26 = vadd.f32 %v552_v19, %v172_v22  ;;  %v465_v27 = vpop.f32.mrf.mxu0 }
 0x114   :  { %v554_v28 = vpop.f32.mrf.mxu1  ;;  %v717_v29 = vpack.c.bf16 %v566_v23, %v565_v20  ;;  %v466_v31 = vadd.f32 %v465_v27, %v172_v22  ;;  %v569_v34 = vmax.f32 %v464_v25, 0.0 }
 0x115   :  { %v718_v30 = vpack.c.bf16 %v568_v24, %v567_v21  ;;  %v555_v32 = vadd.f32 %v554_v28, %v172_v22  ;;  %v571_v35 = vmax.f32 %v553_v26, 0.0 }
 0x116   :  { %625 = vst [vmem:[%s1224_s3 + $0x20] sm:$0xff] %v717_v29  ;;  %v570_v36 = vmax.f32 %v466_v31, 0.0 }
 0x117   :  { %626 = vst [vmem:[%s1224_s3 + $0x28] sm:$0xff] %v718_v30  ;;  %v572_v37 = vmax.f32 %v555_v32, 0.0 }
 0x118   :  { %v719_v38 = vpack.c.bf16 %v570_v36, %v569_v34 }
 0x119   :  { %v720_v39 = vpack.c.bf16 %v572_v37, %v571_v35 }
 0x11a   :  { %627 = vst [vmem:[%s1224_s3 + $0x30] sm:$0xff] %v719_v38 }
 0x11b   :  { %628 = vst [vmem:[%s1224_s3 + $0x38] sm:$0xff] %v720_v39 }

// kernel: autoencoder_forward.11
= control target key start
LH: loop header
LB: loop body
LE: loop exit
PB: predicated region body
PF: predicated region fallthrough
CT: control target
= control target key end

     0   :  { %vm182_vm0 = vcmask 261120   ;;  %v651_v3 = vmov 0   ;;  %s864_s0 = inlined_call_operand.vmem [shape: bf16[1,128,288], index: 0, kind: input, shape index: {}]   ;;  %s865_s1 = inlined_call_operand.vmem [shape: bf16[1,64,288], index: 1, kind: input, shape index: {}]   ;;  %s866_s2 = inlined_call_operand.vmem [shape: f32[1,64,1], index: 2, kind: input, shape index: {}]   ;;  %s867_s3 = inlined_call_operand.vmem [shape: bf16[1,64,128], index: 3, kind: output, shape index: {}]  }
   0x1   :  { %v44_v0 = vld [vmem:[%s864_s0 + $0xb4] sm:$0xff]  ;;  %v45_v1 = vld [vmem:[%s864_s0 + $0xb0] ss:$12 sps:$4 sm:$0xff]   ;;  %v42_v2 = vld [vmem:[%s864_s0 + $0xa8] sm:$0xff]  ;;  %649 = vset.pattern.permute.xlu0 %v651_v3  ;;  %650 = vset.pattern.permute.xlu1 %v651_v3 }
   0x2   :  { %v92_v4 = vunpack.c.h.bf16 %v44_v0  ;;  %v93_v5 = vunpack.c.h.bf16 %v45_v1  ;;  %v91_v6 = vunpack.c.l.bf16 %v44_v0  ;;  %v89_v7 = vunpack.c.h.bf16 %v42_v2  ;;  %v40_v9 = vld [vmem:[%s864_s0 + $0x9c] sm:$0xff]  ;;  %v41_v10 = vld [vmem:[%s864_s0 + $0x98] ss:$12 sps:$4 sm:$0xff]   ;;  %v38_v14 = vld [vmem:[%s864_s0 + $0x90] sm:$0xff] }
   0x3   :  { %v90_v8 = vunpack.c.l.bf16 %v45_v1  ;;  %v88_v11 = vunpack.c.l.bf16 %v42_v2  ;;  %v86_v12 = vunpack.c.h.bf16 %v40_v9  ;;  %v87_v13 = vunpack.c.h.bf16 %v41_v10  ;;  %v36_v18 = vld [vmem:[%s864_s0 + $0x84] sm:$0xff]  ;;  %v37_v19 = vld [vmem:[%s864_s0 + $0x80] ss:$12 sps:$4 sm:$0xff]   ;;  %v136_v24 = vld [vmem:[%s866_s2 + $0x10] sm:$0xff] }
   0x4   :  { %255 = vmatprep.subr.mxu0 %v92_v4  ;;  %604 = vmatprep.subr.msk.mxu1 %vm182_vm0, %v93_v5  ;;  %v85_v15 = vunpack.c.l.bf16 %v40_v9  ;;  %v83_v16 = vunpack.c.h.bf16 %v38_v14  ;;  %v84_v17 = vunpack.c.l.bf16 %v41_v10  ;;  %v704_v20 = vld [vmem:[%s865_s1] sm:$0xff]  ;;  %v709_v21 = vld [vmem:[%s865_s1 + $0x8] ss:$12 sps:$4 sm:$0xff]   ;;  %v82_v22 = vunpack.c.l.bf16 %v38_v14  ;;  %v34_v29 = vld [vmem:[%s864_s0 + $0x78] sm:$0xff] }
   0x5   :  { %256 = vmatpush1.xpose.msra.mxu0 %v91_v6  ;;  %605 = vmatpush3.xpose.msk.msra.mxu1 %vm182_vm0, %v93_v5  ;;  %v134_v23 = vld [vmem:[%s866_s2] sm:$0xff]  ;;  %v80_v25 = vunpack.c.h.bf16 %v36_v18  ;;  %v81_v26 = vunpack.c.h.bf16 %v37_v19  ;;  %v111_v27 = vunpack.c.h.bf16 %v704_v20  ;;  %v112_v28 = vunpack.c.l.bf16 %v709_v21  ;;  %v135_v30 = vld [vmem:[%s866_s2 + $0x8] sm:$0xff]  ;;  %v137_v31 = vld [vmem:[%s866_s2 + $0x18] sm:$0xff] }
   0x6   :  { %257 = vmatprep.subr.mxu0 %v89_v7  ;;  %606 = vmatprep.subr.msk.mxu1 %vm182_vm0, %v90_v8  ;;  %v79_v32 = vunpack.c.l.bf16 %v36_v18  ;;  %v77_v33 = vunpack.c.h.bf16 %v34_v29  ;;  %v78_v34 = vunpack.c.l.bf16 %v37_v19  ;;  %v32_v35 = vld [vmem:[%s864_s0 + $0x6c] sm:$0xff]  ;;  %v33_v36 = vld [vmem:[%s864_s0 + $0x68] ss:$12 sps:$4 sm:$0xff]   ;;  %v138_v38 = vld [vmem:[%s866_s2 + $0x20] sm:$0xff]  ;;  %v76_v39 = vunpack.c.l.bf16 %v34_v29 }
   0x7   :  { %144 = vperm.xlu0 %649, %v134_v23   ;;  %154 = vperm.xlu1 %650, %v136_v24   ;;  %v139_v37 = vld [vmem:[%s866_s2 + $0x28] sm:$0xff]  ;;  %v74_v40 = vunpack.c.h.bf16 %v32_v35  ;;  %v75_v41 = vunpack.c.h.bf16 %v33_v36  ;;  %v30_v42 = vld [vmem:[%s864_s0 + $0x60] sm:$0xff]  ;;  %v141_v43 = vld [vmem:[%s866_s2 + $0x38] sm:$0xff]  ;;  %v73_v45 = vunpack.c.l.bf16 %v32_v35  ;;  %v72_v47 = vunpack.c.l.bf16 %v33_v36 }
   0x8   :  { %319 = vmatprep.mubr.f32.mxu0 %v111_v27  ;;  %636 = vmatprep.mubr.msk.f32.mxu1 %vm182_vm0, %v112_v28  ;;  %v140_v44 = vld [vmem:[%s866_s2 + $0x30] sm:$0xff]  ;;  %v71_v46 = vunpack.c.h.bf16 %v30_v42  ;;  %v70_v50 = vunpack.c.l.bf16 %v30_v42  ;;  %v26_v53 = vld [vmem:[%s864_s0 + $0x48] sm:$0xff]  ;;  %v24_v57 = vld [vmem:[%s864_s0 + $0x3c] sm:$0xff] }
   0x9   :  { %258 = vmatpush1.xpose.msra.mxu0 %v88_v11  ;;  %607 = vmatpush3.xpose.msk.msra.mxu1 %vm182_vm0, %v90_v8  ;;  %v28_v48 = vld [vmem:[%s864_s0 + $0x54] sm:$0xff]  ;;  %v29_v49 = vld [vmem:[%s864_s0 + $0x50] ss:$12 sps:$4 sm:$0xff]   ;;  %v65_v55 = vunpack.c.h.bf16 %v26_v53  ;;  %v64_v59 = vunpack.c.l.bf16 %v26_v53  ;;  %v62_v60 = vunpack.c.h.bf16 %v24_v57  ;;  %v61_v63 = vunpack.c.l.bf16 %v24_v57  ;;  %v20_v2 = vld [vmem:[%s864_s0 + $0x24] sm:$0xff] }
   0xa   :  { %259 = vmatprep.subr.mxu0 %v86_v12  ;;  %608 = vmatprep.subr.msk.mxu1 %vm182_vm0, %v87_v13  ;;  %v68_v51 = vunpack.c.h.bf16 %v28_v48  ;;  %v69_v52 = vunpack.c.h.bf16 %v29_v49  ;;  %v67_v54 = vunpack.c.l.bf16 %v28_v48  ;;  %v66_v56 = vunpack.c.l.bf16 %v29_v49  ;;  %v25_v58 = vld [vmem:[%s864_s0 + $0x38] ss:$12 sps:$4 sm:$0xff]   ;;  %v22_v62 = vld [vmem:[%s864_s0 + $0x30] sm:$0xff]  ;;  %v21_v3 = vld [vmem:[%s864_s0 + $0x20] ss:$12 sps:$4 sm:$0xff]  }
   0xb   :  { %149 = vperm.xlu0 %649, %v135_v30   ;;  %159 = vperm.xlu1 %650, %v137_v31   ;;  %v63_v61 = vunpack.c.h.bf16 %v25_v58  ;;  %v59_v0 = vunpack.c.h.bf16 %v22_v62  ;;  %v60_v1 = vunpack.c.l.bf16 %v25_v58  ;;  %v58_v4 = vunpack.c.l.bf16 %v22_v62  ;;  %v18_v7 = vld [vmem:[%s864_s0 + $0x18] sm:$0xff]  ;;  %v16_v11 = vld [vmem:[%s864_s0 + $0xc] sm:$0xff]  ;;  %v17_v12 = vld [vmem:[%s864_s0 + $0x8] ss:$12 sps:$4 sm:$0xff]  }
   0xc   :  { %v56_v5 = vunpack.c.h.bf16 %v20_v2  ;;  %v57_v6 = vunpack.c.h.bf16 %v21_v3  ;;  %v55_v8 = vunpack.c.l.bf16 %v20_v2  ;;  %v53_v9 = vunpack.c.h.bf16 %v18_v7  ;;  %v96_v23 = vld [vmem:[%s865_s1 + $0xc] sm:$0xff]  ;;  %v98_v29 = vld [vmem:[%s865_s1 + $0x18] sm:$0xff] }
   0xd   :  { %260 = vmatpush1.xpose.msra.mxu0 %v85_v15  ;;  %609 = vmatpush3.xpose.msk.msra.mxu1 %vm182_vm0, %v87_v13  ;;  %v54_v10 = vunpack.c.l.bf16 %v21_v3  ;;  %v52_v13 = vunpack.c.l.bf16 %v18_v7  ;;  %v50_v14 = vunpack.c.h.bf16 %v16_v11  ;;  %v51_v15 = vunpack.c.h.bf16 %v17_v12  ;;  %v99_v24 = vld [vmem:[%s865_s1 + $0x20] ss:$12 sps:$4 sm:$0xff]   ;;  %v103_v30 = vld [vmem:[%s865_s1 + $0x38] ss:$12 sps:$4 sm:$0xff]  }
   0xe   :  { %261 = vmatprep.subr.mxu0 %v83_v16  ;;  %610 = vmatprep.subr.msk.mxu1 %vm182_vm0, %v84_v17  ;;  %v14_v16 = vld [vmem:[%s864_s0] sm:$0xff]  ;;  %v48_v19 = vunpack.c.l.bf16 %v17_v12  ;;  %v114_v27 = vunpack.c.h.bf16 %v96_v23  ;;  %v118_v28 = vunpack.c.l.bf16 %v99_v24  ;;  %v113_v31 = vunpack.c.l.bf16 %v96_v23  ;;  %v108_v49 = vld [vmem:[%s865_s1 + $0x54] sm:$0xff] }
   0xf   :  { %169 = vperm.xlu1 %650, %v139_v37   ;;  %164 = vperm.xlu0 %649, %v138_v38   ;;  %v47_v18 = vunpack.c.h.bf16 %v14_v16  ;;  %v116_v35 = vunpack.c.l.bf16 %v98_v29  ;;  %v127_v36 = vunpack.c.h.bf16 %v103_v30 }
  0x11   :  { %262 = vmatpush1.xpose.msra.mxu0 %v82_v22  ;;  %611 = vmatpush3.xpose.msk.msra.mxu1 %vm182_vm0, %v84_v17  ;;  %v49_v17 = vunpack.c.l.bf16 %v16_v11  ;;  %v46_v22 = vunpack.c.l.bf16 %v14_v16 }
  0x12   :  { %263 = vmatprep.subr.mxu0 %v80_v25  ;;  %612 = vmatprep.subr.msk.mxu1 %vm182_vm0, %v81_v26  ;;  %v110_v25 = vunpack.c.l.bf16 %v704_v20  ;;  %v121_v20 = vunpack.c.h.bf16 %v99_v24 }
  0x13   :  { %179 = vperm.xlu1 %650, %v141_v43   ;;  %174 = vperm.xlu0 %649, %v140_v44   ;;  %v104_v43 = vld [vmem:[%s865_s1 + $0x3c] sm:$0xff] }
  0x15   :  { %264 = vmatpush1.xpose.msra.mxu0 %v79_v32  ;;  %613 = vmatpush3.xpose.msk.msra.mxu1 %vm182_vm0, %v81_v26  ;;  %v115_v26 = vunpack.c.h.bf16 %v709_v21  ;;  %v117_v21 = vunpack.c.h.bf16 %v98_v29  ;;  %v124_v32 = vunpack.c.l.bf16 %v103_v30 }
  0x16   :  { %265 = vmatprep.subr.mxu0 %v77_v33  ;;  %614 = vmatprep.subr.msk.mxu1 %vm182_vm0, %v78_v34  ;;  %v100_v33 = vld [vmem:[%s865_s1 + $0x24] sm:$0xff] }
  0x17   :  { %v120_v37 = vunpack.c.h.bf16 %v100_v33 }
  0x19   :  { %266 = vmatpush1.xpose.msra.mxu0 %v76_v39  ;;  %615 = vmatpush3.xpose.msk.msra.mxu1 %vm182_vm0, %v78_v34  ;;  %v107_v34 = vld [vmem:[%s865_s1 + $0x50] ss:$12 sps:$4 sm:$0xff]  }
  0x1a   :  { %267 = vmatprep.subr.mxu0 %v74_v40  ;;  %616 = vmatprep.subr.msk.mxu1 %vm182_vm0, %v75_v41  ;;  %v130_v38 = vunpack.c.l.bf16 %v107_v34  ;;  %v102_v39 = vld [vmem:[%s865_s1 + $0x30] sm:$0xff]  ;;  %v119_v40 = vunpack.c.l.bf16 %v100_v33 }
  0x1b   :  { %v123_v42 = vunpack.c.h.bf16 %v102_v39  ;;  %v122_v44 = vunpack.c.l.bf16 %v102_v39 }
  0x1d   :  { %268 = vmatpush1.xpose.msra.mxu0 %v73_v45  ;;  %617 = vmatpush3.xpose.msk.msra.mxu1 %vm182_vm0, %v75_v41  ;;  %v133_v41 = vunpack.c.h.bf16 %v107_v34  ;;  %v126_v45 = vunpack.c.h.bf16 %v104_v43 }
  0x1e   :  { %269 = vmatprep.subr.mxu0 %v71_v46  ;;  %618 = vmatprep.subr.msk.mxu1 %vm182_vm0, %v72_v47  ;;  %v106_v46 = vld [vmem:[%s865_s1 + $0x48] sm:$0xff] }
  0x1f   :  { %v129_v48 = vunpack.c.h.bf16 %v106_v46 }
  0x21   :  { %270 = vmatpush1.xpose.msra.mxu0 %v70_v50  ;;  %619 = vmatpush3.xpose.msk.msra.mxu1 %vm182_vm0, %v72_v47  ;;  %v125_v47 = vunpack.c.l.bf16 %v104_v43  ;;  %v128_v50 = vunpack.c.l.bf16 %v106_v46 }
  0x22   :  { %271 = vmatprep.subr.mxu0 %v68_v51  ;;  %620 = vmatprep.subr.msk.mxu1 %vm182_vm0, %v69_v52  ;;  %v132_v51 = vunpack.c.h.bf16 %v108_v49 }
  0x25   :  { %272 = vmatpush1.xpose.msra.mxu0 %v67_v54  ;;  %621 = vmatpush3.xpose.msk.msra.mxu1 %vm182_vm0, %v69_v52  ;;  %v131_v52 = vunpack.c.l.bf16 %v108_v49 }
  0x26   :  { %273 = vmatprep.subr.mxu0 %v65_v55  ;;  %622 = vmatprep.subr.msk.mxu1 %vm182_vm0, %v66_v56 }
  0x29   :  { %274 = vmatpush1.xpose.msra.mxu0 %v64_v59  ;;  %623 = vmatpush3.xpose.msk.msra.mxu1 %vm182_vm0, %v66_v56 }
  0x2a   :  { %275 = vmatprep.subr.mxu0 %v62_v60  ;;  %624 = vmatprep.subr.msk.mxu1 %vm182_vm0, %v63_v61 }
  0x2d   :  { %276 = vmatpush1.xpose.msra.mxu0 %v61_v63  ;;  %625 = vmatpush3.xpose.msk.msra.mxu1 %vm182_vm0, %v63_v61 }
  0x2e   :  { %277 = vmatprep.subr.mxu0 %v59_v0  ;;  %626 = vmatprep.subr.msk.mxu1 %vm182_vm0, %v60_v1 }
  0x31   :  { %278 = vmatpush1.xpose.msra.mxu0 %v58_v4  ;;  %627 = vmatpush3.xpose.msk.msra.mxu1 %vm182_vm0, %v60_v1 }
  0x32   :  { %279 = vmatprep.subr.mxu0 %v56_v5  ;;  %628 = vmatprep.subr.msk.mxu1 %vm182_vm0, %v57_v6 }
  0x35   :  { %280 = vmatpush1.xpose.msra.mxu0 %v55_v8  ;;  %629 = vmatpush3.xpose.msk.msra.mxu1 %vm182_vm0, %v57_v6 }
  0x36   :  { %281 = vmatprep.subr.mxu0 %v53_v9  ;;  %630 = vmatprep.subr.msk.mxu1 %vm182_vm0, %v54_v10 }
  0x39   :  { %282 = vmatpush1.xpose.msra.mxu0 %v52_v13  ;;  %631 = vmatpush3.xpose.msk.msra.mxu1 %vm182_vm0, %v54_v10 }
  0x3a   :  { %283 = vmatprep.subr.mxu0 %v50_v14  ;;  %632 = vmatprep.subr.msk.mxu1 %vm182_vm0, %v51_v15 }
  0x3d   :  { %284 = vmatpush1.xpose.msra.mxu0 %v49_v17  ;;  %633 = vmatpush3.xpose.msk.msra.mxu1 %vm182_vm0, %v51_v15 }
  0x3e   :  { %285 = vmatprep.subr.mxu0 %v47_v18  ;;  %634 = vmatprep.subr.msk.mxu1 %vm182_vm0, %v48_v19 }
  0x41   :  { %286 = vmatpush1.xpose.msra.mxu0 %v46_v22  ;;  %635 = vmatpush3.xpose.msk.msra.mxu1 %vm182_vm0, %v48_v19 }
  0x44   :  { %320 = vmatmul.mubr.f32.vlgmr.msra.gmra.mxu0 %v110_v25  ;;  %637 = vmatmul.mubr.msk.f32.vlgmr.msra.gmra.mxu1 %vm182_vm0, %v115_v26 }
  0x45   :  { %324 = vmatprep.mubr.f32.mxu0 %v114_v27  ;;  %639 = vmatprep.mubr.msk.f32.mxu1 %vm182_vm0, %v118_v28 }
  0x48   :  { %325 = vmatmul.mubr.f32.gmra.mxu0 %v113_v31  ;;  %640 = vmatmul.mubr.msk.f32.gmra.mxu1 %vm182_vm0, %v121_v20 }
  0x49   :  { %329 = vmatprep.mubr.f32.mxu0 %v117_v21  ;;  %642 = vmatprep.mubr.msk.f32.mxu1 %vm182_vm0, %v124_v32 }
  0x4c   :  { %330 = vmatmul.mubr.f32.gmra.mxu0 %v116_v35  ;;  %643 = vmatmul.mubr.msk.f32.gmra.mxu1 %vm182_vm0, %v127_v36 }
  0x4d   :  { %334 = vmatprep.mubr.f32.mxu0 %v120_v37  ;;  %645 = vmatprep.mubr.msk.f32.mxu1 %vm182_vm0, %v130_v38 }
  0x50   :  { %335 = vmatmul.mubr.f32.gmra.mxu0 %v119_v40  ;;  %646 = vmatmul.mubr.msk.f32.gmra.mxu1 %vm182_vm0, %v133_v41 }
  0x51   :  { %339 = vmatprep.mubr.f32.mxu0 %v123_v42 }
  0x54   :  { %340 = vmatmul.mubr.f32.gmra.mxu0 %v122_v44 }
  0x55   :  { %344 = vmatprep.mubr.f32.mxu0 %v126_v45 }
  0x58   :  { %345 = vmatmul.mubr.f32.gmra.mxu0 %v125_v47 }
  0x59   :  { %349 = vmatprep.mubr.f32.mxu0 %v129_v48 }
  0x5c   :  { %350 = vmatmul.mubr.f32.gmra.mxu0 %v128_v50 }
  0x5d   :  { %354 = vmatprep.mubr.f32.mxu0 %v132_v51 }
  0x60   :  { %355 = vmatmul.mubr.f32.gmra.mxu0 %v131_v52 }
  0x82   :  { %v145_v53 = vpop.permute.xlu0 %144  ;;  %v155_v62 = vpop.permute.xlu1 %154 }
  0x86   :  { %v150_v57 = vpop.permute.xlu0 %149  ;;  %v160_v10 = vpop.permute.xlu1 %159 }
  0x8a   :  { %v165_v17 = vpop.permute.xlu0 %164  ;;  %v170_v27 = vpop.permute.xlu1 %169 }
  0x8e   :  { %v175_v32 = vpop.permute.xlu0 %174  ;;  %v180_v40 = vpop.permute.xlu1 %179 }
 0x104   :  { %v321_v54 = vpop.f32.mrf.mxu0  ;;  %v638_v55 = vpop.f32.mrf.mxu1 }
 0x105   :  { %v322_v56 = vadd.f32 %v321_v54, %v145_v53 }
 0x106   :  { %v323_v58 = vpop.f32.mrf.mxu0  ;;  %v426_v59 = vpop.f32.mrf.mxu1 }
 0x107   :  { %v427_v61 = vadd.f32 %v426_v59, %v322_v56 }
 0x108   :  { %v326_v60 = vpop.f32.mrf.mxu0  ;;  %v641_v1 = vpop.f32.mrf.mxu1 }
 0x109   :  { %v327_v63 = vadd.f32 %v326_v60, %v150_v57  ;;  %v465_v4 = vmax.f32 %v427_v61, 0.0 }
 0x10a   :  { %v328_v0 = vpop.f32.mrf.mxu0  ;;  %v436_v8 = vpop.f32.mrf.mxu1 }
 0x10b   :  { %v432_v2 = vadd.f32 %v638_v55, %v327_v63 }
 0x10c   :  { %v331_v3 = vpop.f32.mrf.mxu0  ;;  %v644_v15 = vpop.f32.mrf.mxu1 }
 0x10d   :  { %v466_v5 = vmax.f32 %v432_v2, 0.0  ;;  %v332_v6 = vadd.f32 %v331_v3, %v155_v62 }
 0x10e   :  { %v333_v7 = vpop.f32.mrf.mxu0  ;;  %v446_v25 = vpop.f32.mrf.mxu1 }
 0x10f   :  { %v560_v9 = vpack.c.bf16 %v466_v5, %v465_v4  ;;  %v437_v12 = vadd.f32 %v436_v8, %v332_v6 }
 0x110   :  { %v336_v11 = vpop.f32.mrf.mxu0  ;;  %v647_v20 = vpop.f32.mrf.mxu1 }
 0x111   :  { %561 = vst [vmem:[%s867_s3] sm:$0xff] %v560_v9   ;;  %v337_v13 = vadd.f32 %v336_v11, %v160_v10  ;;  %v467_v19 = vmax.f32 %v437_v12, 0.0 }
 0x112   :  { %v338_v14 = vpop.f32.mrf.mxu0  ;;  %v456_v38 = vpop.f32.mrf.mxu1 }
 0x113   :  { %v442_v16 = vadd.f32 %v641_v1, %v337_v13 }
 0x114   :  { %v341_v18 = vpop.f32.mrf.mxu0 }
 0x115   :  { %v468_v22 = vmax.f32 %v442_v16, 0.0  ;;  %v342_v23 = vadd.f32 %v341_v18, %v165_v17 }
 0x116   :  { %v343_v24 = vpop.f32.mrf.mxu0 }
 0x117   :  { %v565_v26 = vpack.c.bf16 %v468_v22, %v467_v19  ;;  %v447_v29 = vadd.f32 %v446_v25, %v342_v23 }
 0x118   :  { %v346_v28 = vpop.f32.mrf.mxu0 }
 0x119   :  { %577 = vst [vmem:[%s867_s3 + $0x8] sm:$0xff] %v565_v26   ;;  %v347_v30 = vadd.f32 %v346_v28, %v170_v27  ;;  %v469_v34 = vmax.f32 %v447_v29, 0.0 }
 0x11a   :  { %v348_v31 = vpop.f32.mrf.mxu0 }
 0x11b   :  { %v452_v21 = vadd.f32 %v644_v15, %v347_v30 }
 0x11c   :  { %v351_v33 = vpop.f32.mrf.mxu0 }
 0x11d   :  { %v470_v35 = vmax.f32 %v452_v21, 0.0  ;;  %v352_v36 = vadd.f32 %v351_v33, %v175_v32 }
 0x11e   :  { %v353_v37 = vpop.f32.mrf.mxu0 }
 0x11f   :  { %v570_v39 = vpack.c.bf16 %v470_v35, %v469_v34  ;;  %v457_v42 = vadd.f32 %v456_v38, %v352_v36 }
 0x120   :  { %v356_v41 = vpop.f32.mrf.mxu0 }
 0x121   :  { %578 = vst [vmem:[%s867_s3 + $0x10] sm:$0xff] %v570_v39   ;;  %v357_v43 = vadd.f32 %v356_v41, %v180_v40  ;;  %v471_v46 = vmax.f32 %v457_v42, 0.0 }
 0x122   :  { %v358_v44 = vpop.f32.mrf.mxu0 }
 0x123   :  { %v462_v45 = vadd.f32 %v647_v20, %v357_v43 }
 0x125   :  { %v472_v47 = vmax.f32 %v462_v45, 0.0 }
 0x127   :  { %v575_v48 = vpack.c.bf16 %v472_v47, %v471_v46 }
 0x129   :  { %579 = vst [vmem:[%s867_s3 + $0x18] sm:$0xff] %v575_v48  }

// kernel: autoencoder_forward.12
= control target key start
LH: loop header
LB: loop body
LE: loop exit
PB: predicated region body
PF: predicated region fallthrough
CT: control target
= control target key end

     0   :  { %vm197_vm0 = vcmask 523264   ;;  %s1001_s1 = inlined_call_operand.vmem [shape: bf16[1,576,128], index: 1, kind: input, shape index: {}]   ;;  %s1002_s0 = inlined_call_operand.vmem [shape: bf16[1,32,576], index: 0, kind: input, shape index: {}]   ;;  %s1003_s2 = inlined_call_operand.vmem [shape: f32[1,1,128], index: 2, kind: input, shape index: {}]   ;;  %s1004_s3 = inlined_call_operand.vmem [shape: bf16[1,32,128], index: 3, kind: output, shape index: {}]  }
   0x1   :  { %v674_v0 = vld [vmem:[%s1001_s1 + $0x78] sm:$0xff]   ;;  %v673_v8 = vld [vmem:[%s1001_s1 + $0x70] sm:$0xff]   ;;  %v672_v20 = vld [vmem:[%s1001_s1 + $0x68] sm:$0xff]  }
   0x2   :  { %v690_v1 = vld [vmem:[%s1001_s1 + $0xf8] sm:$0xff]   ;;  %v568_v3 = vunpack.c.l.bf16 %v674_v0  ;;  %v569_v4 = vunpack.c.h.bf16 %v674_v0  ;;  %v689_v9 = vld [vmem:[%s1001_s1 + $0xf0] sm:$0xff]   ;;  %v565_v16 = vunpack.c.h.bf16 %v673_v8  ;;  %v688_v21 = vld [vmem:[%s1001_s1 + $0xe8] sm:$0xff]   ;;  %v564_v22 = vunpack.c.l.bf16 %v673_v8 }
   0x3   :  { %v666_v2 = vld [vmem:[%s1001_s1 + $0x38] sm:$0xff]   ;;  %v632_v5 = vunpack.c.l.bf16 %v690_v1  ;;  %v633_v6 = vunpack.c.h.bf16 %v690_v1  ;;  %v665_v14 = vld [vmem:[%s1001_s1 + $0x30] sm:$0xff]   ;;  %v629_v17 = vunpack.c.h.bf16 %v689_v9  ;;  %v628_v23 = vunpack.c.l.bf16 %v689_v9  ;;  %v664_v24 = vld [vmem:[%s1001_s1 + $0x28] sm:$0xff]  }
   0x4   :  { %v682_v7 = vld [vmem:[%s1001_s1 + $0xb8] sm:$0xff]   ;;  %v536_v10 = vunpack.c.l.bf16 %v666_v2  ;;  %v537_v11 = vunpack.c.h.bf16 %v666_v2  ;;  %v681_v15 = vld [vmem:[%s1001_s1 + $0xb0] sm:$0xff]   ;;  %696 = vmatprep.subr.mxu0 %v569_v4  ;;  %v533_v18 = vunpack.c.h.bf16 %v665_v14  ;;  %v680_v25 = vld [vmem:[%s1001_s1 + $0xa8] sm:$0xff]   ;;  %v532_v26 = vunpack.c.l.bf16 %v665_v14 }
   0x5   :  { %v600_v12 = vunpack.c.l.bf16 %v682_v7  ;;  %v601_v13 = vunpack.c.h.bf16 %v682_v7  ;;  %740 = vmatprep.subr.mxu1 %v633_v6  ;;  %v597_v19 = vunpack.c.h.bf16 %v681_v15  ;;  %v596_v27 = vunpack.c.l.bf16 %v681_v15  ;;  %v671_v32 = vld [vmem:[%s1001_s1 + $0x60] sm:$0xff]   ;;  %v670_v44 = vld [vmem:[%s1001_s1 + $0x58] sm:$0xff]   ;;  %v669_v56 = vld [vmem:[%s1001_s1 + $0x50] sm:$0xff]  }
   0x6   :  { %697 = vmatpush3.msra.mxu0 %v537_v11  ;;  %v561_v28 = vunpack.c.h.bf16 %v672_v20  ;;  %v625_v29 = vunpack.c.h.bf16 %v688_v21  ;;  %v529_v30 = vunpack.c.h.bf16 %v664_v24  ;;  %v593_v31 = vunpack.c.h.bf16 %v680_v25  ;;  %v687_v33 = vld [vmem:[%s1001_s1 + $0xe0] sm:$0xff]   ;;  %v686_v45 = vld [vmem:[%s1001_s1 + $0xd8] sm:$0xff]   ;;  %v685_v57 = vld [vmem:[%s1001_s1 + $0xd0] sm:$0xff]  }
   0x7   :  { %741 = vmatpush3.msra.mxu1 %v601_v13  ;;  %698 = vmatprep.subr.mxu0 %v568_v3  ;;  %v560_v34 = vunpack.c.l.bf16 %v672_v20  ;;  %v624_v35 = vunpack.c.l.bf16 %v688_v21  ;;  %v663_v36 = vld [vmem:[%s1001_s1 + $0x20] sm:$0xff]   ;;  %v528_v38 = vunpack.c.l.bf16 %v664_v24  ;;  %v592_v39 = vunpack.c.l.bf16 %v680_v25  ;;  %v662_v48 = vld [vmem:[%s1001_s1 + $0x18] sm:$0xff]   ;;  %v661_v60 = vld [vmem:[%s1001_s1 + $0x10] sm:$0xff]  }
   0x8   :  { %742 = vmatprep.subr.mxu1 %v632_v5  ;;  %699 = vmatpush3.msra.mxu0 %v536_v10  ;;  %v679_v37 = vld [vmem:[%s1001_s1 + $0xa0] sm:$0xff]   ;;  %v557_v40 = vunpack.c.h.bf16 %v671_v32  ;;  %v621_v41 = vunpack.c.h.bf16 %v687_v33  ;;  %v525_v42 = vunpack.c.h.bf16 %v663_v36  ;;  %v556_v46 = vunpack.c.l.bf16 %v671_v32  ;;  %v678_v49 = vld [vmem:[%s1001_s1 + $0x98] sm:$0xff]   ;;  %v677_v61 = vld [vmem:[%s1001_s1 + $0x90] sm:$0xff]  }
   0x9   :  { %743 = vmatpush3.msra.mxu1 %v600_v12  ;;  %700 = vmatprep.subr.mxu0 %v565_v16  ;;  %v589_v43 = vunpack.c.h.bf16 %v679_v37  ;;  %v620_v47 = vunpack.c.l.bf16 %v687_v33  ;;  %v524_v50 = vunpack.c.l.bf16 %v663_v36  ;;  %v588_v51 = vunpack.c.l.bf16 %v679_v37  ;;  %v668_v4 = vld [vmem:[%s1001_s1 + $0x48] sm:$0xff]   ;;  %v667_v16 = vld [vmem:[%s1001_s1 + $0x40] sm:$0xff]  }
   0xa   :  { %744 = vmatprep.subr.mxu1 %v629_v17  ;;  %701 = vmatpush3.msra.mxu0 %v533_v18  ;;  %v553_v52 = vunpack.c.h.bf16 %v670_v44  ;;  %v617_v53 = vunpack.c.h.bf16 %v686_v45  ;;  %v521_v54 = vunpack.c.h.bf16 %v662_v48  ;;  %v585_v55 = vunpack.c.h.bf16 %v678_v49  ;;  %v684_v5 = vld [vmem:[%s1001_s1 + $0xc8] sm:$0xff]   ;;  %v683_v17 = vld [vmem:[%s1001_s1 + $0xc0] sm:$0xff]  }
   0xb   :  { %745 = vmatpush3.msra.mxu1 %v597_v19  ;;  %702 = vmatprep.subr.mxu0 %v564_v22  ;;  %v552_v58 = vunpack.c.l.bf16 %v670_v44  ;;  %v616_v59 = vunpack.c.l.bf16 %v686_v45  ;;  %v520_v62 = vunpack.c.l.bf16 %v662_v48  ;;  %v584_v63 = vunpack.c.l.bf16 %v678_v49  ;;  %v660_v8 = vld [vmem:[%s1001_s1 + $0x8] sm:$0xff]   ;;  %v507_v20 = vld [vmem:[%s1001_s1] sm:$0xff]   ;;  %v693_v45 = vld [vmem:[%s1001_s1 + $0x110] sm:$0xff]  }
   0xc   :  { %746 = vmatprep.subr.mxu1 %v628_v23  ;;  %703 = vmatpush3.msra.mxu0 %v532_v26  ;;  %v549_v0 = vunpack.c.h.bf16 %v669_v56  ;;  %v613_v1 = vunpack.c.h.bf16 %v685_v57  ;;  %v517_v2 = vunpack.c.h.bf16 %v661_v60  ;;  %v581_v3 = vunpack.c.h.bf16 %v677_v61  ;;  %v676_v9 = vld [vmem:[%s1001_s1 + $0x88] sm:$0xff]   ;;  %v675_v21 = vld [vmem:[%s1001_s1 + $0x80] sm:$0xff]  }
   0xd   :  { %747 = vmatpush3.msra.mxu1 %v596_v27  ;;  %704 = vmatprep.subr.mxu0 %v561_v28  ;;  %v548_v6 = vunpack.c.l.bf16 %v669_v56  ;;  %v612_v7 = vunpack.c.l.bf16 %v685_v57  ;;  %v516_v10 = vunpack.c.l.bf16 %v661_v60  ;;  %v580_v11 = vunpack.c.l.bf16 %v677_v61  ;;  %v14_v26 = vld [vmem:[%s1002_s0] sm:$0xff]  ;;  %v20_v49 = vld [vmem:[%s1002_s0 + $0x28] sm:$0xff] }
   0xe   :  { %748 = vmatprep.subr.mxu1 %v625_v29  ;;  %705 = vmatpush3.msra.mxu0 %v529_v30  ;;  %v545_v12 = vunpack.c.h.bf16 %v668_v4  ;;  %v609_v13 = vunpack.c.h.bf16 %v684_v5  ;;  %v513_v14 = vunpack.c.h.bf16 %v660_v8  ;;  %v577_v15 = vunpack.c.h.bf16 %v676_v9  ;;  %v15_v29 = vld [vmem:[%s1002_s0 + $0x8] sm:$0xff] }
   0xf   :  { %749 = vmatpush3.msra.mxu1 %v593_v31  ;;  %706 = vmatprep.subr.mxu0 %v560_v34  ;;  %v544_v18 = vunpack.c.l.bf16 %v668_v4  ;;  %v608_v19 = vunpack.c.l.bf16 %v684_v5  ;;  %v512_v22 = vunpack.c.l.bf16 %v660_v8  ;;  %v576_v23 = vunpack.c.l.bf16 %v676_v9  ;;  %v694_v34 = vld [vmem:[%s1001_s1 + $0x118] sm:$0xff]   ;;  %v19_v5 = vld [vmem:[%s1002_s0 + $0x24] ss:$40 sps:$4 sm:$0xff]  }
  0x10   :  { %750 = vmatprep.subr.mxu1 %v624_v35  ;;  %707 = vmatpush3.msra.mxu0 %v528_v38  ;;  %v541_v24 = vunpack.c.h.bf16 %v667_v16  ;;  %v605_v25 = vunpack.c.h.bf16 %v683_v17  ;;  %v509_v27 = vunpack.c.h.bf16 %v507_v20  ;;  %v573_v28 = vunpack.c.h.bf16 %v675_v21 }
  0x11   :  { %751 = vmatpush3.msra.mxu1 %v592_v39  ;;  %708 = vmatprep.subr.mxu0 %v557_v40  ;;  %v540_v30 = vunpack.c.l.bf16 %v667_v16  ;;  %v604_v31 = vunpack.c.l.bf16 %v683_v17  ;;  %v508_v32 = vunpack.c.l.bf16 %v507_v20  ;;  %v27_v33 = vunpack.c.h.bf16 %v14_v26  ;;  %v17_v40 = vld [vmem:[%s1002_s0 + $0x14] sm:$0xff] }
  0x12   :  { %752 = vmatprep.subr.mxu1 %v621_v41  ;;  %709 = vmatpush3.msra.mxu0 %v525_v42  ;;  %v572_v35 = vunpack.c.l.bf16 %v675_v21  ;;  %v29_v36 = vunpack.c.h.bf16 %v15_v29  ;;  %v26_v37 = vunpack.c.l.bf16 %v14_v26  ;;  %v28_v38 = vunpack.c.l.bf16 %v15_v29  ;;  %v18_v41 = vld [vmem:[%s1002_s0 + $0x1c] sm:$0xff] }
  0x13   :  { %753 = vmatpush3.msra.mxu1 %v589_v43  ;;  %710 = vmatprep.subr.mxu0 %v556_v46  ;;  %v649_v39 = vunpack.c.h.bf16 %v694_v34  ;;  %v648_v42 = vunpack.c.l.bf16 %v694_v34  ;;  %v32_v43 = vunpack.c.h.bf16 %v17_v40  ;;  %v34_v44 = vunpack.c.h.bf16 %v18_v41 }
  0x14   :  { %754 = vmatprep.subr.mxu1 %v620_v47  ;;  %711 = vmatpush3.msra.mxu0 %v524_v50  ;;  %v31_v46 = vunpack.c.l.bf16 %v17_v40  ;;  %v33_v47 = vunpack.c.l.bf16 %v18_v41  ;;  %v645_v48 = vunpack.c.h.bf16 %v693_v45  ;;  %v21_v50 = vld [vmem:[%s1002_s0 + $0x30] sm:$0xff]  ;;  %v35_v8 = vunpack.c.l.bf16 %v19_v5 }
  0x15   :  { %755 = vmatpush3.msra.mxu1 %v588_v51  ;;  %712 = vmatprep.subr.mxu0 %v553_v52  ;;  %v644_v51 = vunpack.c.l.bf16 %v693_v45  ;;  %v37_v52 = vunpack.c.h.bf16 %v20_v49  ;;  %v38_v56 = vunpack.c.l.bf16 %v21_v50  ;;  %v45_v9 = vunpack.c.h.bf16 %v19_v5 }
  0x16   :  { %756 = vmatprep.subr.mxu1 %v617_v53  ;;  %713 = vmatpush3.msra.mxu0 %v521_v54  ;;  %v39_v53 = vunpack.c.h.bf16 %v21_v50  ;;  %v692_v54 = vld [vmem:[%s1001_s1 + $0x108] sm:$0xff]  }
  0x17   :  { %757 = vmatpush3.msra.mxu1 %v585_v55  ;;  %714 = vmatprep.subr.mxu0 %v552_v58  ;;  %v36_v55 = vunpack.c.l.bf16 %v20_v49  ;;  %v641_v57 = vunpack.c.h.bf16 %v692_v54  ;;  %v23_v58 = vld [vmem:[%s1002_s0 + $0x3c] sm:$0xff]  ;;  %v640_v60 = vunpack.c.l.bf16 %v692_v54 }
  0x18   :  { %758 = vmatprep.subr.mxu1 %v616_v59  ;;  %715 = vmatpush3.msra.mxu0 %v520_v62  ;;  %v24_v59 = vld [vmem:[%s1002_s0 + $0x44] sm:$0xff]  ;;  %v42_v61 = vunpack.c.h.bf16 %v23_v58 }
  0x19   :  { %759 = vmatpush3.msra.mxu1 %v584_v63  ;;  %716 = vmatprep.subr.mxu0 %v549_v0  ;;  %v44_v62 = vunpack.c.h.bf16 %v24_v59  ;;  %v691_v63 = vld [vmem:[%s1001_s1 + $0x100] sm:$0xff]   ;;  %v41_v0 = vunpack.c.l.bf16 %v23_v58 }
  0x1a   :  { %760 = vmatprep.subr.mxu1 %v613_v1  ;;  %717 = vmatpush3.msra.mxu0 %v517_v2  ;;  %v43_v1 = vunpack.c.l.bf16 %v24_v59  ;;  %v637_v2 = vunpack.c.h.bf16 %v691_v63  ;;  %v636_v4 = vunpack.c.l.bf16 %v691_v63 }
  0x1b   :  { %761 = vmatpush3.msra.mxu1 %v581_v3  ;;  %718 = vmatprep.subr.mxu0 %v548_v6  ;;  %v16_v3 = vld [vmem:[%s1002_s0 + $0x10] ss:$40 sps:$4 sm:$0xff]  }
  0x1c   :  { %762 = vmatprep.subr.mxu1 %v612_v7  ;;  %719 = vmatpush3.msra.mxu0 %v516_v10  ;;  %v30_v6 = vunpack.c.l.bf16 %v16_v3  ;;  %v40_v7 = vunpack.c.h.bf16 %v16_v3 }
  0x1d   :  { %763 = vmatpush3.msra.mxu1 %v580_v11  ;;  %720 = vmatprep.subr.mxu0 %v545_v12 }
  0x1e   :  { %764 = vmatprep.subr.mxu1 %v609_v13  ;;  %721 = vmatpush3.msra.mxu0 %v513_v14 }
  0x1f   :  { %765 = vmatpush3.msra.mxu1 %v577_v15  ;;  %722 = vmatprep.subr.mxu0 %v544_v18 }
  0x20   :  { %766 = vmatprep.subr.mxu1 %v608_v19  ;;  %723 = vmatpush3.msra.mxu0 %v512_v22 }
  0x21   :  { %767 = vmatpush3.msra.mxu1 %v576_v23  ;;  %724 = vmatprep.subr.mxu0 %v541_v24 }
  0x22   :  { %768 = vmatprep.subr.mxu1 %v605_v25  ;;  %725 = vmatpush3.msra.mxu0 %v509_v27  ;;  %v493_v25 = vld [vmem:[%s1003_s2] ss:$0 sm:$0xff] }
  0x23   :  { %769 = vmatpush3.msra.mxu1 %v573_v28  ;;  %726 = vmatprep.subr.mxu0 %v540_v30 }
  0x24   :  { %770 = vmatprep.subr.mxu1 %v604_v31  ;;  %727 = vmatpush3.msra.mxu0 %v508_v32 }
  0x25   :  { %274 = vmatprep.mubr.f32.mxu0 %v27_v33  ;;  %771 = vmatpush3.msra.mxu1 %v572_v35 }
  0x26   :  { %359 = vmatprep.mubr.f32.mxu1 %v29_v36  ;;  %275 = vmatmul.mubr.f32.vlgmr.msra.gmra.mxu0 %v26_v37 }
  0x27   :  { %360 = vmatmul.mubr.f32.vlgmr.msra.gmra.mxu1 %v28_v38  ;;  %796 = vmatprep.subr.mxu0 %v649_v39 }
  0x28   :  { %818 = vmatprep.subr.mxu1 %v649_v39  ;;  %797 = vmatpush3.msra.mxu0 %v649_v39 }
  0x29   :  { %826 = vmatpush3.msra.mxu1 %v649_v39  ;;  %798 = vmatprep.subr.mxu0 %v648_v42 }
  0x2a   :  { %819 = vmatprep.subr.mxu1 %v648_v42  ;;  %279 = vmatprep.mubr.f32.mxu0 %v32_v43 }
  0x2b   :  { %364 = vmatprep.mubr.f32.mxu1 %v34_v44  ;;  %799 = vmatpush3.msra.mxu0 %v648_v42 }
  0x2c   :  { %827 = vmatpush3.msra.mxu1 %v648_v42  ;;  %280 = vmatmul.mubr.f32.gmra.mxu0 %v31_v46 }
  0x2d   :  { %365 = vmatmul.mubr.f32.gmra.mxu1 %v33_v47  ;;  %800 = vmatprep.subr.mxu0 %v645_v48 }
  0x2e   :  { %820 = vmatprep.subr.mxu1 %v645_v48  ;;  %801 = vmatpush3.msra.mxu0 %v645_v48 }
  0x2f   :  { %828 = vmatpush3.msra.mxu1 %v645_v48  ;;  %802 = vmatprep.subr.mxu0 %v644_v51 }
  0x30   :  { %821 = vmatprep.subr.mxu1 %v644_v51  ;;  %284 = vmatprep.mubr.f32.mxu0 %v37_v52 }
  0x31   :  { %369 = vmatprep.mubr.f32.mxu1 %v39_v53  ;;  %803 = vmatpush3.msra.mxu0 %v644_v51 }
  0x32   :  { %829 = vmatpush3.msra.mxu1 %v644_v51  ;;  %285 = vmatmul.mubr.f32.gmra.mxu0 %v36_v55 }
  0x33   :  { %370 = vmatmul.mubr.f32.gmra.mxu1 %v38_v56  ;;  %804 = vmatprep.subr.mxu0 %v641_v57 }
  0x34   :  { %822 = vmatprep.subr.mxu1 %v641_v57  ;;  %805 = vmatpush3.msra.mxu0 %v641_v57 }
  0x35   :  { %830 = vmatpush3.msra.mxu1 %v641_v57  ;;  %806 = vmatprep.subr.mxu0 %v640_v60 }
  0x36   :  { %823 = vmatprep.subr.mxu1 %v640_v60  ;;  %289 = vmatprep.mubr.f32.mxu0 %v42_v61 }
  0x37   :  { %374 = vmatprep.mubr.f32.mxu1 %v44_v62  ;;  %807 = vmatpush3.msra.mxu0 %v640_v60 }
  0x38   :  { %831 = vmatpush3.msra.mxu1 %v640_v60  ;;  %290 = vmatmul.mubr.f32.gmra.mxu0 %v41_v0 }
  0x39   :  { %375 = vmatmul.mubr.f32.gmra.mxu1 %v43_v1  ;;  %808 = vmatprep.subr.mxu0 %v637_v2 }
  0x3a   :  { %824 = vmatprep.subr.mxu1 %v637_v2  ;;  %809 = vmatpush3.msra.mxu0 %v637_v2 }
  0x3b   :  { %832 = vmatpush3.msra.mxu1 %v637_v2  ;;  %810 = vmatprep.subr.mxu0 %v636_v4 }
  0x3c   :  { %825 = vmatprep.subr.mxu1 %v636_v4  ;;  %811 = vmatpush3.msra.mxu0 %v636_v4 }
  0x3d   :  { %833 = vmatpush3.msra.mxu1 %v636_v4  ;;  %812 = vmatprep.mubr.msk.f32.mxu0 %vm197_vm0, %v30_v6 }
  0x3e   :  { %815 = vmatprep.mubr.msk.f32.mxu1 %vm197_vm0, %v40_v7  ;;  %813 = vmatmul.mubr.msk.f32.vlgmr.msra.gmra.mxu0 %vm197_vm0, %v35_v8 }
  0x3f   :  { %816 = vmatmul.mubr.msk.f32.vlgmr.msra.gmra.mxu1 %vm197_vm0, %v45_v9 }
  0xe6   :  { %v728_v10 = vpop.f32.mrf.mxu0 }
  0xe7   :  { %v772_v11 = vpop.f32.mrf.mxu1 }
  0xe8   :  { %v729_v12 = vpop.f32.mrf.mxu0 }
  0xe9   :  { %v773_v13 = vpop.f32.mrf.mxu1  ;;  %v730_v23 = vadd.f32 %v729_v12, %v728_v10 }
  0xea   :  { %v774_v35 = vadd.f32 %v773_v13, %v772_v11 }
  0xeb   :  { %v277_v31 = vadd.f32 %v730_v23, %v493_v25 }
  0xec   :  { %v731_v14 = vpop.f32.mrf.mxu0 }
  0xed   :  { %v775_v15 = vpop.f32.mrf.mxu1  ;;  %v362_v44 = vadd.f32 %v774_v35, %v277_v31 }
  0xee   :  { %v732_v16 = vpop.f32.mrf.mxu0 }
  0xef   :  { %v776_v17 = vpop.f32.mrf.mxu1  ;;  %v733_v22 = vadd.f32 %v732_v16, %v731_v14 }
  0xf0   :  { %v777_v32 = vadd.f32 %v776_v17, %v775_v15 }
  0xf1   :  { %v282_v28 = vadd.f32 %v733_v22, %v493_v25 }
  0xf2   :  { %v734_v18 = vpop.f32.mrf.mxu0 }
  0xf3   :  { %v778_v19 = vpop.f32.mrf.mxu1  ;;  %v367_v39 = vadd.f32 %v777_v32, %v282_v28 }
  0xf4   :  { %v735_v20 = vpop.f32.mrf.mxu0 }
  0xf5   :  { %v779_v21 = vpop.f32.mrf.mxu1  ;;  %v736_v24 = vadd.f32 %v735_v20, %v734_v18 }
  0xf6   :  { %v780_v36 = vadd.f32 %v779_v21, %v778_v19 }
  0xf7   :  { %v287_v33 = vadd.f32 %v736_v24, %v493_v25 }
  0xf8   :  { %v737_v26 = vpop.f32.mrf.mxu0 }
  0xf9   :  { %v781_v27 = vpop.f32.mrf.mxu1  ;;  %v372_v45 = vadd.f32 %v780_v36, %v287_v33 }
  0xfa   :  { %v738_v29 = vpop.f32.mrf.mxu0 }
  0xfb   :  { %v782_v30 = vpop.f32.mrf.mxu1  ;;  %v739_v34 = vadd.f32 %v738_v29, %v737_v26 }
  0xfc   :  { %v783_v38 = vadd.f32 %v782_v30, %v781_v27 }
  0xfd   :  { %v292_v37 = vadd.f32 %v739_v34, %v493_v25 }
  0xfe   :  { %v814_v40 = vpop.f32.mrf.mxu0 }
  0xff   :  { %v817_v41 = vpop.f32.mrf.mxu1  ;;  %v452_v42 = vadd.f32 %v814_v40, %v367_v39  ;;  %v377_v43 = vadd.f32 %v783_v38, %v292_v37 }
 0x100   :  { %v446_v46 = vpop.f32.mrf.mxu0 }
 0x101   :  { %v456_v47 = vpop.f32.mrf.mxu1  ;;  %v462_v48 = vadd.f32 %v817_v41, %v377_v43  ;;  %v447_v49 = vadd.f32 %v446_v46, %v362_v44  ;;  %v466_v51 = vmax.f32 %v452_v42, 0.0 }
 0x102   :  { %v457_v50 = vadd.f32 %v456_v47, %v372_v45 }
 0x103   :  { %v468_v52 = vmax.f32 %v462_v48, 0.0  ;;  %v465_v53 = vmax.f32 %v447_v49, 0.0 }
 0x104   :  { %v467_v54 = vmax.f32 %v457_v50, 0.0 }
 0x105   :  { %v653_v55 = vpack.c.bf16 %v466_v51, %v465_v53 }
 0x106   :  { %v658_v56 = vpack.c.bf16 %v468_v52, %v467_v54 }
 0x107   :  { %654 = vst [vmem:[%s1004_s3] sm:$0xff] %v653_v55  }
 0x108   :  { %695 = vst [vmem:[%s1004_s3 + $0x8] sm:$0xff] %v658_v56  }

// kernel: squeeze.8
= control target key start
LH: loop header
LB: loop body
LE: loop exit
PB: predicated region body
PF: predicated region fallthrough
CT: control target
= control target key end

     0   :  { %v136_v6 = vmov 0.0   ;;  %s174_s0 = inlined_call_operand.vmem [shape: bf16[1,8,256], index: 0, kind: input, shape index: {}]   ;;  %s175_s1 = inlined_call_operand.vmem [shape: bf16[2,2,2,256], index: 1, kind: output, shape index: {}]  }
   0x1   :  { %v132_v0 = vld [vmem:[%s174_s0] sm:$0xff]  }
   0x2   :  { %v133_v1 = vunpack.c.l.bf16 %v132_v0  ;;  %v134_v2 = vunpack.c.h.bf16 %v132_v0 }
   0x4   :  { %35 = vst [vmem:[#allocation0] ss:$46 sps:$4 sm:$0xc3] %v133_v1   ;;  %37 = vst [vmem:[#allocation0 + $0xe] ss:$18 sps:$4 sm:$0x3c] %v133_v1  }
   0x5   :  { %45 = vst [vmem:[#allocation0 + $0x8] ss:$46 sps:$4 sm:$0xc3] %v134_v2   ;;  %47 = vst [vmem:[#allocation0 + $0x16] ss:$18 sps:$4 sm:$0x3c] %v134_v2  }
   0xb   :  { %v57_v3 = vld [vmem:[#allocation0] sm:$0x3]  ;;  %v70_v5 = vld [vmem:[#allocation0 + $0x10] sm:$0x3] }
   0xc   :  { %v63_v4 = vld [vmem:[#allocation0 + $0x8] sm:$0x3]  ;;  %v58_v7 = vpack.c.bf16 %v136_v6, %v57_v3  ;;  %v71_v9 = vpack.c.bf16 %v136_v6, %v70_v5  ;;  %v78_v10 = vld [vmem:[#allocation0 + $0x18] sm:$0x3]  ;;  %v86_v11 = vld [vmem:[#allocation0 + $0x20] sm:$0x3] }
   0xd   :  { %v64_v8 = vpack.c.bf16 %v136_v6, %v63_v4  ;;  %v94_v12 = vld [vmem:[#allocation0 + $0x28] sm:$0x3]  ;;  %v79_v13 = vpack.c.bf16 %v136_v6, %v78_v10  ;;  %v87_v14 = vpack.c.bf16 %v136_v6, %v86_v11  ;;  %v102_v16 = vld [vmem:[#allocation0 + $0x30] sm:$0x3]  ;;  %v110_v17 = vld [vmem:[#allocation0 + $0x38] sm:$0x3] }
   0xe   :  { %v95_v15 = vpack.c.bf16 %v136_v6, %v94_v12  ;;  %61 = vst [vmem:[%s175_s1] sm:$0x1] %v58_v7  ;;  %125 = vst [vmem:[%s175_s1 + $0x2] sm:$0x1] %v71_v9  ;;  %v103_v18 = vpack.c.bf16 %v136_v6, %v102_v16  ;;  %v111_v19 = vpack.c.bf16 %v136_v6, %v110_v17 }
   0xf   :  { %124 = vst [vmem:[%s175_s1 + $0x1] sm:$0x1] %v64_v8  ;;  %126 = vst [vmem:[%s175_s1 + $0x3] sm:$0x1] %v79_v13 }
  0x10   :  { %127 = vst [vmem:[%s175_s1 + $0x4] sm:$0x1] %v87_v14  ;;  %128 = vst [vmem:[%s175_s1 + $0x5] sm:$0x1] %v95_v15 }
  0x11   :  { %129 = vst [vmem:[%s175_s1 + $0x6] sm:$0x1] %v103_v18  ;;  %130 = vst [vmem:[%s175_s1 + $0x7] sm:$0x1] %v111_v19 }

// kernel: autoencoder_forward.13
= control target key start
LH: loop header
LB: loop body
LE: loop exit
PB: predicated region body
PF: predicated region fallthrough
CT: control target
= control target key end

     0   :  { %s1319_s1 = inlined_call_operand.vmem [shape: bf16[1,1152,256], index: 1, kind: input, shape index: {}]   ;;  %s1320_s0 = inlined_call_operand.vmem [shape: bf16[1,8,1152], index: 0, kind: input, shape index: {}]   ;;  %s1321_s2 = inlined_call_operand.vmem [shape: f32[1,1,256], index: 2, kind: input, shape index: {}]   ;;  %s1322_s3 = inlined_call_operand.vmem [shape: bf16[1,8,256], index: 3, kind: output, shape index: {}]  }
   0x1   :  { %v43_v0 = vld [vmem:[%s1319_s1 + $0x78] sm:$0xff]  ;;  %v42_v1 = vld [vmem:[%s1319_s1 + $0x70] sm:$0xff]  ;;  %v41_v7 = vld [vmem:[%s1319_s1 + $0x68] sm:$0xff] }
   0x2   :  { %v75_v2 = vld [vmem:[%s1319_s1 + $0x178] sm:$0xff]  ;;  %v203_v3 = vunpack.c.h.bf16 %v43_v0  ;;  %v202_v4 = vunpack.c.l.bf16 %v43_v0  ;;  %v201_v5 = vunpack.c.h.bf16 %v42_v1  ;;  %v74_v8 = vld [vmem:[%s1319_s1 + $0x170] sm:$0xff]  ;;  %v200_v9 = vunpack.c.l.bf16 %v42_v1  ;;  %v40_v12 = vld [vmem:[%s1319_s1 + $0x60] sm:$0xff] }
   0x3   :  { %v267_v6 = vunpack.c.h.bf16 %v75_v2  ;;  %v266_v10 = vunpack.c.l.bf16 %v75_v2  ;;  %v265_v11 = vunpack.c.h.bf16 %v74_v8  ;;  %v73_v13 = vld [vmem:[%s1319_s1 + $0x168] sm:$0xff]  ;;  %v72_v14 = vld [vmem:[%s1319_s1 + $0x160] sm:$0xff]  ;;  %v199_v15 = vunpack.c.h.bf16 %v41_v7  ;;  %v39_v20 = vld [vmem:[%s1319_s1 + $0x58] sm:$0xff] }
   0x4   :  { %472 = vmatprep.subr.mxu0 %v203_v3  ;;  %v264_v16 = vunpack.c.l.bf16 %v74_v8  ;;  %v263_v17 = vunpack.c.h.bf16 %v73_v13  ;;  %v198_v18 = vunpack.c.l.bf16 %v41_v7  ;;  %v262_v19 = vunpack.c.l.bf16 %v73_v13  ;;  %v71_v21 = vld [vmem:[%s1319_s1 + $0x158] sm:$0xff]  ;;  %v38_v26 = vld [vmem:[%s1319_s1 + $0x50] sm:$0xff]  ;;  %v37_v32 = vld [vmem:[%s1319_s1 + $0x48] sm:$0xff] }
   0x5   :  { %543 = vmatprep.subr.mxu1 %v267_v6  ;;  %473 = vmatpush1.msra.mxu0 %v202_v4  ;;  %v197_v22 = vunpack.c.h.bf16 %v40_v12  ;;  %v261_v23 = vunpack.c.h.bf16 %v72_v14  ;;  %v196_v24 = vunpack.c.l.bf16 %v40_v12  ;;  %v260_v25 = vunpack.c.l.bf16 %v72_v14  ;;  %v70_v27 = vld [vmem:[%s1319_s1 + $0x150] sm:$0xff]  ;;  %v69_v33 = vld [vmem:[%s1319_s1 + $0x148] sm:$0xff]  ;;  %v36_v38 = vld [vmem:[%s1319_s1 + $0x40] sm:$0xff] }
   0x6   :  { %544 = vmatpush1.msra.mxu1 %v266_v10  ;;  %474 = vmatprep.subr.mxu0 %v201_v5  ;;  %v195_v28 = vunpack.c.h.bf16 %v39_v20  ;;  %v259_v29 = vunpack.c.h.bf16 %v71_v21  ;;  %v194_v30 = vunpack.c.l.bf16 %v39_v20  ;;  %v258_v31 = vunpack.c.l.bf16 %v71_v21  ;;  %v68_v39 = vld [vmem:[%s1319_s1 + $0x140] sm:$0xff]  ;;  %v35_v44 = vld [vmem:[%s1319_s1 + $0x38] sm:$0xff]  ;;  %v34_v50 = vld [vmem:[%s1319_s1 + $0x30] sm:$0xff] }
   0x7   :  { %545 = vmatprep.subr.mxu1 %v265_v11  ;;  %475 = vmatpush1.msra.mxu0 %v200_v9  ;;  %v193_v34 = vunpack.c.h.bf16 %v38_v26  ;;  %v257_v35 = vunpack.c.h.bf16 %v70_v27  ;;  %v192_v36 = vunpack.c.l.bf16 %v38_v26  ;;  %v256_v37 = vunpack.c.l.bf16 %v70_v27  ;;  %v67_v45 = vld [vmem:[%s1319_s1 + $0x138] sm:$0xff]  ;;  %v66_v51 = vld [vmem:[%s1319_s1 + $0x130] sm:$0xff]  ;;  %v33_v56 = vld [vmem:[%s1319_s1 + $0x28] sm:$0xff] }
   0x8   :  { %546 = vmatpush1.msra.mxu1 %v264_v16  ;;  %476 = vmatprep.subr.mxu0 %v199_v15  ;;  %v191_v40 = vunpack.c.h.bf16 %v37_v32  ;;  %v255_v41 = vunpack.c.h.bf16 %v69_v33  ;;  %v190_v42 = vunpack.c.l.bf16 %v37_v32  ;;  %v254_v43 = vunpack.c.l.bf16 %v69_v33  ;;  %v65_v57 = vld [vmem:[%s1319_s1 + $0x128] sm:$0xff]  ;;  %v32_v62 = vld [vmem:[%s1319_s1 + $0x20] sm:$0xff]  ;;  %v31_v4 = vld [vmem:[%s1319_s1 + $0x18] sm:$0xff] }
   0x9   :  { %547 = vmatprep.subr.mxu1 %v263_v17  ;;  %477 = vmatpush1.msra.mxu0 %v198_v18  ;;  %v189_v46 = vunpack.c.h.bf16 %v36_v38  ;;  %v253_v47 = vunpack.c.h.bf16 %v68_v39  ;;  %v188_v48 = vunpack.c.l.bf16 %v36_v38  ;;  %v252_v49 = vunpack.c.l.bf16 %v68_v39  ;;  %v64_v63 = vld [vmem:[%s1319_s1 + $0x120] sm:$0xff]  ;;  %v63_v5 = vld [vmem:[%s1319_s1 + $0x118] sm:$0xff]  ;;  %v30_v10 = vld [vmem:[%s1319_s1 + $0x10] sm:$0xff] }
   0xa   :  { %548 = vmatpush1.msra.mxu1 %v262_v19  ;;  %478 = vmatprep.subr.mxu0 %v197_v22  ;;  %v187_v52 = vunpack.c.h.bf16 %v35_v44  ;;  %v251_v53 = vunpack.c.h.bf16 %v67_v45  ;;  %v186_v54 = vunpack.c.l.bf16 %v35_v44  ;;  %v250_v55 = vunpack.c.l.bf16 %v67_v45  ;;  %v62_v11 = vld [vmem:[%s1319_s1 + $0x110] sm:$0xff]  ;;  %v29_v16 = vld [vmem:[%s1319_s1 + $0x8] sm:$0xff]  ;;  %v28_v22 = vld [vmem:[%s1319_s1] sm:$0xff] }
   0xb   :  { %549 = vmatprep.subr.mxu1 %v261_v23  ;;  %479 = vmatpush1.msra.mxu0 %v196_v24  ;;  %v185_v58 = vunpack.c.h.bf16 %v34_v50  ;;  %v249_v59 = vunpack.c.h.bf16 %v66_v51  ;;  %v184_v60 = vunpack.c.l.bf16 %v34_v50  ;;  %v248_v61 = vunpack.c.l.bf16 %v66_v51  ;;  %v61_v17 = vld [vmem:[%s1319_s1 + $0x108] sm:$0xff]  ;;  %v60_v23 = vld [vmem:[%s1319_s1 + $0x100] sm:$0xff] }
   0xc   :  { %550 = vmatpush1.msra.mxu1 %v260_v25  ;;  %480 = vmatprep.subr.mxu0 %v195_v28  ;;  %v183_v0 = vunpack.c.h.bf16 %v33_v56  ;;  %v247_v1 = vunpack.c.h.bf16 %v65_v57  ;;  %v182_v2 = vunpack.c.l.bf16 %v33_v56  ;;  %v246_v3 = vunpack.c.l.bf16 %v65_v57  ;;  %v59_v28 = vld [vmem:[%s1319_s1 + $0xf8] sm:$0xff] }
   0xd   :  { %551 = vmatprep.subr.mxu1 %v259_v29  ;;  %481 = vmatpush1.msra.mxu0 %v194_v30  ;;  %v181_v6 = vunpack.c.h.bf16 %v32_v62  ;;  %v245_v7 = vunpack.c.h.bf16 %v64_v63  ;;  %v180_v8 = vunpack.c.l.bf16 %v32_v62  ;;  %v244_v9 = vunpack.c.l.bf16 %v64_v63  ;;  %v91_v29 = vld [vmem:[%s1319_s1 + $0x1f8] sm:$0xff] }
   0xe   :  { %552 = vmatpush1.msra.mxu1 %v258_v31  ;;  %482 = vmatprep.subr.mxu0 %v193_v34  ;;  %v179_v12 = vunpack.c.h.bf16 %v31_v4  ;;  %v243_v13 = vunpack.c.h.bf16 %v63_v5  ;;  %v178_v14 = vunpack.c.l.bf16 %v31_v4  ;;  %v242_v15 = vunpack.c.l.bf16 %v63_v5  ;;  %v58_v34 = vld [vmem:[%s1319_s1 + $0xf0] sm:$0xff] }
   0xf   :  { %553 = vmatprep.subr.mxu1 %v257_v35  ;;  %483 = vmatpush1.msra.mxu0 %v192_v36  ;;  %v177_v18 = vunpack.c.h.bf16 %v30_v10  ;;  %v241_v19 = vunpack.c.h.bf16 %v62_v11  ;;  %v176_v20 = vunpack.c.l.bf16 %v30_v10  ;;  %v240_v21 = vunpack.c.l.bf16 %v62_v11  ;;  %v90_v35 = vld [vmem:[%s1319_s1 + $0x1f0] sm:$0xff] }
  0x10   :  { %554 = vmatpush1.msra.mxu1 %v256_v37  ;;  %484 = vmatprep.subr.mxu0 %v191_v40  ;;  %v175_v24 = vunpack.c.h.bf16 %v29_v16  ;;  %v239_v25 = vunpack.c.h.bf16 %v61_v17  ;;  %v174_v26 = vunpack.c.l.bf16 %v29_v16  ;;  %v238_v27 = vunpack.c.l.bf16 %v61_v17  ;;  %v57_v40 = vld [vmem:[%s1319_s1 + $0xe8] sm:$0xff] }
  0x11   :  { %555 = vmatprep.subr.mxu1 %v255_v41  ;;  %485 = vmatpush1.msra.mxu0 %v190_v42  ;;  %v173_v30 = vunpack.c.h.bf16 %v28_v22  ;;  %v237_v31 = vunpack.c.h.bf16 %v60_v23  ;;  %v172_v32 = vunpack.c.l.bf16 %v28_v22  ;;  %v236_v33 = vunpack.c.l.bf16 %v60_v23  ;;  %v89_v41 = vld [vmem:[%s1319_s1 + $0x1e8] sm:$0xff] }
  0x12   :  { %556 = vmatpush1.msra.mxu1 %v254_v43  ;;  %486 = vmatprep.subr.mxu0 %v189_v46  ;;  %v235_v36 = vunpack.c.h.bf16 %v59_v28  ;;  %v299_v37 = vunpack.c.h.bf16 %v91_v29  ;;  %v234_v38 = vunpack.c.l.bf16 %v59_v28  ;;  %v298_v39 = vunpack.c.l.bf16 %v91_v29  ;;  %v56_v46 = vld [vmem:[%s1319_s1 + $0xe0] sm:$0xff] }
  0x13   :  { %557 = vmatprep.subr.mxu1 %v253_v47  ;;  %487 = vmatpush1.msra.mxu0 %v188_v48  ;;  %v233_v42 = vunpack.c.h.bf16 %v58_v34  ;;  %v297_v43 = vunpack.c.h.bf16 %v90_v35  ;;  %v232_v44 = vunpack.c.l.bf16 %v58_v34  ;;  %v296_v45 = vunpack.c.l.bf16 %v90_v35  ;;  %v88_v47 = vld [vmem:[%s1319_s1 + $0x1e0] sm:$0xff] }
  0x14   :  { %558 = vmatpush1.msra.mxu1 %v252_v49  ;;  %488 = vmatprep.subr.mxu0 %v187_v52  ;;  %v231_v48 = vunpack.c.h.bf16 %v57_v40  ;;  %v295_v49 = vunpack.c.h.bf16 %v89_v41  ;;  %v230_v50 = vunpack.c.l.bf16 %v57_v40  ;;  %v294_v51 = vunpack.c.l.bf16 %v89_v41  ;;  %v55_v52 = vld [vmem:[%s1319_s1 + $0xd8] sm:$0xff] }
  0x15   :  { %559 = vmatprep.subr.mxu1 %v251_v53  ;;  %489 = vmatpush1.msra.mxu0 %v186_v54  ;;  %v87_v53 = vld [vmem:[%s1319_s1 + $0x1d8] sm:$0xff]  ;;  %v229_v54 = vunpack.c.h.bf16 %v56_v46  ;;  %v228_v56 = vunpack.c.l.bf16 %v56_v46  ;;  %v292_v57 = vunpack.c.l.bf16 %v88_v47  ;;  %v226_v62 = vunpack.c.l.bf16 %v55_v52 }
  0x16   :  { %560 = vmatpush1.msra.mxu1 %v250_v55  ;;  %490 = vmatprep.subr.mxu0 %v185_v58  ;;  %v293_v55 = vunpack.c.h.bf16 %v88_v47  ;;  %v54_v58 = vld [vmem:[%s1319_s1 + $0xd0] sm:$0xff]  ;;  %v290_v63 = vunpack.c.l.bf16 %v87_v53 }
  0x17   :  { %561 = vmatprep.subr.mxu1 %v249_v59  ;;  %491 = vmatpush1.msra.mxu0 %v184_v60  ;;  %v86_v59 = vld [vmem:[%s1319_s1 + $0x1d0] sm:$0xff]  ;;  %v227_v60 = vunpack.c.h.bf16 %v55_v52  ;;  %v224_v4 = vunpack.c.l.bf16 %v54_v58  ;;  %v14_v52 = vld [vmem:[%s1320_s0] sm:$0xff] }
  0x18   :  { %562 = vmatpush1.msra.mxu1 %v248_v61  ;;  %492 = vmatprep.subr.mxu0 %v183_v0  ;;  %v291_v61 = vunpack.c.h.bf16 %v87_v53  ;;  %v53_v0 = vld [vmem:[%s1319_s1 + $0xc8] sm:$0xff]  ;;  %v288_v5 = vunpack.c.l.bf16 %v86_v59 }
  0x19   :  { %563 = vmatprep.subr.mxu1 %v247_v1  ;;  %493 = vmatpush1.msra.mxu0 %v182_v2  ;;  %v85_v1 = vld [vmem:[%s1319_s1 + $0x1c8] sm:$0xff]  ;;  %v225_v2 = vunpack.c.h.bf16 %v54_v58  ;;  %v222_v10 = vunpack.c.l.bf16 %v53_v0  ;;  %v76_v58 = vld [vmem:[%s1319_s1 + $0x180] sm:$0xff] }
  0x1a   :  { %564 = vmatpush1.msra.mxu1 %v246_v3  ;;  %494 = vmatprep.subr.mxu0 %v181_v6  ;;  %v289_v3 = vunpack.c.h.bf16 %v86_v59  ;;  %v52_v6 = vld [vmem:[%s1319_s1 + $0xc0] sm:$0xff]  ;;  %v286_v11 = vunpack.c.l.bf16 %v85_v1 }
  0x1b   :  { %565 = vmatprep.subr.mxu1 %v245_v7  ;;  %495 = vmatpush1.msra.mxu0 %v180_v8  ;;  %v84_v7 = vld [vmem:[%s1319_s1 + $0x1c0] sm:$0xff]  ;;  %v223_v8 = vunpack.c.h.bf16 %v53_v0  ;;  %v220_v16 = vunpack.c.l.bf16 %v52_v6  ;;  %v15_v0 = vld [vmem:[%s1320_s0 + $0x8] sm:$0xff] }
  0x1c   :  { %566 = vmatpush1.msra.mxu1 %v244_v9  ;;  %496 = vmatprep.subr.mxu0 %v179_v12  ;;  %v287_v9 = vunpack.c.h.bf16 %v85_v1  ;;  %v51_v12 = vld [vmem:[%s1319_s1 + $0xb8] sm:$0xff]  ;;  %v284_v17 = vunpack.c.l.bf16 %v84_v7 }
  0x1d   :  { %567 = vmatprep.subr.mxu1 %v243_v13  ;;  %497 = vmatpush1.msra.mxu0 %v178_v14  ;;  %v83_v13 = vld [vmem:[%s1319_s1 + $0x1b8] sm:$0xff]  ;;  %v221_v14 = vunpack.c.h.bf16 %v52_v6  ;;  %v218_v22 = vunpack.c.l.bf16 %v51_v12 }
  0x1e   :  { %568 = vmatpush1.msra.mxu1 %v242_v15  ;;  %498 = vmatprep.subr.mxu0 %v177_v18  ;;  %v285_v15 = vunpack.c.h.bf16 %v84_v7  ;;  %v50_v18 = vld [vmem:[%s1319_s1 + $0xb0] sm:$0xff]  ;;  %v282_v23 = vunpack.c.l.bf16 %v83_v13  ;;  %v139_v6 = vld [vmem:[%s1319_s1 + $0x378] sm:$0xff]  ;;  %v268_v7 = vunpack.c.l.bf16 %v76_v58 }
  0x1f   :  { %569 = vmatprep.subr.mxu1 %v241_v19  ;;  %499 = vmatpush1.msra.mxu0 %v176_v20  ;;  %v82_v19 = vld [vmem:[%s1319_s1 + $0x1b0] sm:$0xff]  ;;  %v219_v20 = vunpack.c.h.bf16 %v51_v12  ;;  %v216_v28 = vunpack.c.l.bf16 %v50_v18 }
  0x20   :  { %570 = vmatpush1.msra.mxu1 %v240_v21  ;;  %500 = vmatprep.subr.mxu0 %v175_v24  ;;  %v283_v21 = vunpack.c.h.bf16 %v83_v13  ;;  %v49_v24 = vld [vmem:[%s1319_s1 + $0xa8] sm:$0xff]  ;;  %v280_v29 = vunpack.c.l.bf16 %v82_v19  ;;  %v138_v12 = vld [vmem:[%s1319_s1 + $0x370] sm:$0xff] }
  0x21   :  { %571 = vmatprep.subr.mxu1 %v239_v25  ;;  %501 = vmatpush1.msra.mxu0 %v174_v26  ;;  %v81_v25 = vld [vmem:[%s1319_s1 + $0x1a8] sm:$0xff]  ;;  %v217_v26 = vunpack.c.h.bf16 %v50_v18  ;;  %v214_v34 = vunpack.c.l.bf16 %v49_v24 }
  0x22   :  { %572 = vmatpush1.msra.mxu1 %v238_v27  ;;  %502 = vmatprep.subr.mxu0 %v173_v30  ;;  %v281_v27 = vunpack.c.h.bf16 %v82_v19  ;;  %v48_v30 = vld [vmem:[%s1319_s1 + $0xa0] sm:$0xff]  ;;  %v278_v35 = vunpack.c.l.bf16 %v81_v25  ;;  %v137_v18 = vld [vmem:[%s1319_s1 + $0x368] sm:$0xff] }
  0x23   :  { %573 = vmatprep.subr.mxu1 %v237_v31  ;;  %503 = vmatpush1.msra.mxu0 %v172_v32  ;;  %v80_v31 = vld [vmem:[%s1319_s1 + $0x1a0] sm:$0xff]  ;;  %v215_v32 = vunpack.c.h.bf16 %v49_v24  ;;  %v212_v40 = vunpack.c.l.bf16 %v48_v30 }
  0x24   :  { %574 = vmatpush1.msra.mxu1 %v236_v33  ;;  %504 = vmatprep.subr.mxu0 %v235_v36  ;;  %v279_v33 = vunpack.c.h.bf16 %v81_v25  ;;  %v47_v36 = vld [vmem:[%s1319_s1 + $0x98] sm:$0xff]  ;;  %v276_v41 = vunpack.c.l.bf16 %v80_v31  ;;  %v136_v24 = vld [vmem:[%s1319_s1 + $0x360] sm:$0xff] }
  0x25   :  { %575 = vmatprep.subr.mxu1 %v299_v37  ;;  %505 = vmatpush2.msra.mxu0 %v234_v38  ;;  %v79_v37 = vld [vmem:[%s1319_s1 + $0x198] sm:$0xff]  ;;  %v213_v38 = vunpack.c.h.bf16 %v48_v30  ;;  %v210_v46 = vunpack.c.l.bf16 %v47_v36 }
  0x26   :  { %576 = vmatpush2.msra.mxu1 %v298_v39  ;;  %506 = vmatprep.subr.mxu0 %v233_v42  ;;  %v277_v39 = vunpack.c.h.bf16 %v80_v31  ;;  %v46_v42 = vld [vmem:[%s1319_s1 + $0x90] sm:$0xff]  ;;  %v274_v47 = vunpack.c.l.bf16 %v79_v37  ;;  %v135_v30 = vld [vmem:[%s1319_s1 + $0x358] sm:$0xff] }
  0x27   :  { %577 = vmatprep.subr.mxu1 %v297_v43  ;;  %507 = vmatpush2.msra.mxu0 %v232_v44  ;;  %v78_v43 = vld [vmem:[%s1319_s1 + $0x190] sm:$0xff]  ;;  %v211_v44 = vunpack.c.h.bf16 %v47_v36  ;;  %v208_v53 = vunpack.c.l.bf16 %v46_v42 }
  0x28   :  { %578 = vmatpush2.msra.mxu1 %v296_v45  ;;  %508 = vmatprep.subr.mxu0 %v231_v48  ;;  %v275_v45 = vunpack.c.h.bf16 %v79_v37  ;;  %v45_v48 = vld [vmem:[%s1319_s1 + $0x88] sm:$0xff]  ;;  %v134_v36 = vld [vmem:[%s1319_s1 + $0x350] sm:$0xff] }
  0x29   :  { %579 = vmatprep.subr.mxu1 %v295_v49  ;;  %509 = vmatpush2.msra.mxu0 %v230_v50  ;;  %v77_v49 = vld [vmem:[%s1319_s1 + $0x188] sm:$0xff]  ;;  %v209_v50 = vunpack.c.h.bf16 %v46_v42  ;;  %v206_v59 = vunpack.c.l.bf16 %v45_v48 }
  0x2a   :  { %580 = vmatpush2.msra.mxu1 %v294_v51  ;;  %510 = vmatprep.subr.mxu0 %v229_v54  ;;  %v273_v51 = vunpack.c.h.bf16 %v78_v43  ;;  %v272_v54 = vunpack.c.l.bf16 %v78_v43  ;;  %v133_v42 = vld [vmem:[%s1319_s1 + $0x348] sm:$0xff] }
  0x2b   :  { %581 = vmatprep.subr.mxu1 %v293_v55  ;;  %511 = vmatpush2.msra.mxu0 %v228_v56  ;;  %v44_v55 = vld [vmem:[%s1319_s1 + $0x80] sm:$0xff]  ;;  %v207_v56 = vunpack.c.h.bf16 %v45_v48 }
  0x2c   :  { %582 = vmatpush2.msra.mxu1 %v292_v57  ;;  %512 = vmatprep.subr.mxu0 %v227_v60  ;;  %v271_v57 = vunpack.c.h.bf16 %v77_v49  ;;  %v20_v60 = vunpack.c.h.bf16 %v14_v52  ;;  %v204_v1 = vunpack.c.l.bf16 %v44_v55  ;;  %v132_v48 = vld [vmem:[%s1319_s1 + $0x340] sm:$0xff] }
  0x2d   :  { %583 = vmatprep.subr.mxu1 %v291_v61  ;;  %513 = vmatpush2.msra.mxu0 %v226_v62  ;;  %v107_v61 = vld [vmem:[%s1319_s1 + $0x278] sm:$0xff]  ;;  %v205_v62 = vunpack.c.h.bf16 %v44_v55 }
  0x2e   :  { %584 = vmatpush2.msra.mxu1 %v290_v63  ;;  %514 = vmatprep.subr.mxu0 %v225_v2  ;;  %v270_v63 = vunpack.c.l.bf16 %v77_v49  ;;  %v269_v2 = vunpack.c.h.bf16 %v76_v58  ;;  %v380_v58 = vunpack.c.l.bf16 %v132_v48 }
  0x2f   :  { %585 = vmatprep.subr.mxu1 %v289_v3  ;;  %515 = vmatpush2.msra.mxu0 %v224_v4  ;;  %v19_v3 = vunpack.c.l.bf16 %v14_v52  ;;  %v331_v4 = vunpack.c.h.bf16 %v107_v61  ;;  %v382_v52 = vunpack.c.l.bf16 %v133_v42 }
  0x30   :  { %586 = vmatpush2.msra.mxu1 %v288_v5  ;;  %516 = vmatprep.subr.mxu0 %v223_v8  ;;  %v106_v5 = vld [vmem:[%s1319_s1 + $0x270] sm:$0xff]  ;;  %v22_v8 = vunpack.c.h.bf16 %v15_v0 }
  0x31   :  { %587 = vmatprep.subr.mxu1 %v287_v9  ;;  %517 = vmatpush2.msra.mxu0 %v222_v10  ;;  %v330_v9 = vunpack.c.l.bf16 %v107_v61  ;;  %v21_v10 = vunpack.c.l.bf16 %v15_v0  ;;  %v329_v13 = vunpack.c.h.bf16 %v106_v5 }
  0x32   :  { %588 = vmatpush2.msra.mxu1 %v286_v11  ;;  %518 = vmatprep.subr.mxu0 %v221_v14  ;;  %v105_v11 = vld [vmem:[%s1319_s1 + $0x268] sm:$0xff]  ;;  %v395_v14 = vunpack.c.h.bf16 %v139_v6 }
  0x33   :  { %589 = vmatprep.subr.mxu1 %v285_v15  ;;  %519 = vmatpush2.msra.mxu0 %v220_v16  ;;  %v328_v15 = vunpack.c.l.bf16 %v106_v5  ;;  %v394_v16 = vunpack.c.l.bf16 %v139_v6  ;;  %v327_v19 = vunpack.c.h.bf16 %v105_v11 }
  0x34   :  { %590 = vmatpush2.msra.mxu1 %v284_v17  ;;  %520 = vmatprep.subr.mxu0 %v219_v20  ;;  %v104_v17 = vld [vmem:[%s1319_s1 + $0x260] sm:$0xff]  ;;  %v393_v20 = vunpack.c.h.bf16 %v138_v12 }
  0x35   :  { %591 = vmatprep.subr.mxu1 %v283_v21  ;;  %521 = vmatpush2.msra.mxu0 %v218_v22  ;;  %v326_v21 = vunpack.c.l.bf16 %v105_v11  ;;  %v392_v22 = vunpack.c.l.bf16 %v138_v12  ;;  %v325_v25 = vunpack.c.h.bf16 %v104_v17 }
  0x36   :  { %592 = vmatpush2.msra.mxu1 %v282_v23  ;;  %522 = vmatprep.subr.mxu0 %v217_v26  ;;  %v103_v23 = vld [vmem:[%s1319_s1 + $0x258] sm:$0xff]  ;;  %v391_v26 = vunpack.c.h.bf16 %v137_v18 }
  0x37   :  { %593 = vmatprep.subr.mxu1 %v281_v27  ;;  %523 = vmatpush2.msra.mxu0 %v216_v28  ;;  %v324_v27 = vunpack.c.l.bf16 %v104_v17  ;;  %v390_v28 = vunpack.c.l.bf16 %v137_v18  ;;  %v323_v31 = vunpack.c.h.bf16 %v103_v23 }
  0x38   :  { %594 = vmatpush2.msra.mxu1 %v280_v29  ;;  %524 = vmatprep.subr.mxu0 %v215_v32  ;;  %v102_v29 = vld [vmem:[%s1319_s1 + $0x250] sm:$0xff]  ;;  %v389_v32 = vunpack.c.h.bf16 %v136_v24 }
  0x39   :  { %595 = vmatprep.subr.mxu1 %v279_v33  ;;  %525 = vmatpush2.msra.mxu0 %v214_v34  ;;  %v322_v33 = vunpack.c.l.bf16 %v103_v23  ;;  %v388_v34 = vunpack.c.l.bf16 %v136_v24  ;;  %v321_v37 = vunpack.c.h.bf16 %v102_v29 }
  0x3a   :  { %596 = vmatpush2.msra.mxu1 %v278_v35  ;;  %526 = vmatprep.subr.mxu0 %v213_v38  ;;  %v101_v35 = vld [vmem:[%s1319_s1 + $0x248] sm:$0xff]  ;;  %v387_v38 = vunpack.c.h.bf16 %v135_v30 }
  0x3b   :  { %597 = vmatprep.subr.mxu1 %v277_v39  ;;  %527 = vmatpush2.msra.mxu0 %v212_v40  ;;  %v320_v39 = vunpack.c.l.bf16 %v102_v29  ;;  %v386_v40 = vunpack.c.l.bf16 %v135_v30  ;;  %v319_v43 = vunpack.c.h.bf16 %v101_v35 }
  0x3c   :  { %598 = vmatpush2.msra.mxu1 %v276_v41  ;;  %528 = vmatprep.subr.mxu0 %v211_v44  ;;  %v100_v41 = vld [vmem:[%s1319_s1 + $0x240] sm:$0xff]  ;;  %v385_v44 = vunpack.c.h.bf16 %v134_v36 }
  0x3d   :  { %599 = vmatprep.subr.mxu1 %v275_v45  ;;  %529 = vmatpush2.msra.mxu0 %v210_v46  ;;  %v318_v45 = vunpack.c.l.bf16 %v101_v35  ;;  %v384_v46 = vunpack.c.l.bf16 %v134_v36  ;;  %v317_v49 = vunpack.c.h.bf16 %v100_v41 }
  0x3e   :  { %600 = vmatpush2.msra.mxu1 %v274_v47  ;;  %530 = vmatprep.subr.mxu0 %v209_v50  ;;  %v99_v47 = vld [vmem:[%s1319_s1 + $0x238] sm:$0xff]  ;;  %v383_v50 = vunpack.c.h.bf16 %v133_v42 }
  0x3f   :  { %601 = vmatprep.subr.mxu1 %v273_v51  ;;  %531 = vmatpush2.msra.mxu0 %v208_v53  ;;  %v316_v51 = vunpack.c.l.bf16 %v100_v41  ;;  %v98_v53 = vld [vmem:[%s1319_s1 + $0x230] sm:$0xff]  ;;  %v315_v55 = vunpack.c.h.bf16 %v99_v47 }
  0x40   :  { %602 = vmatpush2.msra.mxu1 %v272_v54  ;;  %532 = vmatprep.subr.mxu0 %v207_v56  ;;  %v131_v54 = vld [vmem:[%s1319_s1 + $0x338] sm:$0xff]  ;;  %v381_v56 = vunpack.c.h.bf16 %v132_v48  ;;  %v313_v61 = vunpack.c.h.bf16 %v98_v53 }
  0x41   :  { %603 = vmatprep.subr.mxu1 %v271_v57  ;;  %533 = vmatpush2.msra.mxu0 %v206_v59  ;;  %v314_v57 = vunpack.c.l.bf16 %v99_v47  ;;  %v97_v59 = vld [vmem:[%s1319_s1 + $0x228] sm:$0xff]  ;;  %v378_v0 = vunpack.c.l.bf16 %v131_v54 }
  0x42   :  { %536 = vmatprep.mubr.f32.mxu0 %v20_v60  ;;  %534 = vmatprep.subr.mxu0 %v205_v62  ;;  %v130_v60 = vld [vmem:[%s1319_s1 + $0x330] sm:$0xff]  ;;  %v379_v62 = vunpack.c.h.bf16 %v131_v54  ;;  %v310_v5 = vunpack.c.l.bf16 %v97_v59 }
  0x43   :  { %604 = vmatpush2.msra.mxu1 %v270_v63  ;;  %535 = vmatpush2.msra.mxu0 %v204_v1  ;;  %v312_v63 = vunpack.c.l.bf16 %v98_v53  ;;  %v96_v1 = vld [vmem:[%s1319_s1 + $0x220] sm:$0xff]  ;;  %v376_v6 = vunpack.c.l.bf16 %v130_v60 }
  0x44   :  { %605 = vmatprep.subr.mxu1 %v269_v2  ;;  %537 = vmatmul.mubr.f32.vlgmr.msra.gmra.mxu0 %v19_v3  ;;  %v129_v2 = vld [vmem:[%s1319_s1 + $0x328] sm:$0xff]  ;;  %v311_v3 = vunpack.c.h.bf16 %v97_v59  ;;  %v308_v11 = vunpack.c.l.bf16 %v96_v1 }
  0x45   :  { %614 = vmatprep.subr.mxu0 %v331_v4  ;;  %606 = vmatpush2.msra.mxu1 %v268_v7  ;;  %v377_v4 = vunpack.c.h.bf16 %v130_v60  ;;  %v95_v7 = vld [vmem:[%s1319_s1 + $0x218] sm:$0xff]  ;;  %v374_v12 = vunpack.c.l.bf16 %v129_v2 }
  0x46   :  { %607 = vmatprep.mubr.f32.mxu1 %v22_v8  ;;  %615 = vmatpush1.msra.mxu0 %v330_v9  ;;  %v128_v8 = vld [vmem:[%s1319_s1 + $0x320] sm:$0xff]  ;;  %v309_v9 = vunpack.c.h.bf16 %v96_v1  ;;  %v306_v17 = vunpack.c.l.bf16 %v95_v7 }
  0x47   :  { %608 = vmatmul.mubr.f32.vlgmr.msra.gmra.mxu1 %v21_v10  ;;  %616 = vmatprep.subr.mxu0 %v329_v13  ;;  %v375_v10 = vunpack.c.h.bf16 %v129_v2  ;;  %v94_v13 = vld [vmem:[%s1319_s1 + $0x210] sm:$0xff]  ;;  %v372_v18 = vunpack.c.l.bf16 %v128_v8 }
  0x48   :  { %685 = vmatprep.subr.mxu1 %v395_v14  ;;  %617 = vmatpush1.msra.mxu0 %v328_v15  ;;  %v127_v14 = vld [vmem:[%s1319_s1 + $0x318] sm:$0xff]  ;;  %v307_v15 = vunpack.c.h.bf16 %v95_v7  ;;  %v304_v23 = vunpack.c.l.bf16 %v94_v13 }
  0x49   :  { %686 = vmatpush1.msra.mxu1 %v394_v16  ;;  %618 = vmatprep.subr.mxu0 %v327_v19  ;;  %v373_v16 = vunpack.c.h.bf16 %v128_v8  ;;  %v93_v19 = vld [vmem:[%s1319_s1 + $0x208] sm:$0xff]  ;;  %v370_v24 = vunpack.c.l.bf16 %v127_v14 }
  0x4a   :  { %687 = vmatprep.subr.mxu1 %v393_v20  ;;  %619 = vmatpush1.msra.mxu0 %v326_v21  ;;  %v126_v20 = vld [vmem:[%s1319_s1 + $0x310] sm:$0xff]  ;;  %v305_v21 = vunpack.c.h.bf16 %v94_v13  ;;  %v302_v29 = vunpack.c.l.bf16 %v93_v19 }
  0x4b   :  { %688 = vmatpush1.msra.mxu1 %v392_v22  ;;  %620 = vmatprep.subr.mxu0 %v325_v25  ;;  %v371_v22 = vunpack.c.h.bf16 %v127_v14  ;;  %v92_v25 = vld [vmem:[%s1319_s1 + $0x200] sm:$0xff]  ;;  %v368_v30 = vunpack.c.l.bf16 %v126_v20 }
  0x4c   :  { %689 = vmatprep.subr.mxu1 %v391_v26  ;;  %621 = vmatpush1.msra.mxu0 %v324_v27  ;;  %v125_v26 = vld [vmem:[%s1319_s1 + $0x308] sm:$0xff]  ;;  %v303_v27 = vunpack.c.h.bf16 %v93_v19  ;;  %v300_v35 = vunpack.c.l.bf16 %v92_v25 }
  0x4d   :  { %690 = vmatpush1.msra.mxu1 %v390_v28  ;;  %622 = vmatprep.subr.mxu0 %v323_v31  ;;  %v369_v28 = vunpack.c.h.bf16 %v126_v20  ;;  %v123_v31 = vld [vmem:[%s1319_s1 + $0x2f8] sm:$0xff]  ;;  %v366_v36 = vunpack.c.l.bf16 %v125_v26 }
  0x4e   :  { %691 = vmatprep.subr.mxu1 %v389_v32  ;;  %623 = vmatpush1.msra.mxu0 %v322_v33  ;;  %v124_v32 = vld [vmem:[%s1319_s1 + $0x300] sm:$0xff]  ;;  %v301_v33 = vunpack.c.h.bf16 %v92_v25  ;;  %v362_v41 = vunpack.c.l.bf16 %v123_v31 }
  0x4f   :  { %692 = vmatpush1.msra.mxu1 %v388_v34  ;;  %624 = vmatprep.subr.mxu0 %v321_v37  ;;  %v367_v34 = vunpack.c.h.bf16 %v125_v26  ;;  %v122_v37 = vld [vmem:[%s1319_s1 + $0x2f0] sm:$0xff]  ;;  %v364_v42 = vunpack.c.l.bf16 %v124_v32 }
  0x50   :  { %693 = vmatprep.subr.mxu1 %v387_v38  ;;  %625 = vmatpush1.msra.mxu0 %v320_v39  ;;  %v155_v38 = vld [vmem:[%s1319_s1 + $0x3f8] sm:$0xff]  ;;  %v363_v39 = vunpack.c.h.bf16 %v123_v31  ;;  %v360_v47 = vunpack.c.l.bf16 %v122_v37 }
  0x51   :  { %694 = vmatpush1.msra.mxu1 %v386_v40  ;;  %626 = vmatprep.subr.mxu0 %v319_v43  ;;  %v365_v40 = vunpack.c.h.bf16 %v124_v32  ;;  %v121_v43 = vld [vmem:[%s1319_s1 + $0x2e8] sm:$0xff]  ;;  %v426_v48 = vunpack.c.l.bf16 %v155_v38 }
  0x52   :  { %695 = vmatprep.subr.mxu1 %v385_v44  ;;  %627 = vmatpush1.msra.mxu0 %v318_v45  ;;  %v154_v44 = vld [vmem:[%s1319_s1 + $0x3f0] sm:$0xff]  ;;  %v361_v45 = vunpack.c.h.bf16 %v122_v37  ;;  %v358_v53 = vunpack.c.l.bf16 %v121_v43 }
  0x53   :  { %696 = vmatpush1.msra.mxu1 %v384_v46  ;;  %628 = vmatprep.subr.mxu0 %v317_v49  ;;  %v427_v46 = vunpack.c.h.bf16 %v155_v38  ;;  %v120_v49 = vld [vmem:[%s1319_s1 + $0x2e0] sm:$0xff]  ;;  %v424_v54 = vunpack.c.l.bf16 %v154_v44 }
  0x54   :  { %697 = vmatprep.subr.mxu1 %v383_v50  ;;  %629 = vmatpush1.msra.mxu0 %v316_v51  ;;  %v153_v50 = vld [vmem:[%s1319_s1 + $0x3e8] sm:$0xff]  ;;  %v359_v51 = vunpack.c.h.bf16 %v121_v43  ;;  %v356_v59 = vunpack.c.l.bf16 %v120_v49 }
  0x55   :  { %698 = vmatpush1.msra.mxu1 %v382_v52  ;;  %630 = vmatprep.subr.mxu0 %v315_v55  ;;  %v425_v52 = vunpack.c.h.bf16 %v154_v44  ;;  %v119_v55 = vld [vmem:[%s1319_s1 + $0x2d8] sm:$0xff]  ;;  %v422_v60 = vunpack.c.l.bf16 %v153_v50 }
  0x56   :  { %699 = vmatprep.subr.mxu1 %v381_v56  ;;  %631 = vmatpush1.msra.mxu0 %v314_v57  ;;  %v152_v56 = vld [vmem:[%s1319_s1 + $0x3e0] sm:$0xff]  ;;  %v357_v57 = vunpack.c.h.bf16 %v120_v49  ;;  %v354_v1 = vunpack.c.l.bf16 %v119_v55 }
  0x57   :  { %700 = vmatpush1.msra.mxu1 %v380_v58  ;;  %632 = vmatprep.subr.mxu0 %v313_v61  ;;  %v423_v58 = vunpack.c.h.bf16 %v153_v50  ;;  %v118_v61 = vld [vmem:[%s1319_s1 + $0x2d0] sm:$0xff]  ;;  %v420_v2 = vunpack.c.l.bf16 %v152_v56 }
  0x58   :  { %701 = vmatprep.subr.mxu1 %v379_v62  ;;  %633 = vmatpush1.msra.mxu0 %v312_v63  ;;  %v151_v62 = vld [vmem:[%s1319_s1 + $0x3d8] sm:$0xff]  ;;  %v355_v63 = vunpack.c.h.bf16 %v119_v55  ;;  %v352_v7 = vunpack.c.l.bf16 %v118_v61 }
  0x59   :  { %702 = vmatpush1.msra.mxu1 %v378_v0  ;;  %634 = vmatprep.subr.mxu0 %v311_v3  ;;  %v421_v0 = vunpack.c.h.bf16 %v152_v56  ;;  %v117_v3 = vld [vmem:[%s1319_s1 + $0x2c8] sm:$0xff]  ;;  %v418_v8 = vunpack.c.l.bf16 %v151_v62 }
  0x5a   :  { %703 = vmatprep.subr.mxu1 %v377_v4  ;;  %635 = vmatpush1.msra.mxu0 %v310_v5  ;;  %v150_v4 = vld [vmem:[%s1319_s1 + $0x3d0] sm:$0xff]  ;;  %v353_v5 = vunpack.c.h.bf16 %v118_v61  ;;  %v350_v13 = vunpack.c.l.bf16 %v117_v3 }
  0x5b   :  { %704 = vmatpush1.msra.mxu1 %v376_v6  ;;  %636 = vmatprep.subr.mxu0 %v309_v9  ;;  %v419_v6 = vunpack.c.h.bf16 %v151_v62  ;;  %v116_v9 = vld [vmem:[%s1319_s1 + $0x2c0] sm:$0xff]  ;;  %v416_v14 = vunpack.c.l.bf16 %v150_v4  ;;  %v16_v61 = vld [vmem:[%s1320_s0 + $0x10] sm:$0xff] }
  0x5c   :  { %705 = vmatprep.subr.mxu1 %v375_v10  ;;  %637 = vmatpush1.msra.mxu0 %v308_v11  ;;  %v149_v10 = vld [vmem:[%s1319_s1 + $0x3c8] sm:$0xff]  ;;  %v351_v11 = vunpack.c.h.bf16 %v117_v3  ;;  %v348_v19 = vunpack.c.l.bf16 %v116_v9  ;;  %v171_v3 = vld [vmem:[%s1319_s1 + $0x478] sm:$0xff] }
  0x5d   :  { %706 = vmatpush1.msra.mxu1 %v374_v12  ;;  %638 = vmatprep.subr.mxu0 %v307_v15  ;;  %v417_v12 = vunpack.c.h.bf16 %v150_v4  ;;  %v115_v15 = vld [vmem:[%s1319_s1 + $0x2b8] sm:$0xff]  ;;  %v414_v20 = vunpack.c.l.bf16 %v149_v10 }
  0x5e   :  { %707 = vmatprep.subr.mxu1 %v373_v16  ;;  %639 = vmatpush1.msra.mxu0 %v306_v17  ;;  %v148_v16 = vld [vmem:[%s1319_s1 + $0x3c0] sm:$0xff]  ;;  %v349_v17 = vunpack.c.h.bf16 %v116_v9  ;;  %v346_v25 = vunpack.c.l.bf16 %v115_v15 }
  0x5f   :  { %708 = vmatpush1.msra.mxu1 %v372_v18  ;;  %640 = vmatprep.subr.mxu0 %v305_v21  ;;  %v415_v18 = vunpack.c.h.bf16 %v149_v10  ;;  %v114_v21 = vld [vmem:[%s1319_s1 + $0x2b0] sm:$0xff]  ;;  %v412_v26 = vunpack.c.l.bf16 %v148_v16  ;;  %v459_v10 = vunpack.c.h.bf16 %v171_v3 }
  0x60   :  { %709 = vmatprep.subr.mxu1 %v371_v22  ;;  %641 = vmatpush1.msra.mxu0 %v304_v23  ;;  %v147_v22 = vld [vmem:[%s1319_s1 + $0x3b8] sm:$0xff]  ;;  %v347_v23 = vunpack.c.h.bf16 %v115_v15  ;;  %v344_v31 = vunpack.c.l.bf16 %v114_v21 }
  0x61   :  { %710 = vmatpush1.msra.mxu1 %v370_v24  ;;  %642 = vmatprep.subr.mxu0 %v303_v27  ;;  %v413_v24 = vunpack.c.h.bf16 %v148_v16  ;;  %v113_v27 = vld [vmem:[%s1319_s1 + $0x2a8] sm:$0xff]  ;;  %v410_v32 = vunpack.c.l.bf16 %v147_v22 }
  0x62   :  { %711 = vmatprep.subr.mxu1 %v369_v28  ;;  %643 = vmatpush1.msra.mxu0 %v302_v29  ;;  %v146_v28 = vld [vmem:[%s1319_s1 + $0x3b0] sm:$0xff]  ;;  %v345_v29 = vunpack.c.h.bf16 %v114_v21  ;;  %v342_v37 = vunpack.c.l.bf16 %v113_v27  ;;  %v169_v16 = vld [vmem:[%s1319_s1 + $0x468] sm:$0xff] }
  0x63   :  { %712 = vmatpush1.msra.mxu1 %v368_v30  ;;  %644 = vmatprep.subr.mxu0 %v301_v33  ;;  %v411_v30 = vunpack.c.h.bf16 %v147_v22  ;;  %v112_v33 = vld [vmem:[%s1319_s1 + $0x2a0] sm:$0xff]  ;;  %v408_v38 = vunpack.c.l.bf16 %v146_v28  ;;  %v454_v21 = vunpack.c.l.bf16 %v169_v16  ;;  %v167_v22 = vld [vmem:[%s1319_s1 + $0x458] sm:$0xff] }
  0x64   :  { %713 = vmatprep.subr.mxu1 %v367_v34  ;;  %645 = vmatpush1.msra.mxu0 %v300_v35  ;;  %v145_v34 = vld [vmem:[%s1319_s1 + $0x3a8] sm:$0xff]  ;;  %v343_v35 = vunpack.c.h.bf16 %v113_v27  ;;  %v340_v43 = vunpack.c.l.bf16 %v112_v33  ;;  %v451_v27 = vunpack.c.h.bf16 %v167_v22 }
  0x65   :  { %714 = vmatpush1.msra.mxu1 %v366_v36  ;;  %646 = vmatprep.subr.mxu0 %v363_v39  ;;  %v409_v36 = vunpack.c.h.bf16 %v146_v28  ;;  %v111_v39 = vld [vmem:[%s1319_s1 + $0x298] sm:$0xff]  ;;  %v406_v44 = vunpack.c.l.bf16 %v145_v34  ;;  %v450_v28 = vunpack.c.l.bf16 %v167_v22 }
  0x66   :  { %715 = vmatprep.subr.mxu1 %v365_v40  ;;  %647 = vmatpush2.msra.mxu0 %v362_v41  ;;  %v144_v40 = vld [vmem:[%s1319_s1 + $0x3a0] sm:$0xff]  ;;  %v341_v41 = vunpack.c.h.bf16 %v112_v33  ;;  %v338_v49 = vunpack.c.l.bf16 %v111_v39 }
  0x67   :  { %716 = vmatpush1.msra.mxu1 %v364_v42  ;;  %648 = vmatprep.subr.mxu0 %v361_v45  ;;  %v407_v42 = vunpack.c.h.bf16 %v145_v34  ;;  %v110_v45 = vld [vmem:[%s1319_s1 + $0x290] sm:$0xff]  ;;  %v404_v50 = vunpack.c.l.bf16 %v144_v40 }
  0x68   :  { %717 = vmatprep.subr.mxu1 %v427_v46  ;;  %649 = vmatpush2.msra.mxu0 %v360_v47  ;;  %v143_v46 = vld [vmem:[%s1319_s1 + $0x398] sm:$0xff]  ;;  %v339_v47 = vunpack.c.h.bf16 %v111_v39  ;;  %v336_v55 = vunpack.c.l.bf16 %v110_v45 }
  0x69   :  { %718 = vmatpush2.msra.mxu1 %v426_v48  ;;  %650 = vmatprep.subr.mxu0 %v359_v51  ;;  %v405_v48 = vunpack.c.h.bf16 %v144_v40  ;;  %v109_v51 = vld [vmem:[%s1319_s1 + $0x288] sm:$0xff]  ;;  %v402_v56 = vunpack.c.l.bf16 %v143_v46 }
  0x6a   :  { %719 = vmatprep.subr.mxu1 %v425_v52  ;;  %651 = vmatpush2.msra.mxu0 %v358_v53  ;;  %v142_v52 = vld [vmem:[%s1319_s1 + $0x390] sm:$0xff]  ;;  %v337_v53 = vunpack.c.h.bf16 %v110_v45  ;;  %v334_v62 = vunpack.c.l.bf16 %v109_v51 }
  0x6b   :  { %720 = vmatpush2.msra.mxu1 %v424_v54  ;;  %652 = vmatprep.subr.mxu0 %v357_v57  ;;  %v403_v54 = vunpack.c.h.bf16 %v143_v46  ;;  %v108_v57 = vld [vmem:[%s1319_s1 + $0x280] sm:$0xff] }
  0x6c   :  { %721 = vmatprep.subr.mxu1 %v423_v58  ;;  %653 = vmatpush2.msra.mxu0 %v356_v59  ;;  %v141_v58 = vld [vmem:[%s1319_s1 + $0x388] sm:$0xff]  ;;  %v335_v59 = vunpack.c.h.bf16 %v109_v51  ;;  %v332_v4 = vunpack.c.l.bf16 %v108_v57 }
  0x6d   :  { %722 = vmatpush2.msra.mxu1 %v422_v60  ;;  %654 = vmatprep.subr.mxu0 %v355_v63  ;;  %v401_v60 = vunpack.c.h.bf16 %v142_v52  ;;  %v400_v63 = vunpack.c.l.bf16 %v142_v52 }
  0x6e   :  { %723 = vmatprep.subr.mxu1 %v421_v0  ;;  %655 = vmatpush2.msra.mxu0 %v354_v1  ;;  %v333_v0 = vunpack.c.h.bf16 %v108_v57  ;;  %v399_v1 = vunpack.c.h.bf16 %v141_v58 }
  0x6f   :  { %724 = vmatpush2.msra.mxu1 %v420_v2  ;;  %656 = vmatprep.subr.mxu0 %v353_v5  ;;  %v140_v2 = vld [vmem:[%s1319_s1 + $0x380] sm:$0xff]  ;;  %v24_v5 = vunpack.c.h.bf16 %v16_v61 }
  0x70   :  { %725 = vmatprep.subr.mxu1 %v419_v6  ;;  %657 = vmatpush2.msra.mxu0 %v352_v7  ;;  %v17_v6 = vld [vmem:[%s1320_s0 + $0x18] sm:$0xff]  ;;  %v398_v7 = vunpack.c.l.bf16 %v141_v58  ;;  %v397_v9 = vunpack.c.h.bf16 %v140_v2 }
  0x71   :  { %726 = vmatpush2.msra.mxu1 %v418_v8  ;;  %658 = vmatprep.subr.mxu0 %v351_v11  ;;  %v23_v8 = vunpack.c.l.bf16 %v16_v61  ;;  %v170_v11 = vld [vmem:[%s1319_s1 + $0x470] sm:$0xff]  ;;  %v25_v15 = vunpack.c.l.bf16 %v17_v6 }
  0x72   :  { %727 = vmatprep.subr.mxu1 %v417_v12  ;;  %659 = vmatpush2.msra.mxu0 %v350_v13  ;;  %v396_v12 = vunpack.c.l.bf16 %v140_v2  ;;  %v26_v13 = vunpack.c.h.bf16 %v17_v6  ;;  %v460_v2 = vld [vmem:[%s1321_s2] sm:$0x3] }
  0x73   :  { %728 = vmatpush2.msra.mxu1 %v416_v14  ;;  %660 = vmatprep.subr.mxu0 %v349_v17  ;;  %v458_v14 = vunpack.c.l.bf16 %v171_v3  ;;  %v457_v17 = vunpack.c.h.bf16 %v170_v11 }
  0x74   :  { %729 = vmatprep.subr.mxu1 %v415_v18  ;;  %661 = vmatpush2.msra.mxu0 %v348_v19  ;;  %v456_v18 = vunpack.c.l.bf16 %v170_v11  ;;  %v168_v19 = vld [vmem:[%s1319_s1 + $0x460] sm:$0xff] }
  0x75   :  { %730 = vmatpush2.msra.mxu1 %v414_v20  ;;  %662 = vmatprep.subr.mxu0 %v347_v23  ;;  %v455_v20 = vunpack.c.h.bf16 %v169_v16  ;;  %v453_v23 = vunpack.c.h.bf16 %v168_v19 }
  0x76   :  { %731 = vmatprep.subr.mxu1 %v413_v24  ;;  %663 = vmatpush2.msra.mxu0 %v346_v25  ;;  %v845_v24 = vmov 0.0   ;;  %v452_v25 = vunpack.c.l.bf16 %v168_v19 }
  0x77   :  { %732 = vmatpush2.msra.mxu1 %v412_v26  ;;  %664 = vmatprep.subr.mxu0 %v345_v29  ;;  %v166_v26 = vld [vmem:[%s1319_s1 + $0x450] sm:$0xff]  ;;  %v165_v29 = vld [vmem:[%s1319_s1 + $0x448] sm:$0xff] }
  0x78   :  { %733 = vmatprep.subr.mxu1 %v411_v30  ;;  %665 = vmatpush2.msra.mxu0 %v344_v31  ;;  %v449_v30 = vunpack.c.h.bf16 %v166_v26  ;;  %v448_v31 = vunpack.c.l.bf16 %v166_v26  ;;  %v447_v33 = vunpack.c.h.bf16 %v165_v29  ;;  %v446_v34 = vunpack.c.l.bf16 %v165_v29 }
  0x79   :  { %734 = vmatpush2.msra.mxu1 %v410_v32  ;;  %666 = vmatprep.subr.mxu0 %v343_v35  ;;  %v164_v32 = vld [vmem:[%s1319_s1 + $0x440] sm:$0xff]  ;;  %v163_v35 = vld [vmem:[%s1319_s1 + $0x438] sm:$0xff] }
  0x7a   :  { %735 = vmatprep.subr.mxu1 %v409_v36  ;;  %667 = vmatpush2.msra.mxu0 %v342_v37  ;;  %v445_v36 = vunpack.c.h.bf16 %v164_v32  ;;  %v444_v37 = vunpack.c.l.bf16 %v164_v32  ;;  %v443_v39 = vunpack.c.h.bf16 %v163_v35  ;;  %v442_v40 = vunpack.c.l.bf16 %v163_v35 }
  0x7b   :  { %736 = vmatpush2.msra.mxu1 %v408_v38  ;;  %668 = vmatprep.subr.mxu0 %v341_v41  ;;  %v162_v38 = vld [vmem:[%s1319_s1 + $0x430] sm:$0xff]  ;;  %v161_v41 = vld [vmem:[%s1319_s1 + $0x428] sm:$0xff] }
  0x7c   :  { %737 = vmatprep.subr.mxu1 %v407_v42  ;;  %669 = vmatpush2.msra.mxu0 %v340_v43  ;;  %v441_v42 = vunpack.c.h.bf16 %v162_v38  ;;  %v440_v43 = vunpack.c.l.bf16 %v162_v38  ;;  %v439_v45 = vunpack.c.h.bf16 %v161_v41  ;;  %v438_v46 = vunpack.c.l.bf16 %v161_v41 }
  0x7d   :  { %738 = vmatpush2.msra.mxu1 %v406_v44  ;;  %670 = vmatprep.subr.mxu0 %v339_v47  ;;  %v160_v44 = vld [vmem:[%s1319_s1 + $0x420] sm:$0xff]  ;;  %v159_v47 = vld [vmem:[%s1319_s1 + $0x418] sm:$0xff] }
  0x7e   :  { %739 = vmatprep.subr.mxu1 %v405_v48  ;;  %671 = vmatpush2.msra.mxu0 %v338_v49  ;;  %v437_v48 = vunpack.c.h.bf16 %v160_v44  ;;  %v436_v49 = vunpack.c.l.bf16 %v160_v44  ;;  %v435_v51 = vunpack.c.h.bf16 %v159_v47  ;;  %v434_v52 = vunpack.c.l.bf16 %v159_v47 }
  0x7f   :  { %740 = vmatpush2.msra.mxu1 %v404_v50  ;;  %672 = vmatprep.subr.mxu0 %v337_v53  ;;  %v158_v50 = vld [vmem:[%s1319_s1 + $0x410] sm:$0xff]  ;;  %v157_v53 = vld [vmem:[%s1319_s1 + $0x408] sm:$0xff] }
  0x80   :  { %741 = vmatprep.subr.mxu1 %v403_v54  ;;  %673 = vmatpush2.msra.mxu0 %v336_v55  ;;  %v433_v54 = vunpack.c.h.bf16 %v158_v50  ;;  %v432_v55 = vunpack.c.l.bf16 %v158_v50  ;;  %v431_v57 = vunpack.c.h.bf16 %v157_v53  ;;  %v430_v58 = vunpack.c.l.bf16 %v157_v53 }
  0x81   :  { %742 = vmatpush2.msra.mxu1 %v402_v56  ;;  %674 = vmatprep.subr.mxu0 %v335_v59  ;;  %v156_v56 = vld [vmem:[%s1319_s1 + $0x400] sm:$0xff] }
  0x82   :  { %743 = vmatprep.subr.mxu1 %v401_v60  ;;  %675 = vmatpush2.msra.mxu0 %v334_v62  ;;  %v18_v59 = vld [vmem:[%s1320_s0 + $0x20] sm:$0xf]  ;;  %v429_v60 = vunpack.c.h.bf16 %v156_v56  ;;  %v428_v61 = vunpack.c.l.bf16 %v156_v56 }
  0x83   :  { %744 = vmatpush2.msra.mxu1 %v400_v63  ;;  %676 = vmatprep.subr.mxu0 %v333_v0  ;;  %v27_v62 = vunpack.c.l.bf16 %v18_v59  ;;  %v462_v63 = vlaneseq }
  0x84   :  { %745 = vmatprep.subr.mxu1 %v399_v1  ;;  %677 = vmatpush2.msra.mxu0 %v332_v4 }
  0x85   :  { %678 = vmatprep.mubr.f32.mxu0 %v24_v5  ;;  %746 = vmatpush2.msra.mxu1 %v398_v7  ;;  %v463_v0 = vshrl.u32 %v462_v63, 7 }
  0x86   :  { %679 = vmatmul.mubr.f32.vlgmr.msra.gmra.mxu0 %v23_v8  ;;  %747 = vmatprep.subr.mxu1 %v397_v9 }
  0x87   :  { %756 = vmatprep.subr.mxu0 %v459_v10  ;;  %748 = vmatpush2.msra.mxu1 %v396_v12  ;;  %v464_v1 = vsub.s32 0, %v463_v0  ;;  %v468_v3 = vsub.s32 1, %v463_v0 }
  0x88   :  { %749 = vmatprep.mubr.f32.mxu1 %v26_v13  ;;  %757 = vmatpush1.msra.mxu0 %v458_v14 }
  0x89   :  { %750 = vmatmul.mubr.f32.vlgmr.msra.gmra.mxu1 %v25_v15  ;;  %758 = vmatprep.subr.mxu0 %v457_v17  ;;  %v465_v5 = vrot.slane %v460_v2, %v464_v1  ;;  %v469_v6 = vrot.slane %v460_v2, %v468_v3 }
  0x8a   :  { %820 = vmatprep.mubr.f32.mxu0 %v845_v24  ;;  %759 = vmatpush1.msra.mxu0 %v456_v18 }
  0x8b   :  { %760 = vmatprep.subr.mxu0 %v455_v20 }
  0x8c   :  { %761 = vmatpush1.msra.mxu0 %v454_v21 }
  0x8d   :  { %762 = vmatprep.subr.mxu0 %v453_v23 }
  0x8e   :  { %763 = vmatpush1.msra.mxu0 %v452_v25 }
  0x8f   :  { %764 = vmatprep.subr.mxu0 %v451_v27 }
  0x90   :  { %765 = vmatpush1.msra.mxu0 %v450_v28 }
  0x91   :  { %766 = vmatprep.subr.mxu0 %v449_v30 }
  0x92   :  { %767 = vmatpush1.msra.mxu0 %v448_v31 }
  0x93   :  { %768 = vmatprep.subr.mxu0 %v447_v33 }
  0x94   :  { %769 = vmatpush1.msra.mxu0 %v446_v34 }
  0x95   :  { %770 = vmatprep.subr.mxu0 %v445_v36 }
  0x96   :  { %771 = vmatpush1.msra.mxu0 %v444_v37 }
  0x97   :  { %772 = vmatprep.subr.mxu0 %v443_v39 }
  0x98   :  { %773 = vmatpush1.msra.mxu0 %v442_v40 }
  0x99   :  { %774 = vmatprep.subr.mxu0 %v441_v42 }
  0x9a   :  { %775 = vmatpush1.msra.mxu0 %v440_v43 }
  0x9b   :  { %776 = vmatprep.subr.mxu0 %v439_v45 }
  0x9c   :  { %777 = vmatpush1.msra.mxu0 %v438_v46 }
  0x9d   :  { %778 = vmatprep.subr.mxu0 %v437_v48 }
  0x9e   :  { %779 = vmatpush1.msra.mxu0 %v436_v49 }
  0x9f   :  { %780 = vmatprep.subr.mxu0 %v435_v51 }
  0xa0   :  { %781 = vmatpush1.msra.mxu0 %v434_v52 }
  0xa1   :  { %782 = vmatprep.subr.mxu0 %v433_v54 }
  0xa2   :  { %783 = vmatpush1.msra.mxu0 %v432_v55 }
  0xa3   :  { %784 = vmatprep.subr.mxu0 %v431_v57 }
  0xa4   :  { %785 = vmatpush1.msra.mxu0 %v430_v58 }
  0xa5   :  { %786 = vmatprep.subr.mxu0 %v429_v60 }
  0xa6   :  { %787 = vmatpush1.msra.mxu0 %v428_v61 }
  0xa7   :  { %821 = vmatmul.mubr.f32.vlgmr.msra.gmra.mxu0 %v27_v62 }
 0x104   :  { %v538_v4 = vpop.f32.mrf.mxu0 }
 0x105   :  { %v539_v9 = vadd.f32 %v538_v4, %v465_v5 }
 0x106   :  { %v540_v7 = vpop.f32.mrf.mxu0 }
 0x107   :  { %v609_v8 = vpop.f32.mrf.mxu1  ;;  %v541_v11 = vadd.f32 %v540_v7, %v469_v6 }
 0x108   :  { %v610_v13 = vadd.f32 %v609_v8, %v539_v9 }
 0x109   :  { %v611_v12 = vpop.f32.mrf.mxu1 }
 0x10a   :  { %v612_v16 = vadd.f32 %v611_v12, %v541_v11 }
 0x146   :  { %v680_v10 = vpop.f32.mrf.mxu0 }
 0x147   :  { %v681_v17 = vadd.f32 %v680_v10, %v610_v13 }
 0x148   :  { %v682_v14 = vpop.f32.mrf.mxu0 }
 0x149   :  { %v751_v15 = vpop.f32.mrf.mxu1  ;;  %v683_v18 = vadd.f32 %v682_v14, %v612_v16 }
 0x14a   :  { %v752_v20 = vadd.f32 %v751_v15, %v681_v17 }
 0x14b   :  { %v753_v19 = vpop.f32.mrf.mxu1 }
 0x14c   :  { %v754_v22 = vadd.f32 %v753_v19, %v683_v18 }
 0x167   :  { %v822_v21 = vpop.f32.mrf.mxu0 }
 0x168   :  { %v823_v23 = vadd.f32 %v822_v21, %v752_v20 }
 0x169   :  { %v824_v24 = vpop.f32.mrf.mxu0 }
 0x16a   :  { %v825_v25 = vadd.f32 %v824_v24, %v754_v22  ;;  %v827_v26 = vmax.f32 %v823_v23, 0.0 }
 0x16c   :  { %v828_v27 = vmax.f32 %v825_v25, 0.0 }
 0x16e   :  { %v843_v28 = vpack.c.bf16 %v828_v27, %v827_v26 }
 0x170   :  { %837 = vst [vmem:[%s1322_s3] sm:$0xff] %v843_v28 }

// kernel: autoencoder_forward.14
= control target key start
LH: loop header
LB: loop body
LE: loop exit
PB: predicated region body
PF: predicated region fallthrough
CT: control target
= control target key end

     0   :  { %v2378_v48 = vmov 1983009808   ;;  %v614_v50 = vlaneseq  ;;  %vm1336_vm0 = vcmask 122880   ;;  %s2890_s1 = inlined_call_operand.vmem [shape: bf16[1,2304,16], index: 1, kind: input, shape index: {}]   ;;  %s2891_s0 = inlined_call_operand.vmem [shape: bf16[1,2,2304], index: 0, kind: input, shape index: {}]   ;;  %s2892_s2 = inlined_call_operand.vmem [shape: f32[1,1,16], index: 2, kind: input, shape index: {}]   ;;  %s2893_s3 = inlined_call_operand.vmem [shape: bf16[1,2,16], index: 3, kind: output, shape index: {}]  }
   0x1   :  { %v1933_v0 = vld [vmem:[%s2890_s1 + $0x78] sm:$0xff]   ;;  %v1932_v7 = vld [vmem:[%s2890_s1 + $0x70] sm:$0xff]   ;;  %v1931_v19 = vld [vmem:[%s2890_s1 + $0x68] sm:$0xff]   ;;  %v612_v49 = vunpack.c.l.s4 %v2378_v48 }
   0x2   :  { %v1925_v1 = vld [vmem:[%s2890_s1 + $0x38] sm:$0xff]   ;;  %v1405_v3 = vunpack.c.l.bf16 %v1933_v0  ;;  %v1406_v4 = vunpack.c.h.bf16 %v1933_v0  ;;  %v1924_v8 = vld [vmem:[%s2890_s1 + $0x30] sm:$0xff]   ;;  %v1402_v16 = vunpack.c.h.bf16 %v1932_v7  ;;  %v1401_v20 = vunpack.c.l.bf16 %v1932_v7  ;;  %v1923_v22 = vld [vmem:[%s2890_s1 + $0x28] sm:$0xff]  }
   0x3   :  { %v1949_v2 = vld [vmem:[%s2890_s1 + $0xf8] sm:$0xff]   ;;  %v1374_v5 = vunpack.c.h.bf16 %v1925_v1  ;;  %v1373_v9 = vunpack.c.l.bf16 %v1925_v1  ;;  %v1948_v13 = vld [vmem:[%s2890_s1 + $0xf0] sm:$0xff]   ;;  %v1370_v17 = vunpack.c.h.bf16 %v1924_v8  ;;  %v1947_v23 = vld [vmem:[%s2890_s1 + $0xe8] sm:$0xff]   ;;  %v1369_v24 = vunpack.c.l.bf16 %v1924_v8 }
   0x4   :  { %v1941_v6 = vld [vmem:[%s2890_s1 + $0xb8] sm:$0xff]   ;;  %v1469_v10 = vunpack.c.l.bf16 %v1949_v2  ;;  %v1470_v11 = vunpack.c.h.bf16 %v1949_v2  ;;  %v1940_v14 = vld [vmem:[%s2890_s1 + $0xb0] sm:$0xff]   ;;  %2062 = vmatprep.subr.mxu0 %v1406_v4  ;;  %v1466_v18 = vunpack.c.h.bf16 %v1948_v13  ;;  %v1465_v25 = vunpack.c.l.bf16 %v1948_v13  ;;  %v1939_v26 = vld [vmem:[%s2890_s1 + $0xa8] sm:$0xff]  }
   0x5   :  { %v1438_v12 = vunpack.c.h.bf16 %v1941_v6  ;;  %v1437_v15 = vunpack.c.l.bf16 %v1941_v6  ;;  %2063 = vmatpush3.msra.mxu0 %v1374_v5  ;;  %v1434_v21 = vunpack.c.h.bf16 %v1940_v14  ;;  %v1398_v27 = vunpack.c.h.bf16 %v1931_v19  ;;  %v1930_v31 = vld [vmem:[%s2890_s1 + $0x60] sm:$0xff]   ;;  %v1929_v43 = vld [vmem:[%s2890_s1 + $0x58] sm:$0xff]   ;;  %v1928_v58 = vld [vmem:[%s2890_s1 + $0x50] sm:$0xff]  }
   0x6   :  { %2097 = vmatprep.subr.mxu1 %v1470_v11  ;;  %2064 = vmatprep.subr.mxu0 %v1405_v3  ;;  %v1433_v28 = vunpack.c.l.bf16 %v1940_v14  ;;  %v1366_v29 = vunpack.c.h.bf16 %v1923_v22  ;;  %v1462_v30 = vunpack.c.h.bf16 %v1947_v23  ;;  %v1397_v32 = vunpack.c.l.bf16 %v1931_v19  ;;  %v1922_v34 = vld [vmem:[%s2890_s1 + $0x20] sm:$0xff]   ;;  %v1921_v46 = vld [vmem:[%s2890_s1 + $0x18] sm:$0xff]   ;;  %v1920_v61 = vld [vmem:[%s2890_s1 + $0x10] sm:$0xff]  }
   0x7   :  { %2098 = vmatpush3.msra.mxu1 %v1438_v12  ;;  %2065 = vmatpush3.msra.mxu0 %v1373_v9  ;;  %v1430_v33 = vunpack.c.h.bf16 %v1939_v26  ;;  %v1946_v35 = vld [vmem:[%s2890_s1 + $0xe0] sm:$0xff]   ;;  %v1365_v36 = vunpack.c.l.bf16 %v1923_v22  ;;  %v1461_v37 = vunpack.c.l.bf16 %v1947_v23  ;;  %v1394_v39 = vunpack.c.h.bf16 %v1930_v31  ;;  %v1945_v47 = vld [vmem:[%s2890_s1 + $0xd8] sm:$0xff]   ;;  %v1944_v62 = vld [vmem:[%s2890_s1 + $0xd0] sm:$0xff]  }
   0x8   :  { %2099 = vmatprep.subr.mxu1 %v1469_v10  ;;  %2066 = vmatprep.subr.mxu0 %v1402_v16  ;;  %v1938_v38 = vld [vmem:[%s2890_s1 + $0xa0] sm:$0xff]   ;;  %v1429_v40 = vunpack.c.l.bf16 %v1939_v26  ;;  %v1362_v41 = vunpack.c.h.bf16 %v1922_v34  ;;  %v1458_v42 = vunpack.c.h.bf16 %v1946_v35  ;;  %v1393_v44 = vunpack.c.l.bf16 %v1930_v31  ;;  %v1937_v53 = vld [vmem:[%s2890_s1 + $0x98] sm:$0xff]   ;;  %v1936_v3 = vld [vmem:[%s2890_s1 + $0x90] sm:$0xff]  }
   0x9   :  { %2100 = vmatpush3.msra.mxu1 %v1437_v15  ;;  %2067 = vmatpush3.msra.mxu0 %v1370_v17  ;;  %v1426_v45 = vunpack.c.h.bf16 %v1938_v38  ;;  %v1361_v51 = vunpack.c.l.bf16 %v1922_v34  ;;  %v1457_v52 = vunpack.c.l.bf16 %v1946_v35  ;;  %v1390_v54 = vunpack.c.h.bf16 %v1929_v43  ;;  %v2474_v4 = vld [vmem:[%s2891_s0] sm:$0xff]  ;;  %v1927_v9 = vld [vmem:[%s2890_s1 + $0x48] sm:$0xff]  }
   0xa   :  { %2101 = vmatprep.subr.mxu1 %v1466_v18  ;;  %2068 = vmatprep.subr.mxu0 %v1401_v20  ;;  %v1425_v55 = vunpack.c.l.bf16 %v1938_v38  ;;  %v1358_v56 = vunpack.c.h.bf16 %v1921_v46  ;;  %v1454_v57 = vunpack.c.h.bf16 %v1945_v47  ;;  %v1389_v59 = vunpack.c.l.bf16 %v1929_v43  ;;  %v1919_v12 = vld [vmem:[%s2890_s1 + $0x8] sm:$0xff]   ;;  %v1926_v23 = vld [vmem:[%s2890_s1 + $0x40] sm:$0xff]   ;;  %v1957_v43 = vld [vmem:[%s2890_s1 + $0x138] sm:$0xff]  }
   0xb   :  { %2102 = vmatpush3.msra.mxu1 %v1434_v21  ;;  %2069 = vmatpush3.msra.mxu0 %v1369_v24  ;;  %v1422_v60 = vunpack.c.h.bf16 %v1937_v53  ;;  %v613_v63 = vunpack.c.0.s8 %v612_v49  ;;  %v615_v0 = vshrl.u32 %v614_v50, 7  ;;  %v1357_v1 = vunpack.c.l.bf16 %v1921_v46  ;;  %v1943_v13 = vld [vmem:[%s2890_s1 + $0xc8] sm:$0xff]   ;;  %v1344_v26 = vld [vmem:[%s2890_s1] sm:$0xff]   ;;  %v1973_v50 = vld [vmem:[%s2890_s1 + $0x1b8] sm:$0xff]  }
   0xc   :  { %2103 = vmatprep.subr.mxu1 %v1465_v25  ;;  %2070 = vmatprep.subr.mxu0 %v1398_v27  ;;  %v1453_v2 = vunpack.c.l.bf16 %v1945_v47  ;;  %v1386_v5 = vunpack.c.h.bf16 %v1928_v58  ;;  %v1421_v6 = vunpack.c.l.bf16 %v1937_v53  ;;  %v1354_v7 = vunpack.c.h.bf16 %v1920_v61  ;;  %v1935_v18 = vld [vmem:[%s2890_s1 + $0x88] sm:$0xff]   ;;  %v1942_v27 = vld [vmem:[%s2890_s1 + $0xc0] sm:$0xff]   ;;  %v1981_v47 = vld [vmem:[%s2890_s1 + $0x1f8] sm:$0xff]  }
   0xd   :  { %2104 = vmatpush3.msra.mxu1 %v1433_v28  ;;  %2071 = vmatpush3.msra.mxu0 %v1366_v29  ;;  %v1450_v8 = vunpack.c.h.bf16 %v1944_v62  ;;  %v1385_v10 = vunpack.c.l.bf16 %v1928_v58  ;;  %v1418_v11 = vunpack.c.h.bf16 %v1936_v3  ;;  %v17_v14 = vunpack.c.l.bf16 %v2474_v4  ;;  %v1934_v34 = vld [vmem:[%s2890_s1 + $0x80] sm:$0xff]   ;;  %v1956_v53 = vld [vmem:[%s2890_s1 + $0x130] sm:$0xff]  }
   0xe   :  { %2105 = vmatprep.subr.mxu1 %v1462_v30  ;;  %2072 = vmatprep.subr.mxu0 %v1397_v32  ;;  %v2486_v15 = vsub.s32 %v613_v63, %v615_v0  ;;  %v1353_v16 = vunpack.c.l.bf16 %v1920_v61  ;;  %v1449_v17 = vunpack.c.l.bf16 %v1944_v62  ;;  %v1382_v19 = vunpack.c.h.bf16 %v1927_v9  ;;  %v1980_v58 = vld [vmem:[%s2890_s1 + $0x1f0] sm:$0xff]   ;;  %v1963_v62 = vld [vmem:[%s2890_s1 + $0x168] sm:$0xff]  }
   0xf   :  { %2106 = vmatpush3.msra.mxu1 %v1430_v33  ;;  %2073 = vmatpush3.msra.mxu0 %v1365_v36  ;;  %v1417_v20 = vunpack.c.l.bf16 %v1936_v3  ;;  %v1350_v21 = vunpack.c.h.bf16 %v1919_v12  ;;  %v1446_v22 = vunpack.c.h.bf16 %v1943_v13  ;;  %v1381_v24 = vunpack.c.l.bf16 %v1927_v9  ;;  %v1972_v61 = vld [vmem:[%s2890_s1 + $0x1b0] sm:$0xff]  }
  0x10   :  { %2107 = vmatprep.subr.mxu1 %v1461_v37  ;;  %2074 = vmatprep.subr.mxu0 %v1394_v39  ;;  %v1414_v25 = vunpack.c.h.bf16 %v1935_v18  ;;  %v617_v28 = vrot.slane %v17_v14, %v2486_v15  ;;  %v610_v29 = vcombine.high %v17_v14, %v17_v14  ;;  %v1349_v30 = vunpack.c.l.bf16 %v1919_v12  ;;  %v1965_v39 = vld [vmem:[%s2890_s1 + $0x178] sm:$0xff]   ;;  %v1954_v14 = vld [vmem:[%s2890_s1 + $0x120] sm:$0xff]  }
  0x11   :  { %2108 = vmatpush3.msra.mxu1 %v1429_v40  ;;  %2075 = vmatpush3.msra.mxu0 %v1362_v41  ;;  %v1445_v31 = vunpack.c.l.bf16 %v1943_v13  ;;  %v1378_v32 = vunpack.c.h.bf16 %v1926_v23  ;;  %v1413_v33 = vunpack.c.l.bf16 %v1935_v18  ;;  %v1346_v35 = vunpack.c.h.bf16 %v1344_v26 }
  0x12   :  { %2109 = vmatprep.subr.mxu1 %v1458_v42  ;;  %2076 = vmatprep.subr.mxu0 %v1393_v44  ;;  %v1442_v36 = vunpack.c.h.bf16 %v1942_v27  ;;  %v1377_v37 = vunpack.c.l.bf16 %v1926_v23  ;;  %v625_v38 = vcombine.high %v617_v28, %v617_v28  ;;  %v624_v40 = vrot.slane %v610_v29, %v2486_v15  ;;  %v1970_v23 = vld [vmem:[%s2890_s1 + $0x1a0] sm:$0xff]  }
  0x13   :  { %2110 = vmatpush3.msra.mxu1 %v1426_v45  ;;  %2077 = vmatpush3.msra.mxu0 %v1361_v51  ;;  %v1345_v41 = vunpack.c.l.bf16 %v1344_v26  ;;  %v1410_v42 = vunpack.c.h.bf16 %v1934_v34  ;;  %v1441_v44 = vunpack.c.l.bf16 %v1942_v27  ;;  %v1534_v45 = vunpack.c.h.bf16 %v1965_v39  ;;  %v1964_v51 = vld [vmem:[%s2890_s1 + $0x170] sm:$0xff]   ;;  %v1953_v27 = vld [vmem:[%s2890_s1 + $0x118] sm:$0xff]  }
  0x14   :  { %2111 = vmatprep.subr.mxu1 %v1457_v52  ;;  %2078 = vmatprep.subr.mxu0 %v1390_v54  ;;  %v1409_v46 = vunpack.c.l.bf16 %v1934_v34  ;;  %v626_v48 = vcombine.high %v624_v40, %v624_v40  ;;  %v1502_v49 = vunpack.c.h.bf16 %v1957_v43  ;;  %v1533_v52 = vunpack.c.l.bf16 %v1965_v39 }
  0x15   :  { %2112 = vmatpush3.msra.mxu1 %v1425_v55  ;;  %2079 = vmatpush3.msra.mxu0 %v1358_v56  ;;  %v1598_v54 = vunpack.c.h.bf16 %v1981_v47  ;;  %v1501_v55 = vunpack.c.l.bf16 %v1957_v43  ;;  %v1566_v56 = vunpack.c.h.bf16 %v1973_v50  ;;  %v1565_v63 = vunpack.c.l.bf16 %v1973_v50  ;;  %v1959_v50 = vld [vmem:[%s2890_s1 + $0x148] sm:$0xff]  }
  0x16   :  { %2113 = vmatprep.subr.mxu1 %v1454_v57  ;;  %2080 = vmatprep.subr.mxu0 %v1389_v59  ;;  %v1530_v57 = vunpack.c.h.bf16 %v1964_v51  ;;  %v1597_v59 = vunpack.c.l.bf16 %v1981_v47  ;;  %v1529_v0 = vunpack.c.l.bf16 %v1964_v51  ;;  %v1497_v3 = vunpack.c.l.bf16 %v1956_v53 }
  0x17   :  { %2114 = vmatpush3.msra.mxu1 %v1422_v60  ;;  %2081 = vmatpush3.msra.mxu0 %v1357_v1  ;;  %v1498_v60 = vunpack.c.h.bf16 %v1956_v53  ;;  %v1955_v1 = vld [vmem:[%s2890_s1 + $0x128] sm:$0xff]   ;;  %v1561_v12 = vunpack.c.l.bf16 %v1972_v61  ;;  %v1525_v13 = vunpack.c.l.bf16 %v1963_v62  ;;  %v1489_v29 = vunpack.c.l.bf16 %v1954_v14 }
  0x18   :  { %2115 = vmatprep.subr.mxu1 %v1453_v2  ;;  %2082 = vmatprep.subr.mxu0 %v1386_v5  ;;  %v1594_v2 = vunpack.c.h.bf16 %v1980_v58  ;;  %v1562_v5 = vunpack.c.h.bf16 %v1972_v61  ;;  %v1494_v9 = vunpack.c.h.bf16 %v1955_v1  ;;  %v1486_v34 = vunpack.c.h.bf16 %v1953_v27  ;;  %v1951_v53 = vld [vmem:[%s2890_s1 + $0x108] sm:$0xff]  }
  0x19   :  { %2116 = vmatpush3.msra.mxu1 %v1421_v6  ;;  %2083 = vmatpush3.msra.mxu0 %v1354_v7  ;;  %v1526_v6 = vunpack.c.h.bf16 %v1963_v62  ;;  %v1979_v7 = vld [vmem:[%s2890_s1 + $0x1e8] sm:$0xff]  }
  0x1a   :  { %2117 = vmatprep.subr.mxu1 %v1450_v8  ;;  %2084 = vmatprep.subr.mxu0 %v1385_v10  ;;  %v1593_v8 = vunpack.c.l.bf16 %v1980_v58  ;;  %v1971_v10 = vld [vmem:[%s2890_s1 + $0x1a8] sm:$0xff]  }
  0x1b   :  { %2118 = vmatpush3.msra.mxu1 %v1418_v11  ;;  %2085 = vmatpush3.msra.mxu0 %v1353_v16  ;;  %v1962_v11 = vld [vmem:[%s2890_s1 + $0x160] sm:$0xff]   ;;  %v1590_v16 = vunpack.c.h.bf16 %v1979_v7  ;;  %v1558_v18 = vunpack.c.h.bf16 %v1971_v10  ;;  %v1975_v61 = vld [vmem:[%s2890_s1 + $0x1c8] sm:$0xff]  }
  0x1c   :  { %2119 = vmatprep.subr.mxu1 %v1449_v17  ;;  %2086 = vmatprep.subr.mxu0 %v1382_v19  ;;  %v1493_v17 = vunpack.c.l.bf16 %v1955_v1  ;;  %v1522_v19 = vunpack.c.h.bf16 %v1962_v11  ;;  %v1521_v26 = vunpack.c.l.bf16 %v1962_v11  ;;  %v1958_v1 = vld [vmem:[%s2890_s1 + $0x140] sm:$0xff]  }
  0x1d   :  { %2120 = vmatpush3.msra.mxu1 %v1417_v20  ;;  %2087 = vmatpush3.msra.mxu0 %v1350_v21  ;;  %v1978_v20 = vld [vmem:[%s2890_s1 + $0x1e0] sm:$0xff]   ;;  %v1589_v21 = vunpack.c.l.bf16 %v1979_v7  ;;  %v1477_v7 = vunpack.c.l.bf16 %v1951_v53 }
  0x1e   :  { %2121 = vmatprep.subr.mxu1 %v1446_v22  ;;  %2088 = vmatprep.subr.mxu0 %v1381_v24  ;;  %v1490_v22 = vunpack.c.h.bf16 %v1954_v14  ;;  %v1961_v24 = vld [vmem:[%s2890_s1 + $0x158] sm:$0xff]   ;;  %v1974_v11 = vld [vmem:[%s2890_s1 + $0x1c0] sm:$0xff]  }
  0x1f   :  { %2122 = vmatpush3.msra.mxu1 %v1414_v25  ;;  %2089 = vmatpush3.msra.mxu0 %v1349_v30  ;;  %v1557_v25 = vunpack.c.l.bf16 %v1971_v10  ;;  %v1554_v30 = vunpack.c.h.bf16 %v1970_v23  ;;  %v1517_v39 = vunpack.c.l.bf16 %v1961_v24  ;;  %v1506_v10 = vunpack.c.h.bf16 %v1958_v1 }
  0x20   :  { %2123 = vmatprep.subr.mxu1 %v1445_v31  ;;  %2090 = vmatprep.subr.mxu0 %v1378_v32  ;;  %v1518_v31 = vunpack.c.h.bf16 %v1961_v24  ;;  %v1977_v32 = vld [vmem:[%s2890_s1 + $0x1d8] sm:$0xff]  }
  0x21   :  { %2124 = vmatpush3.msra.mxu1 %v1413_v33  ;;  %2091 = vmatpush3.msra.mxu0 %v1346_v35  ;;  %v1585_v33 = vunpack.c.l.bf16 %v1978_v20  ;;  %v1969_v35 = vld [vmem:[%s2890_s1 + $0x198] sm:$0xff]   ;;  %v1581_v47 = vunpack.c.l.bf16 %v1977_v32 }
  0x22   :  { %2125 = vmatprep.subr.mxu1 %v1442_v36  ;;  %2092 = vmatprep.subr.mxu0 %v1377_v37  ;;  %v1960_v36 = vld [vmem:[%s2890_s1 + $0x150] sm:$0xff]   ;;  %v2571_v37 = vld [vmem:[%s2891_s0 + $0x8] sm:$0xff]  ;;  %v1550_v43 = vunpack.c.h.bf16 %v1969_v35  ;;  %v1549_v51 = vunpack.c.l.bf16 %v1969_v35 }
  0x23   :  { %768 = vmatprep.mubr.f32.mxu0 %v625_v38  ;;  %2093 = vmatpush3.msra.mxu0 %v1345_v41  ;;  %v1553_v38 = vunpack.c.l.bf16 %v1970_v23  ;;  %v1582_v41 = vunpack.c.h.bf16 %v1977_v32  ;;  %v2005_v32 = vld [vmem:[%s2890_s1 + $0x2b8] sm:$0xff]   ;;  %v1988_v35 = vld [vmem:[%s2890_s1 + $0x230] sm:$0xff]  }
  0x24   :  { %2126 = vmatpush3.msra.mxu1 %v1410_v42  ;;  %769 = vmatmul.mubr.f32.vlgmr.msra.gmra.mxu0 %v617_v28  ;;  %v1586_v28 = vunpack.c.h.bf16 %v1978_v20  ;;  %v1485_v42 = vunpack.c.l.bf16 %v1953_v27 }
  0x25   :  { %2127 = vmatprep.subr.mxu1 %v1441_v44  ;;  %2132 = vmatprep.subr.mxu0 %v1534_v45  ;;  %v1514_v44 = vunpack.c.h.bf16 %v1960_v36  ;;  %v1976_v45 = vld [vmem:[%s2890_s1 + $0x1d0] sm:$0xff]  }
  0x26   :  { %2128 = vmatpush3.msra.mxu1 %v1409_v46  ;;  %838 = vmatprep.mubr.f32.mxu1 %v626_v48  ;;  %v19_v46 = vunpack.c.l.bf16 %v2571_v37 }
  0x27   :  { %2133 = vmatpush3.msra.mxu0 %v1502_v49  ;;  %839 = vmatmul.mubr.f32.vlgmr.msra.gmra.mxu1 %v624_v40  ;;  %v1952_v40 = vld [vmem:[%s2890_s1 + $0x110] sm:$0xff]  }
  0x28   :  { %2134 = vmatprep.subr.mxu0 %v1533_v52  ;;  %2167 = vmatprep.subr.mxu1 %v1598_v54  ;;  %v1482_v48 = vunpack.c.h.bf16 %v1952_v40  ;;  %v1968_v49 = vld [vmem:[%s2890_s1 + $0x190] sm:$0xff]   ;;  %v1513_v52 = vunpack.c.l.bf16 %v1960_v36  ;;  %v2590_v54 = vrot.slane %v19_v46, %v2486_v15  ;;  %v1481_v58 = vunpack.c.l.bf16 %v1952_v40 }
  0x29   :  { %2135 = vmatpush3.msra.mxu0 %v1501_v55  ;;  %2168 = vmatpush3.msra.mxu1 %v1566_v56  ;;  %v644_v55 = vcombine.high %v19_v46, %v19_v46  ;;  %v18_v56 = vunpack.c.h.bf16 %v2474_v4  ;;  %v1967_v4 = vld [vmem:[%s2890_s1 + $0x188] sm:$0xff]   ;;  %v1694_v40 = vunpack.c.h.bf16 %v2005_v32 }
  0x2a   :  { %2136 = vmatprep.subr.mxu0 %v1530_v57  ;;  %2169 = vmatprep.subr.mxu1 %v1597_v59  ;;  %v1578_v57 = vunpack.c.h.bf16 %v1976_v45  ;;  %v1546_v59 = vunpack.c.h.bf16 %v1968_v49 }
  0x2b   :  { %2137 = vmatpush3.msra.mxu0 %v1498_v60  ;;  %2170 = vmatpush3.msra.mxu1 %v1565_v63  ;;  %v1510_v60 = vunpack.c.h.bf16 %v1959_v50  ;;  %v2597_v62 = vrot.slane %v644_v55, %v2486_v15  ;;  %v1577_v63 = vunpack.c.l.bf16 %v1976_v45  ;;  %v2004_v45 = vld [vmem:[%s2890_s1 + $0x2b0] sm:$0xff]  }
  0x2c   :  { %2138 = vmatprep.subr.mxu0 %v1529_v0  ;;  %2171 = vmatprep.subr.mxu1 %v1594_v2  ;;  %v1478_v0 = vunpack.c.h.bf16 %v1951_v53  ;;  %v1545_v2 = vunpack.c.l.bf16 %v1968_v49  ;;  %v1690_v55 = vunpack.c.h.bf16 %v2004_v45 }
  0x2d   :  { %2139 = vmatpush3.msra.mxu0 %v1497_v3  ;;  %2172 = vmatpush3.msra.mxu1 %v1562_v5  ;;  %v1509_v3 = vunpack.c.l.bf16 %v1959_v50  ;;  %v1950_v5 = vld [vmem:[%s2890_s1 + $0x100] sm:$0xff]   ;;  %v1987_v50 = vld [vmem:[%s2890_s1 + $0x228] sm:$0xff]  }
  0x2e   :  { %2140 = vmatprep.subr.mxu0 %v1526_v6  ;;  %2173 = vmatprep.subr.mxu1 %v1593_v8  ;;  %v1574_v6 = vunpack.c.h.bf16 %v1975_v61  ;;  %v627_v8 = vcombine.high %v18_v56, %v18_v56  ;;  %v1474_v14 = vunpack.c.h.bf16 %v1950_v5  ;;  %v1473_v20 = vunpack.c.l.bf16 %v1950_v5 }
  0x2f   :  { %2141 = vmatpush3.msra.mxu0 %v1494_v9  ;;  %2174 = vmatpush3.msra.mxu1 %v1561_v12  ;;  %v1542_v9 = vunpack.c.h.bf16 %v1967_v4  ;;  %v634_v12 = vrot.slane %v18_v56, %v2486_v15 }
  0x30   :  { %2142 = vmatprep.subr.mxu0 %v1525_v13  ;;  %2175 = vmatprep.subr.mxu1 %v1590_v16  ;;  %v1573_v13 = vunpack.c.l.bf16 %v1975_v61  ;;  %v1966_v16 = vld [vmem:[%s2890_s1 + $0x180] sm:$0xff]  }
  0x31   :  { %2143 = vmatpush3.msra.mxu0 %v1493_v17  ;;  %2176 = vmatpush3.msra.mxu1 %v1558_v18  ;;  %v1541_v17 = vunpack.c.l.bf16 %v1967_v4  ;;  %v1505_v18 = vunpack.c.l.bf16 %v1958_v1  ;;  %v642_v23 = vcombine.high %v634_v12, %v634_v12  ;;  %v1538_v24 = vunpack.c.h.bf16 %v1966_v16  ;;  %v1994_v61 = vld [vmem:[%s2890_s1 + $0x260] sm:$0xff]   ;;  %v16_v1 = vld [vmem:[%s2891_s0 + $0x10] sm:$0x3] }
  0x32   :  { %2144 = vmatprep.subr.mxu0 %v1522_v19  ;;  %2177 = vmatprep.subr.mxu1 %v1589_v21  ;;  %v1570_v19 = vunpack.c.h.bf16 %v1974_v11  ;;  %v1997_v21 = vld [vmem:[%s2890_s1 + $0x278] sm:$0xff]   ;;  %v1986_v4 = vld [vmem:[%s2890_s1 + $0x220] sm:$0xff]  }
  0x33   :  { %2145 = vmatpush3.msra.mxu0 %v1490_v22  ;;  %2178 = vmatpush3.msra.mxu1 %v1557_v25  ;;  %v641_v22 = vrot.slane %v627_v8, %v2486_v15  ;;  %v1989_v25 = vld [vmem:[%s2890_s1 + $0x238] sm:$0xff]   ;;  %v1662_v27 = vunpack.c.h.bf16 %v1997_v21 }
  0x34   :  { %2146 = vmatprep.subr.mxu0 %v1521_v26  ;;  %2179 = vmatprep.subr.mxu1 %v1586_v28  ;;  %v1569_v26 = vunpack.c.l.bf16 %v1974_v11  ;;  %v1537_v28 = vunpack.c.l.bf16 %v1966_v16  ;;  %v1993_v11 = vld [vmem:[%s2890_s1 + $0x258] sm:$0xff]  }
  0x35   :  { %2147 = vmatpush3.msra.mxu0 %v1489_v29  ;;  %2180 = vmatpush3.msra.mxu1 %v1554_v30  ;;  %v2013_v29 = vld [vmem:[%s2890_s1 + $0x2f8] sm:$0xff]   ;;  %v643_v30 = vcombine.high %v641_v22, %v641_v22 }
  0x36   :  { %2148 = vmatprep.subr.mxu0 %v1518_v31  ;;  %2181 = vmatprep.subr.mxu1 %v1585_v33  ;;  %v1630_v31 = vunpack.c.h.bf16 %v1989_v25  ;;  %v1996_v33 = vld [vmem:[%s2890_s1 + $0x270] sm:$0xff]   ;;  %v1726_v36 = vunpack.c.h.bf16 %v2013_v29  ;;  %v1985_v16 = vld [vmem:[%s2890_s1 + $0x218] sm:$0xff]  }
  0x37   :  { %2149 = vmatpush3.msra.mxu0 %v1486_v34  ;;  %2182 = vmatpush3.msra.mxu1 %v1553_v38  ;;  %v1661_v34 = vunpack.c.l.bf16 %v1997_v21  ;;  %v1629_v38 = vunpack.c.l.bf16 %v1989_v25  ;;  %v1657_v49 = vunpack.c.l.bf16 %v1996_v33  ;;  %v1646_v21 = vunpack.c.h.bf16 %v1993_v11  ;;  %v2001_v25 = vld [vmem:[%s2890_s1 + $0x298] sm:$0xff]  }
  0x38   :  { %2150 = vmatprep.subr.mxu0 %v1517_v39  ;;  %2183 = vmatprep.subr.mxu1 %v1582_v41  ;;  %v20_v39 = vunpack.c.h.bf16 %v2571_v37  ;;  %v1658_v41 = vunpack.c.h.bf16 %v1996_v33  ;;  %v1995_v37 = vld [vmem:[%s2890_s1 + $0x268] sm:$0xff]   ;;  %v2008_v33 = vld [vmem:[%s2890_s1 + $0x2d0] sm:$0xff]  }
  0x39   :  { %2151 = vmatpush3.msra.mxu0 %v1485_v42  ;;  %2184 = vmatpush3.msra.mxu1 %v1550_v43  ;;  %v2012_v42 = vld [vmem:[%s2890_s1 + $0x2f0] sm:$0xff]   ;;  %v1725_v43 = vunpack.c.l.bf16 %v2013_v29  ;;  %v1654_v56 = vunpack.c.h.bf16 %v1995_v37 }
  0x3a   :  { %2152 = vmatprep.subr.mxu0 %v1514_v44  ;;  %2185 = vmatprep.subr.mxu1 %v1581_v47  ;;  %v1626_v44 = vunpack.c.h.bf16 %v1988_v35  ;;  %v2645_v46 = vrot.slane %v20_v39, %v2486_v15  ;;  %v661_v47 = vcombine.high %v20_v39, %v20_v39  ;;  %v1677_v39 = vunpack.c.l.bf16 %v2001_v25 }
  0x3b   :  { %2153 = vmatpush3.msra.mxu0 %v1482_v48  ;;  %2186 = vmatpush3.msra.mxu1 %v1549_v51  ;;  %v1693_v48 = vunpack.c.l.bf16 %v2005_v32  ;;  %v1722_v51 = vunpack.c.h.bf16 %v2012_v42 }
  0x3c   :  { %2154 = vmatprep.subr.mxu0 %v1513_v52  ;;  %2187 = vmatprep.subr.mxu1 %v1578_v57  ;;  %v1625_v52 = vunpack.c.l.bf16 %v1988_v35  ;;  %v2651_v53 = vrot.slane %v661_v47, %v2486_v15  ;;  %v2011_v57 = vld [vmem:[%s2890_s1 + $0x2e8] sm:$0xff]   ;;  %v1705_v47 = vunpack.c.l.bf16 %v2008_v33 }
  0x3d   :  { %2155 = vmatpush3.msra.mxu0 %v1481_v58  ;;  %2188 = vmatpush3.msra.mxu1 %v1546_v59  ;;  %v1721_v58 = vunpack.c.l.bf16 %v2012_v42  ;;  %v1622_v59 = vunpack.c.h.bf16 %v1987_v50  ;;  %v1717_v8 = vunpack.c.l.bf16 %v2011_v57  ;;  %v1706_v42 = vunpack.c.h.bf16 %v2008_v33 }
  0x3e   :  { %2156 = vmatprep.subr.mxu0 %v1510_v60  ;;  %2189 = vmatprep.subr.mxu1 %v1577_v63  ;;  %v2003_v60 = vld [vmem:[%s2890_s1 + $0x2a8] sm:$0xff]   ;;  %v1689_v63 = vunpack.c.l.bf16 %v2004_v45 }
  0x3f   :  { %2157 = vmatpush3.msra.mxu0 %v1478_v0  ;;  %2190 = vmatpush3.msra.mxu1 %v1545_v2  ;;  %v1653_v0 = vunpack.c.l.bf16 %v1995_v37  ;;  %v1718_v2 = vunpack.c.h.bf16 %v2011_v57  ;;  %v1686_v5 = vunpack.c.h.bf16 %v2003_v60  ;;  %v2007_v37 = vld [vmem:[%s2890_s1 + $0x2c8] sm:$0xff]  }
  0x40   :  { %2158 = vmatprep.subr.mxu0 %v1509_v3  ;;  %2191 = vmatprep.subr.mxu1 %v1574_v6  ;;  %v1621_v3 = vunpack.c.l.bf16 %v1987_v50  ;;  %v1650_v6 = vunpack.c.h.bf16 %v1994_v61  ;;  %v1990_v50 = vld [vmem:[%s2890_s1 + $0x240] sm:$0xff]  }
  0x41   :  { %2159 = vmatpush3.msra.mxu0 %v1477_v7  ;;  %2192 = vmatpush3.msra.mxu1 %v1542_v9  ;;  %v2010_v7 = vld [vmem:[%s2890_s1 + $0x2e0] sm:$0xff]   ;;  %v1618_v9 = vunpack.c.h.bf16 %v1986_v4 }
  0x42   :  { %2160 = vmatprep.subr.mxu0 %v1506_v10  ;;  %2193 = vmatprep.subr.mxu1 %v1573_v13  ;;  %v2002_v10 = vld [vmem:[%s2890_s1 + $0x2a0] sm:$0xff]   ;;  %v1685_v13 = vunpack.c.l.bf16 %v2003_v60 }
  0x43   :  { %2161 = vmatpush3.msra.mxu0 %v1474_v14  ;;  %2194 = vmatpush3.msra.mxu1 %v1541_v17  ;;  %v1649_v14 = vunpack.c.l.bf16 %v1994_v61  ;;  %v1714_v17 = vunpack.c.h.bf16 %v2010_v7  ;;  %v2006_v60 = vld [vmem:[%s2890_s1 + $0x2c0] sm:$0xff]   ;;  %v1701_v61 = vunpack.c.l.bf16 %v2007_v37 }
  0x44   :  { %2162 = vmatprep.subr.mxu0 %v1505_v18  ;;  %2195 = vmatprep.subr.mxu1 %v1570_v19  ;;  %v1617_v18 = vunpack.c.l.bf16 %v1986_v4 }
  0x45   :  { %2163 = vmatpush3.msra.mxu0 %v1473_v20  ;;  %908 = vmatprep.mubr.f32.mxu0 %v642_v23  ;;  %v1682_v20 = vunpack.c.h.bf16 %v2002_v10  ;;  %v1713_v23 = vunpack.c.l.bf16 %v2010_v7 }
  0x46   :  { %2196 = vmatpush3.msra.mxu1 %v1538_v24  ;;  %909 = vmatmul.mubr.f32.vlgmr.msra.gmra.mxu0 %v634_v12  ;;  %v21_v12 = vunpack.c.l.bf16 %v16_v1  ;;  %v1614_v24 = vunpack.c.h.bf16 %v1985_v16  ;;  %v1633_v1 = vunpack.c.l.bf16 %v1990_v50 }
  0x47   :  { %2197 = vmatprep.subr.mxu1 %v1569_v26  ;;  %2202 = vmatprep.subr.mxu0 %v1662_v27  ;;  %v1681_v26 = vunpack.c.l.bf16 %v2002_v10  ;;  %v1645_v27 = vunpack.c.l.bf16 %v1993_v11 }
  0x48   :  { %2198 = vmatpush3.msra.mxu1 %v1537_v28  ;;  %978 = vmatprep.mubr.f32.mxu1 %v643_v30  ;;  %v2681_v19 = vrot.slane %v21_v12, %v2486_v15  ;;  %v1992_v15 = vld [vmem:[%s2890_s1 + $0x250] sm:$0xff]   ;;  %v1613_v30 = vunpack.c.l.bf16 %v1985_v16  ;;  %v2045_v12 = vld [vmem:[%s2890_s1 + $0x3f8] sm:$0xff]  }
  0x49   :  { %2203 = vmatpush3.msra.mxu0 %v1630_v31  ;;  %979 = vmatmul.mubr.f32.vlgmr.msra.gmra.mxu1 %v641_v22  ;;  %v2009_v22 = vld [vmem:[%s2890_s1 + $0x2d8] sm:$0xff]   ;;  %v1984_v28 = vld [vmem:[%s2890_s1 + $0x210] sm:$0xff]   ;;  %v1678_v31 = vunpack.c.h.bf16 %v2001_v25  ;;  %v1642_v32 = vunpack.c.h.bf16 %v1992_v15 }
  0x4a   :  { %2204 = vmatprep.subr.mxu0 %v1661_v34  ;;  %2237 = vmatprep.subr.mxu1 %v1726_v36  ;;  %v1710_v29 = vunpack.c.h.bf16 %v2009_v22  ;;  %v1709_v34 = vunpack.c.l.bf16 %v2009_v22  ;;  %v1610_v35 = vunpack.c.h.bf16 %v1984_v28  ;;  %v2000_v36 = vld [vmem:[%s2890_s1 + $0x290] sm:$0xff]   ;;  %v2037_v16 = vld [vmem:[%s2890_s1 + $0x3b8] sm:$0xff]  }
  0x4b   :  { %2205 = vmatpush3.msra.mxu0 %v1629_v38  ;;  %2238 = vmatpush3.msra.mxu1 %v1694_v40  ;;  %v1991_v38 = vld [vmem:[%s2890_s1 + $0x248] sm:$0xff]   ;;  %v1641_v40 = vunpack.c.l.bf16 %v1992_v15  ;;  %v2044_v25 = vld [vmem:[%s2890_s1 + $0x3f0] sm:$0xff]   ;;  %v1853_v15 = vunpack.c.l.bf16 %v2045_v12 }
  0x4c   :  { %2206 = vmatprep.subr.mxu0 %v1658_v41  ;;  %2239 = vmatprep.subr.mxu1 %v1725_v43  ;;  %v1983_v41 = vld [vmem:[%s2890_s1 + $0x208] sm:$0xff]   ;;  %v1609_v43 = vunpack.c.l.bf16 %v1984_v28  ;;  %v1638_v45 = vunpack.c.h.bf16 %v1991_v38  ;;  %v1821_v28 = vunpack.c.l.bf16 %v2037_v16 }
  0x4d   :  { %2207 = vmatpush3.msra.mxu0 %v1626_v44  ;;  %2240 = vmatpush3.msra.mxu1 %v1693_v48  ;;  %v1674_v44 = vunpack.c.h.bf16 %v2000_v36  ;;  %v1606_v48 = vunpack.c.h.bf16 %v1983_v41  ;;  %v1605_v57 = vunpack.c.l.bf16 %v1983_v41 }
  0x4e   :  { %2208 = vmatprep.subr.mxu0 %v1657_v49  ;;  %2241 = vmatprep.subr.mxu1 %v1722_v51  ;;  %v1999_v49 = vld [vmem:[%s2890_s1 + $0x288] sm:$0xff]   ;;  %v1673_v51 = vunpack.c.l.bf16 %v2000_v36 }
  0x4f   :  { %2209 = vmatpush3.msra.mxu0 %v1625_v52  ;;  %2242 = vmatpush3.msra.mxu1 %v1690_v55  ;;  %v1637_v52 = vunpack.c.l.bf16 %v1991_v38  ;;  %v1982_v55 = vld [vmem:[%s2890_s1 + $0x200] sm:$0xff]   ;;  %v1669_v4 = vunpack.c.l.bf16 %v1999_v49  ;;  %v2035_v38 = vld [vmem:[%s2890_s1 + $0x3a8] sm:$0xff]  }
  0x50   :  { %2210 = vmatprep.subr.mxu0 %v1654_v56  ;;  %2243 = vmatprep.subr.mxu1 %v1721_v58  ;;  %v1702_v56 = vunpack.c.h.bf16 %v2007_v37  ;;  %v1670_v58 = vunpack.c.h.bf16 %v1999_v49 }
  0x51   :  { %2211 = vmatpush3.msra.mxu0 %v1622_v59  ;;  %2244 = vmatpush3.msra.mxu1 %v1689_v63  ;;  %v1634_v59 = vunpack.c.h.bf16 %v1990_v50  ;;  %v1602_v63 = vunpack.c.h.bf16 %v1982_v55  ;;  %v2034_v50 = vld [vmem:[%s2890_s1 + $0x3a0] sm:$0xff]  }
  0x52   :  { %2212 = vmatprep.subr.mxu0 %v1653_v0  ;;  %2245 = vmatprep.subr.mxu1 %v1718_v2  ;;  %v1998_v0 = vld [vmem:[%s2890_s1 + $0x280] sm:$0xff]   ;;  %v1698_v2 = vunpack.c.h.bf16 %v2006_v60 }
  0x53   :  { %2213 = vmatpush3.msra.mxu0 %v1621_v3  ;;  %2246 = vmatpush3.msra.mxu1 %v1686_v5  ;;  %v1601_v3 = vunpack.c.l.bf16 %v1982_v55  ;;  %v2029_v5 = vld [vmem:[%s2890_s1 + $0x378] sm:$0xff]   ;;  %v1666_v7 = vunpack.c.h.bf16 %v1998_v0  ;;  %v1665_v11 = vunpack.c.l.bf16 %v1998_v0 }
  0x54   :  { %2214 = vmatprep.subr.mxu0 %v1650_v6  ;;  %2247 = vmatprep.subr.mxu1 %v1717_v8  ;;  %v659_v6 = vcombine.high %v2590_v54, %v2590_v54  ;;  %v2021_v8 = vld [vmem:[%s2890_s1 + $0x338] sm:$0xff]   ;;  %v1790_v10 = vunpack.c.h.bf16 %v2029_v5 }
  0x55   :  { %2215 = vmatpush3.msra.mxu0 %v1618_v9  ;;  %2248 = vmatpush3.msra.mxu1 %v1685_v13  ;;  %v1697_v9 = vunpack.c.l.bf16 %v2006_v60  ;;  %v660_v13 = vcombine.high %v2597_v62, %v2597_v62  ;;  %v1757_v22 = vunpack.c.l.bf16 %v2021_v8 }
  0x56   :  { %2216 = vmatprep.subr.mxu0 %v1649_v14  ;;  %2249 = vmatprep.subr.mxu1 %v1714_v17  ;;  %v1758_v14 = vunpack.c.h.bf16 %v2021_v8  ;;  %v2028_v17 = vld [vmem:[%s2890_s1 + $0x370] sm:$0xff]  }
  0x57   :  { %2217 = vmatpush3.msra.mxu0 %v1617_v18  ;;  %2250 = vmatpush3.msra.mxu1 %v1682_v20  ;;  %v1789_v18 = vunpack.c.l.bf16 %v2029_v5  ;;  %v2020_v20 = vld [vmem:[%s2890_s1 + $0x330] sm:$0xff]  }
  0x58   :  { %2218 = vmatprep.subr.mxu0 %v1646_v21  ;;  %2251 = vmatprep.subr.mxu1 %v1713_v23  ;;  %v1854_v21 = vunpack.c.h.bf16 %v2045_v12  ;;  %v1822_v23 = vunpack.c.h.bf16 %v2037_v16  ;;  %v2016_v5 = vld [vmem:[%s2890_s1 + $0x310] sm:$0xff]  }
  0x59   :  { %2219 = vmatpush3.msra.mxu0 %v1614_v24  ;;  %2252 = vmatpush3.msra.mxu1 %v1681_v26  ;;  %v1786_v24 = vunpack.c.h.bf16 %v2028_v17  ;;  %v1754_v26 = vunpack.c.h.bf16 %v2020_v20  ;;  %v1738_v12 = vunpack.c.h.bf16 %v2016_v5 }
  0x5a   :  { %2220 = vmatprep.subr.mxu0 %v1645_v27  ;;  %2253 = vmatprep.subr.mxu1 %v1710_v29  ;;  %v2036_v27 = vld [vmem:[%s2890_s1 + $0x3b0] sm:$0xff]   ;;  %v1785_v29 = vunpack.c.l.bf16 %v2028_v17 }
  0x5b   :  { %2221 = vmatpush3.msra.mxu0 %v1613_v30  ;;  %2254 = vmatpush3.msra.mxu1 %v1678_v31  ;;  %v2019_v30 = vld [vmem:[%s2890_s1 + $0x328] sm:$0xff]   ;;  %v1850_v31 = vunpack.c.h.bf16 %v2044_v25  ;;  %v1818_v33 = vunpack.c.h.bf16 %v2036_v27 }
  0x5c   :  { %2222 = vmatprep.subr.mxu0 %v1642_v32  ;;  %2255 = vmatprep.subr.mxu1 %v1709_v34  ;;  %v1753_v32 = vunpack.c.l.bf16 %v2020_v20  ;;  %v1750_v36 = vunpack.c.h.bf16 %v2019_v30 }
  0x5d   :  { %2223 = vmatpush3.msra.mxu0 %v1610_v35  ;;  %2256 = vmatpush3.msra.mxu1 %v1677_v39  ;;  %v2043_v35 = vld [vmem:[%s2890_s1 + $0x3e8] sm:$0xff]   ;;  %v2026_v39 = vld [vmem:[%s2890_s1 + $0x360] sm:$0xff]  }
  0x5e   :  { %2224 = vmatprep.subr.mxu0 %v1641_v40  ;;  %2257 = vmatprep.subr.mxu1 %v1706_v42  ;;  %v1817_v40 = vunpack.c.l.bf16 %v2036_v27  ;;  %v2018_v42 = vld [vmem:[%s2890_s1 + $0x320] sm:$0xff]   ;;  %v1778_v37 = vunpack.c.h.bf16 %v2026_v39  ;;  %v1777_v55 = vunpack.c.l.bf16 %v2026_v39 }
  0x5f   :  { %2225 = vmatpush3.msra.mxu0 %v1609_v43  ;;  %2258 = vmatpush3.msra.mxu1 %v1674_v44  ;;  %v1846_v43 = vunpack.c.h.bf16 %v2043_v35  ;;  %v1749_v44 = vunpack.c.l.bf16 %v2019_v30  ;;  %v1746_v49 = vunpack.c.h.bf16 %v2018_v42  ;;  %v2022_v27 = vld [vmem:[%s2890_s1 + $0x340] sm:$0xff]  }
  0x60   :  { %2226 = vmatprep.subr.mxu0 %v1638_v45  ;;  %2259 = vmatprep.subr.mxu1 %v1705_v47  ;;  %v1814_v45 = vunpack.c.h.bf16 %v2035_v38  ;;  %v2042_v47 = vld [vmem:[%s2890_s1 + $0x3e0] sm:$0xff]   ;;  %v1761_v39 = vunpack.c.l.bf16 %v2022_v27 }
  0x61   :  { %2227 = vmatpush3.msra.mxu0 %v1606_v48  ;;  %2260 = vmatpush3.msra.mxu1 %v1673_v51  ;;  %v1845_v48 = vunpack.c.l.bf16 %v2043_v35  ;;  %v2025_v51 = vld [vmem:[%s2890_s1 + $0x358] sm:$0xff]  }
  0x62   :  { %2228 = vmatprep.subr.mxu0 %v1637_v52  ;;  %2261 = vmatprep.subr.mxu1 %v1702_v56  ;;  %v1813_v52 = vunpack.c.l.bf16 %v2035_v38  ;;  %v2017_v56 = vld [vmem:[%s2890_s1 + $0x318] sm:$0xff]   ;;  %v1774_v60 = vunpack.c.h.bf16 %v2025_v51 }
  0x63   :  { %2229 = vmatpush3.msra.mxu0 %v1605_v57  ;;  %2262 = vmatpush3.msra.mxu1 %v1670_v58  ;;  %v1842_v57 = vunpack.c.h.bf16 %v2042_v47  ;;  %v1745_v58 = vunpack.c.l.bf16 %v2018_v42  ;;  %v1742_v0 = vunpack.c.h.bf16 %v2017_v56  ;;  %v2061_v42 = vld [vmem:[%s2890_s1 + $0x478] sm:$0xff]  }
  0x64   :  { %2230 = vmatprep.subr.mxu0 %v1634_v59  ;;  %2263 = vmatprep.subr.mxu1 %v1701_v61  ;;  %v1810_v59 = vunpack.c.h.bf16 %v2034_v50  ;;  %v2041_v61 = vld [vmem:[%s2890_s1 + $0x3d8] sm:$0xff]  }
  0x65   :  { %2231 = vmatpush3.msra.mxu0 %v1602_v63  ;;  %2264 = vmatpush3.msra.mxu1 %v1669_v4  ;;  %v1841_v63 = vunpack.c.l.bf16 %v2042_v47  ;;  %v2033_v4 = vld [vmem:[%s2890_s1 + $0x398] sm:$0xff]   ;;  %v1918_v47 = vunpack.c.h.bf16 %v2061_v42 }
  0x66   :  { %2232 = vmatprep.subr.mxu0 %v1633_v1  ;;  %2265 = vmatprep.subr.mxu1 %v1698_v2  ;;  %v2024_v1 = vld [vmem:[%s2890_s1 + $0x350] sm:$0xff]   ;;  %v1809_v2 = vunpack.c.l.bf16 %v2034_v50  ;;  %v1806_v8 = vunpack.c.h.bf16 %v2033_v4  ;;  %v1805_v16 = vunpack.c.l.bf16 %v2033_v4 }
  0x67   :  { %2233 = vmatpush3.msra.mxu0 %v1601_v3  ;;  %1048 = vmatprep.mubr.f32.mxu0 %v659_v6  ;;  %v1773_v3 = vunpack.c.l.bf16 %v2025_v51  ;;  %v1838_v6 = vunpack.c.h.bf16 %v2041_v61  ;;  %v1769_v17 = vunpack.c.l.bf16 %v2024_v1  ;;  %v2060_v51 = vld [vmem:[%s2890_s1 + $0x470] sm:$0xff]  }
  0x68   :  { %2266 = vmatpush3.msra.mxu1 %v1666_v7  ;;  %1049 = vmatmul.mubr.f32.vlgmr.msra.gmra.mxu0 %v2590_v54  ;;  %v2027_v54 = vld [vmem:[%s2890_s1 + $0x368] sm:$0xff]   ;;  %v1741_v7 = vunpack.c.l.bf16 %v2017_v56 }
  0x69   :  { %2267 = vmatprep.subr.mxu1 %v1697_v9  ;;  %2272 = vmatprep.subr.mxu0 %v1790_v10  ;;  %v1782_v34 = vunpack.c.h.bf16 %v2027_v54  ;;  %v1781_v41 = vunpack.c.l.bf16 %v2027_v54  ;;  %v1770_v9 = vunpack.c.h.bf16 %v2024_v1  ;;  %v2040_v10 = vld [vmem:[%s2890_s1 + $0x3d0] sm:$0xff]   ;;  %v2058_v1 = vld [vmem:[%s2890_s1 + $0x460] sm:$0xff]  }
  0x6a   :  { %2268 = vmatpush3.msra.mxu1 %v1665_v11  ;;  %1118 = vmatprep.mubr.f32.mxu1 %v660_v13  ;;  %v1837_v11 = vunpack.c.l.bf16 %v2041_v61  ;;  %v2032_v13 = vld [vmem:[%s2890_s1 + $0x390] sm:$0xff]   ;;  %v1834_v20 = vunpack.c.h.bf16 %v2040_v10  ;;  %v1913_v61 = vunpack.c.l.bf16 %v2060_v51 }
  0x6b   :  { %2273 = vmatpush3.msra.mxu0 %v1758_v14  ;;  %1119 = vmatmul.mubr.f32.vlgmr.msra.gmra.mxu1 %v2597_v62  ;;  %v1849_v62 = vunpack.c.l.bf16 %v2044_v25  ;;  %v2023_v14 = vld [vmem:[%s2890_s1 + $0x348] sm:$0xff]   ;;  %v1833_v25 = vunpack.c.l.bf16 %v2040_v10  ;;  %v1801_v54 = vunpack.c.l.bf16 %v2032_v13 }
  0x6c   :  { %2274 = vmatprep.subr.mxu0 %v1789_v18  ;;  %2307 = vmatprep.subr.mxu1 %v1854_v21  ;;  %v2015_v18 = vld [vmem:[%s2890_s1 + $0x308] sm:$0xff]   ;;  %v1737_v21 = vunpack.c.l.bf16 %v2016_v5  ;;  %v1906_v5 = vunpack.c.h.bf16 %v2058_v1 }
  0x6d   :  { %2275 = vmatpush3.msra.mxu0 %v1757_v22  ;;  %2308 = vmatpush3.msra.mxu1 %v1822_v23  ;;  %v1802_v22 = vunpack.c.h.bf16 %v2032_v13  ;;  %v1766_v23 = vunpack.c.h.bf16 %v2023_v14  ;;  %v2056_v13 = vld [vmem:[%s2890_s1 + $0x450] sm:$0xff]  }
  0x6e   :  { %2276 = vmatprep.subr.mxu0 %v1786_v24  ;;  %2309 = vmatprep.subr.mxu1 %v1853_v15  ;;  %v2039_v24 = vld [vmem:[%s2890_s1 + $0x3c8] sm:$0xff]   ;;  %v1734_v15 = vunpack.c.h.bf16 %v2015_v18 }
  0x6f   :  { %2277 = vmatpush3.msra.mxu0 %v1754_v26  ;;  %2310 = vmatpush3.msra.mxu1 %v1821_v28  ;;  %v2031_v26 = vld [vmem:[%s2890_s1 + $0x388] sm:$0xff]   ;;  %v1765_v28 = vunpack.c.l.bf16 %v2023_v14  ;;  %v1830_v30 = vunpack.c.h.bf16 %v2039_v24  ;;  %v1829_v35 = vunpack.c.l.bf16 %v2039_v24 }
  0x70   :  { %2278 = vmatprep.subr.mxu0 %v1785_v29  ;;  %2311 = vmatprep.subr.mxu1 %v1850_v31  ;;  %v2014_v29 = vld [vmem:[%s2890_s1 + $0x300] sm:$0xff]   ;;  %v1733_v31 = vunpack.c.l.bf16 %v2015_v18  ;;  %v1797_v38 = vunpack.c.l.bf16 %v2031_v26  ;;  %v1898_v18 = vunpack.c.h.bf16 %v2056_v13 }
  0x71   :  { %2279 = vmatpush3.msra.mxu0 %v1753_v32  ;;  %2312 = vmatpush3.msra.mxu1 %v1818_v33  ;;  %v1798_v32 = vunpack.c.h.bf16 %v2031_v26  ;;  %v1762_v33 = vunpack.c.h.bf16 %v2022_v27  ;;  %v2054_v26 = vld [vmem:[%s2890_s1 + $0x440] sm:$0xff]  }
  0x72   :  { %2280 = vmatprep.subr.mxu0 %v1782_v34  ;;  %2313 = vmatprep.subr.mxu1 %v1849_v62  ;;  %v2038_v34 = vld [vmem:[%s2890_s1 + $0x3c0] sm:$0xff]   ;;  %v1730_v62 = vunpack.c.h.bf16 %v2014_v29 }
  0x73   :  { %2281 = vmatpush3.msra.mxu0 %v1750_v36  ;;  %2314 = vmatpush3.msra.mxu1 %v1817_v40  ;;  %v2030_v36 = vld [vmem:[%s2890_s1 + $0x380] sm:$0xff]   ;;  %v1826_v40 = vunpack.c.h.bf16 %v2038_v34 }
  0x74   :  { %2282 = vmatprep.subr.mxu0 %v1781_v41  ;;  %2315 = vmatprep.subr.mxu1 %v1846_v43  ;;  %v1729_v41 = vunpack.c.l.bf16 %v2014_v29  ;;  %v676_v43 = vcombine.high %v2645_v46, %v2645_v46  ;;  %v1890_v29 = vunpack.c.h.bf16 %v2054_v26 }
  0x75   :  { %2283 = vmatpush3.msra.mxu0 %v1749_v44  ;;  %2316 = vmatpush3.msra.mxu1 %v1814_v45  ;;  %v1794_v44 = vunpack.c.h.bf16 %v2030_v36  ;;  %v2053_v45 = vld [vmem:[%s2890_s1 + $0x438] sm:$0xff]  }
  0x76   :  { %2284 = vmatprep.subr.mxu0 %v1778_v37  ;;  %2317 = vmatprep.subr.mxu1 %v1845_v48  ;;  %v1825_v37 = vunpack.c.l.bf16 %v2038_v34  ;;  %v1793_v48 = vunpack.c.l.bf16 %v2030_v36  ;;  %v1886_v50 = vunpack.c.h.bf16 %v2053_v45  ;;  %v1885_v56 = vunpack.c.l.bf16 %v2053_v45 }
  0x77   :  { %2285 = vmatpush3.msra.mxu0 %v1746_v49  ;;  %2318 = vmatpush3.msra.mxu1 %v1813_v52  ;;  %v677_v49 = vcombine.high %v2651_v53, %v2651_v53  ;;  %v1917_v52 = vunpack.c.l.bf16 %v2061_v42 }
  0x78   :  { %2286 = vmatprep.subr.mxu0 %v1777_v55  ;;  %2319 = vmatprep.subr.mxu1 %v1842_v57  ;;  %v2052_v55 = vld [vmem:[%s2890_s1 + $0x430] sm:$0xff]   ;;  %v685_v57 = vcombine.high %v2681_v19, %v2681_v19 }
  0x79   :  { %2287 = vmatpush3.msra.mxu0 %v1745_v58  ;;  %2320 = vmatpush3.msra.mxu1 %v1810_v59  ;;  %v1914_v58 = vunpack.c.h.bf16 %v2060_v51  ;;  %v1882_v59 = vunpack.c.h.bf16 %v2052_v55 }
  0x7a   :  { %2288 = vmatprep.subr.mxu0 %v1774_v60  ;;  %2321 = vmatprep.subr.mxu1 %v1841_v63  ;;  %v2059_v60 = vld [vmem:[%s2890_s1 + $0x468] sm:$0xff]   ;;  %v1881_v63 = vunpack.c.l.bf16 %v2052_v55 }
  0x7b   :  { %2289 = vmatpush3.msra.mxu0 %v1742_v0  ;;  %2322 = vmatpush3.msra.mxu1 %v1809_v2  ;;  %v1910_v0 = vunpack.c.h.bf16 %v2059_v60  ;;  %v1909_v2 = vunpack.c.l.bf16 %v2059_v60 }
  0x7c   :  { %2290 = vmatprep.subr.mxu0 %v1773_v3  ;;  %2323 = vmatprep.subr.mxu1 %v1838_v6 }
  0x7d   :  { %2291 = vmatpush3.msra.mxu0 %v1741_v7  ;;  %2324 = vmatpush3.msra.mxu1 %v1806_v8  ;;  %v2057_v7 = vld [vmem:[%s2890_s1 + $0x458] sm:$0xff]   ;;  %v1905_v8 = vunpack.c.l.bf16 %v2058_v1 }
  0x7e   :  { %2292 = vmatprep.subr.mxu0 %v1770_v9  ;;  %2325 = vmatprep.subr.mxu1 %v1837_v11  ;;  %v2049_v9 = vld [vmem:[%s2890_s1 + $0x418] sm:$0xff]   ;;  %v1902_v11 = vunpack.c.h.bf16 %v2057_v7  ;;  %v1901_v14 = vunpack.c.l.bf16 %v2057_v7 }
  0x7f   :  { %2293 = vmatpush3.msra.mxu0 %v1738_v12  ;;  %2326 = vmatpush3.msra.mxu1 %v1805_v16  ;;  %v1870_v12 = vunpack.c.h.bf16 %v2049_v9  ;;  %v2048_v16 = vld [vmem:[%s2890_s1 + $0x410] sm:$0xff]  }
  0x80   :  { %2294 = vmatprep.subr.mxu0 %v1769_v17  ;;  %2327 = vmatprep.subr.mxu1 %v1834_v20  ;;  %v1869_v17 = vunpack.c.l.bf16 %v2049_v9  ;;  %v1866_v20 = vunpack.c.h.bf16 %v2048_v16  ;;  %v1865_v24 = vunpack.c.l.bf16 %v2048_v16 }
  0x81   :  { %2295 = vmatpush3.msra.mxu0 %v1737_v21  ;;  %2328 = vmatpush3.msra.mxu1 %v1802_v22  ;;  %v2055_v21 = vld [vmem:[%s2890_s1 + $0x448] sm:$0xff]   ;;  %v1897_v22 = vunpack.c.l.bf16 %v2056_v13 }
  0x82   :  { %2296 = vmatprep.subr.mxu0 %v1766_v23  ;;  %2329 = vmatprep.subr.mxu1 %v1833_v25  ;;  %v2047_v23 = vld [vmem:[%s2890_s1 + $0x408] sm:$0xff]   ;;  %v1894_v25 = vunpack.c.h.bf16 %v2055_v21  ;;  %v1893_v27 = vunpack.c.l.bf16 %v2055_v21 }
  0x83   :  { %2297 = vmatpush3.msra.mxu0 %v1734_v15  ;;  %2330 = vmatpush3.msra.mxu1 %v1801_v54  ;;  %v1862_v15 = vunpack.c.h.bf16 %v2047_v23  ;;  %v2046_v54 = vld [vmem:[%s2890_s1 + $0x400] sm:$0xff]  }
  0x84   :  { %2298 = vmatprep.subr.mxu0 %v1765_v28  ;;  %2331 = vmatprep.subr.mxu1 %v1830_v30  ;;  %v1861_v28 = vunpack.c.l.bf16 %v2047_v23  ;;  %v1858_v30 = vunpack.c.h.bf16 %v2046_v54 }
  0x85   :  { %2299 = vmatpush3.msra.mxu0 %v1733_v31  ;;  %2332 = vmatpush3.msra.mxu1 %v1798_v32  ;;  %v1889_v31 = vunpack.c.l.bf16 %v2054_v26  ;;  %v1857_v32 = vunpack.c.l.bf16 %v2046_v54 }
  0x86   :  { %2300 = vmatprep.subr.mxu0 %v1762_v33  ;;  %2333 = vmatprep.subr.mxu1 %v1829_v35 }
  0x87   :  { %2301 = vmatpush3.msra.mxu0 %v1730_v62  ;;  %2334 = vmatpush3.msra.mxu1 %v1797_v38  ;;  %v1342_v38 = vld [vmem:[%s2892_s2] ss:$0 sm:$0xff] }
  0x88   :  { %2302 = vmatprep.subr.mxu0 %v1761_v39  ;;  %2335 = vmatprep.subr.mxu1 %v1826_v40 }
  0x89   :  { %2303 = vmatpush3.msra.mxu0 %v1729_v41  ;;  %1188 = vmatprep.mubr.f32.mxu0 %v676_v43 }
  0x8a   :  { %2336 = vmatpush3.msra.mxu1 %v1794_v44  ;;  %1189 = vmatmul.mubr.f32.vlgmr.msra.gmra.mxu0 %v2645_v46  ;;  %v2051_v46 = vld [vmem:[%s2890_s1 + $0x428] sm:$0xff]  }
  0x8b   :  { %2337 = vmatprep.subr.mxu1 %v1825_v37  ;;  %2342 = vmatprep.subr.mxu0 %v1918_v47  ;;  %v1878_v4 = vunpack.c.h.bf16 %v2051_v46  ;;  %v1877_v3 = vunpack.c.l.bf16 %v2051_v46 }
  0x8c   :  { %2338 = vmatpush3.msra.mxu1 %v1793_v48  ;;  %1258 = vmatprep.mubr.f32.mxu1 %v677_v49 }
  0x8d   :  { %2343 = vmatpush3.msra.mxu0 %v1886_v50  ;;  %1259 = vmatmul.mubr.f32.vlgmr.msra.gmra.mxu1 %v2651_v53  ;;  %v2050_v53 = vld [vmem:[%s2890_s1 + $0x420] sm:$0xff]  }
  0x8e   :  { %2344 = vmatprep.subr.mxu0 %v1917_v52  ;;  %1328 = vmatprep.mubr.f32.mxu0 %v685_v57  ;;  %v1874_v6 = vunpack.c.h.bf16 %v2050_v53  ;;  %v1873_v10 = vunpack.c.l.bf16 %v2050_v53 }
  0x8f   :  { %2345 = vmatpush3.msra.mxu0 %v1885_v56 }
  0x90   :  { %2346 = vmatprep.subr.mxu0 %v1914_v58 }
  0x91   :  { %2347 = vmatpush3.msra.mxu0 %v1882_v59 }
  0x92   :  { %2348 = vmatprep.subr.mxu0 %v1913_v61 }
  0x93   :  { %2349 = vmatpush3.msra.mxu0 %v1881_v63 }
  0x94   :  { %2350 = vmatprep.subr.mxu0 %v1910_v0 }
  0x95   :  { %2351 = vmatpush3.msra.mxu0 %v1878_v4 }
  0x96   :  { %2352 = vmatprep.subr.mxu0 %v1909_v2 }
  0x97   :  { %2353 = vmatpush3.msra.mxu0 %v1877_v3 }
  0x98   :  { %2354 = vmatprep.subr.mxu0 %v1906_v5 }
  0x99   :  { %2355 = vmatpush3.msra.mxu0 %v1874_v6 }
  0x9a   :  { %2356 = vmatprep.subr.mxu0 %v1905_v8 }
  0x9b   :  { %2357 = vmatpush3.msra.mxu0 %v1873_v10 }
  0x9c   :  { %2358 = vmatprep.subr.mxu0 %v1902_v11 }
  0x9d   :  { %2359 = vmatpush3.msra.mxu0 %v1870_v12 }
  0x9e   :  { %2360 = vmatprep.subr.mxu0 %v1901_v14 }
  0x9f   :  { %2361 = vmatpush3.msra.mxu0 %v1869_v17 }
  0xa0   :  { %2362 = vmatprep.subr.mxu0 %v1898_v18 }
  0xa1   :  { %2363 = vmatpush3.msra.mxu0 %v1866_v20 }
  0xa2   :  { %2364 = vmatprep.subr.mxu0 %v1897_v22 }
  0xa3   :  { %2365 = vmatpush3.msra.mxu0 %v1865_v24 }
  0xa4   :  { %2366 = vmatprep.subr.mxu0 %v1894_v25 }
  0xa5   :  { %2367 = vmatpush3.msra.mxu0 %v1862_v15 }
  0xa6   :  { %2368 = vmatprep.subr.mxu0 %v1893_v27 }
  0xa7   :  { %2369 = vmatpush3.msra.mxu0 %v1861_v28 }
  0xa8   :  { %2370 = vmatprep.subr.mxu0 %v1890_v29 }
  0xa9   :  { %2371 = vmatpush3.msra.mxu0 %v1858_v30 }
  0xaa   :  { %2372 = vmatprep.subr.mxu0 %v1889_v31 }
  0xab   :  { %2373 = vmatpush3.msra.mxu0 %v1857_v32 }
  0xac   :  { %1329 = vmatmul.mubr.f32.vlgmr.msra.gmra.mxu0 %v2681_v19 }
  0xe4   :  { %v2094_v33 = vpop.f32.mrf.mxu0 }
  0xe6   :  { %v2095_v34 = vpop.f32.mrf.mxu0 }
  0xe7   :  { %v2129_v35 = vpop.f32.mrf.mxu1  ;;  %v2096_v36 = vadd.f32 %v2095_v34, %v2094_v33 }
  0xe9   :  { %v2130_v39 = vpop.f32.mrf.mxu1  ;;  %v771_v42 = vadd.f32 %v2096_v36, %v1342_v38 }
  0xea   :  { %v2131_v43 = vadd.f32 %v2130_v39, %v2129_v35 }
  0xec   :  { %v841_v47 = vadd.f32 %v2131_v43, %v771_v42 }
 0x106   :  { %v2164_v62 = vpop.f32.mrf.mxu0 }
 0x108   :  { %v2165_v40 = vpop.f32.mrf.mxu0 }
 0x109   :  { %v2199_v41 = vpop.f32.mrf.mxu1  ;;  %v2166_v45 = vadd.f32 %v2165_v40, %v2164_v62 }
 0x10b   :  { %v2200_v37 = vpop.f32.mrf.mxu1  ;;  %v911_v49 = vadd.f32 %v2166_v45, %v841_v47 }
 0x10c   :  { %v2201_v50 = vadd.f32 %v2200_v37, %v2199_v41 }
 0x10e   :  { %v981_v56 = vadd.f32 %v2201_v50, %v911_v49 }
 0x128   :  { %v2234_v44 = vpop.f32.mrf.mxu0 }
 0x12a   :  { %v2235_v48 = vpop.f32.mrf.mxu0 }
 0x12b   :  { %v2269_v19 = vpop.f32.mrf.mxu1  ;;  %v2236_v52 = vadd.f32 %v2235_v48, %v2234_v44 }
 0x12d   :  { %v2270_v55 = vpop.f32.mrf.mxu1  ;;  %v1051_v59 = vadd.f32 %v2236_v52, %v981_v56 }
 0x12e   :  { %v2271_v60 = vadd.f32 %v2270_v55, %v2269_v19 }
 0x130   :  { %v1121_v63 = vadd.f32 %v2271_v60, %v1051_v59 }
 0x14a   :  { %v2304_v51 = vpop.f32.mrf.mxu0 }
 0x14c   :  { %v2305_v57 = vpop.f32.mrf.mxu0 }
 0x14d   :  { %v2339_v58 = vpop.f32.mrf.mxu1  ;;  %v2306_v61 = vadd.f32 %v2305_v57, %v2304_v51 }
 0x14f   :  { %v2340_v46 = vpop.f32.mrf.mxu1  ;;  %v1191_v0 = vadd.f32 %v2306_v61, %v1121_v63 }
 0x150   :  { %v2341_v4 = vadd.f32 %v2340_v46, %v2339_v58 }
 0x152   :  { %v1261_v53 = vadd.f32 %v2341_v4, %v1191_v0 }
 0x16c   :  { %v2374_v1 = vpop.f32.mrf.mxu0 }
 0x16e   :  { %v2375_v2 = vpop.f32.mrf.mxu0 }
 0x16f   :  { %v2376_v3 = vadd.f32 %v2375_v2, %v2374_v1 }
 0x171   :  { %v1331_v5 = vadd.f32 %v2376_v3, %v1261_v53 }
 0x173   :  { %v1334_v6 = vmax.f32 %v1331_v5, 0.0 }
 0x175   :  { %v1335_v7 = vpack.c.bf16 %v1334_v6, %v1334_v6 }
 0x177   :  { %1337 = vst.msk [vmem:[%s2893_s3] sm:$0x1] %vm1336_vm0, %v1335_v7 }

// kernel: autoencoder_forward.15
= control target key start
LH: loop header
LB: loop body
LE: loop exit
PB: predicated region body
PF: predicated region fallthrough
CT: control target
= control target key end

     0   :  { %s435_s12 = smov 0   ;;  %s463_s0 = inlined_call_operand.vmem [shape: bf16[4,2,64], index: 0, kind: input, shape index: {}]   ;;  %s464_s1 = inlined_call_operand.vmem [shape: bf16[4,64,256], index: 1, kind: input, shape index: {}]   ;;  %s465_s2 = inlined_call_operand.vmem [shape: f32[1,1,256], index: 2, kind: input, shape index: {}]   ;;  %s466_s3 = inlined_call_operand.vmem [shape: bf16[4,2,256], index: 3, kind: output, shape index: {}]  }
   0x1 LB: > { %s381_s13 = sadd.s32 4294967295, %s411_s12   ;;  %p385_p0 = scmp.ge.s32.totalorder %s411_s12, 1  ;;  %s411_s12 = sphi %s435_s12, %s13_s12  }
   0x2   : > { %p145_p1 = scmp.lt.s32.totalorder %s411_s12, 5 }
   0x4   : > { %p146_p2 = pnand %p385_p0, %p145_p1 }
   0x5   : > { %p171_p3 = scmp.lt.s32.totalorder (!%p146_p2), %s381_s13, 3 }
   0x6   : > { %149 = sbr.rel (%p146_p2) target bundleno = 237 (0xed), region = 32 }
   0xb   : > { %v413_v0 = vmov 0.0   ;;  %s468_s13 = smov (!%p171_p3, %s381_s13), 3  ;;  %vm221_vm0 = vcmask 523264   ;;  %v211_v27 = vlaneseq  ;;  %v209_v30 = vld [vmem:[%s465_s2] sm:$0x3] }
   0xc   : > { %289 = vmatprep.mubr.f32.mxu0 %v413_v0  ;;  %s394_s14 = sshll.u32 %s468_s13, 6  ;;  %s173_s20 = scalar_lea.vmem %s463_s0, %s468_s13  ;;  %v414_v33 = vmov 1966171168  }
   0xd   : > { %s178_s17 = scalar_lea.vmem %s464_s1, %s394_s14  ;;  %v183_v23 = vld [vmem:[%s173_s20] sm:$0x1]  ;;  %v212_v28 = vshrl.u32 %v211_v27, 7  ;;  %v304_v34 = vunpack.c.l.s4 %v414_v33  ;;  %s388_s23 = sshll.u32 %s468_s13, 1 }
   0xe   : > { %v192_v1 = vld [vmem:[%s178_s17 + $0x38] sm:$0xff]  ;;  %v191_v2 = vld [vmem:[%s178_s17 + $0x30] sm:$0xff]  ;;  %v190_v3 = vld [vmem:[%s178_s17 + $0x28] sm:$0xff]  ;;  %v184_v26 = vunpack.c.l.bf16 %v183_v23  ;;  %s182_s26 = scalar_lea.vmem %s466_s3, %s388_s23 }
   0xf   : > { %v208_v4 = vunpack.c.h.bf16 %v192_v1  ;;  %v207_v5 = vunpack.c.l.bf16 %v192_v1  ;;  %v206_v6 = vunpack.c.h.bf16 %v191_v2  ;;  %v205_v7 = vunpack.c.l.bf16 %v191_v2  ;;  %v189_v8 = vld [vmem:[%s178_s17 + $0x20] sm:$0xff]  ;;  %v188_v11 = vld [vmem:[%s178_s17 + $0x18] sm:$0xff]  ;;  %v187_v14 = vld [vmem:[%s178_s17 + $0x10] sm:$0xff] }
  0x10   : > { %v204_v9 = vunpack.c.h.bf16 %v190_v3  ;;  %v203_v10 = vunpack.c.l.bf16 %v190_v3  ;;  %v202_v12 = vunpack.c.h.bf16 %v189_v8  ;;  %v201_v13 = vunpack.c.l.bf16 %v189_v8  ;;  %v186_v17 = vld [vmem:[%s178_s17 + $0x8] sm:$0xff]  ;;  %v185_v20 = vld [vmem:[%s178_s17] sm:$0xff] }
  0x11   : > { %241 = vmatprep.subr.mxu0 %v208_v4  ;;  %v200_v15 = vunpack.c.h.bf16 %v188_v11  ;;  %v199_v16 = vunpack.c.l.bf16 %v188_v11  ;;  %v198_v18 = vunpack.c.h.bf16 %v187_v14  ;;  %v197_v19 = vunpack.c.l.bf16 %v187_v14 }
  0x12   : > { %242 = vmatpush1.msra.mxu0 %v207_v5  ;;  %v196_v21 = vunpack.c.h.bf16 %v186_v17  ;;  %v195_v22 = vunpack.c.l.bf16 %v186_v17  ;;  %v194_v24 = vunpack.c.h.bf16 %v185_v20  ;;  %v193_v25 = vunpack.c.l.bf16 %v185_v20 }
  0x13   : > { %243 = vmatprep.subr.mxu0 %v206_v6  ;;  %v213_v29 = vsub.s32 0, %v212_v28  ;;  %v217_v31 = vsub.s32 1, %v212_v28  ;;  %v305_v38 = vunpack.c.0.s8 %v304_v34 }
  0x14   : > { %244 = vmatpush1.msra.mxu0 %v205_v7 }
  0x15   : > { %245 = vmatprep.subr.mxu0 %v204_v9  ;;  %v214_v32 = vrot.slane %v209_v30, %v213_v29  ;;  %v218_v35 = vrot.slane %v209_v30, %v217_v31  ;;  %v308_v43 = vsub.s32 %v305_v38, %v212_v28 }
  0x16   : > { %246 = vmatpush1.msra.mxu0 %v203_v10 }
  0x17   : > { %247 = vmatprep.subr.mxu0 %v202_v12 }
  0x18   : > { %248 = vmatpush1.msra.mxu0 %v201_v13 }
  0x19   : > { %249 = vmatprep.subr.mxu0 %v200_v15 }
  0x1a   : > { %250 = vmatpush1.msra.mxu0 %v199_v16 }
  0x1b   : > { %251 = vmatprep.subr.mxu0 %v198_v18 }
  0x1c   : > { %252 = vmatpush1.msra.mxu0 %v197_v19 }
  0x1d   : > { %253 = vmatprep.subr.mxu0 %v196_v21 }
  0x1e   : > { %254 = vmatpush1.msra.mxu0 %v195_v22 }
  0x1f   : > { %255 = vmatprep.subr.mxu0 %v194_v24 }
  0x20   : > { %256 = vmatpush1.msra.mxu0 %v193_v25 }
  0x21   : > { %389 = vmatmul.mubr.msk.f32.vlgmr.msra.gmra.mxu0 %vm221_vm0, %v184_v26 }
  0xe1   : > { %v291_v36 = vpop.f32.mrf.mxu0 }
  0xe2   : > { %v292_v37 = vadd.f32 %v291_v36, %v214_v32 }
  0xe3   : > { %v293_v39 = vpop.f32.mrf.mxu0 }
  0xe4   : > { %v294_v40 = vadd.f32 %v293_v39, %v218_v35  ;;  %v296_v41 = vmax.f32 %v292_v37, 0.0 }
  0xe6   : > { %v297_v42 = vmax.f32 %v294_v40, 0.0 }
  0xe8   : > { %v390_v44 = vpack.c.bf16 %v297_v42, %v296_v41 }
  0xea   : > { %v309_v45 = vrot.slane %v390_v44, %v308_v43 }
  0xec   : > { %391 = vst.sshfl [vmem:[%s182_s26] sm:$0x5 pattern:$0x73625140] %v309_v45 }
  0xed PF: > { %s13_s12 = sadd.s32 1, %s411_s12  }
  0xee   : > { %p10_p4 = scmp.ge.s32.totalorder %s13_s12, 6  }
  0xf0   :  { %12 = sbr.rel (!%p10_p4) target bundleno = 1 (0x1), region = 65 }

// kernel: autoencoder_forward.16
= control target key start
LH: loop header
LB: loop body
LE: loop exit
PB: predicated region body
PF: predicated region fallthrough
CT: control target
= control target key end

     0   :  { %s1322_s12 = smov 0   ;;  %s1422_s0 = inlined_call_operand.vmem [shape: bf16[4,8,1024], index: 0, kind: input, shape index: {}]   ;;  %s1423_s1 = inlined_call_operand.vmem [shape: bf16[4,1024,128], index: 1, kind: input, shape index: {}]   ;;  %s1424_s2 = inlined_call_operand.vmem [shape: f32[1,1,128], index: 2, kind: input, shape index: {}]   ;;  %s1425_s3 = inlined_call_operand.vmem [shape: bf16[4,8,128], index: 3, kind: output, shape index: {}]  }
   0x1 LB: > { %s812_s13 = sadd.s32 4294967295, %s1300_s12   ;;  %p816_p0 = scmp.ge.s32.totalorder %s1300_s12, 1  ;;  %s1300_s12 = sphi %s1322_s12, %s13_s12  }
   0x2   : > { %p147_p1 = scmp.lt.s32.totalorder %s1300_s12, 5 }
   0x4   : > { %p148_p2 = pnand %p816_p0, %p147_p1 }
   0x5   : > { %p175_p3 = scmp.lt.s32.totalorder (!%p148_p2), %s812_s13, 3 }
   0x6   : > { %151 = sbr.rel (%p148_p2) target bundleno = 291 (0x123), region = 32 }
   0xb   : > { %s1427_s13 = smov (!%p175_p3, %s812_s13), 3 }
   0xc   : > { %s826_s14 = sshll.u32 %s1427_s13, 9  ;;  %s825_s18 = sshll.u32 %s1427_s13, 5 }
   0xd   : > { %s1336_s17 = scalar_lea.vmem %s1423_s1, %s826_s14  ;;  %s1372_s21 = scalar_lea.vmem %s1422_s0, %s825_s18 }
   0xe   : > { %v1097_v0 = vld [vmem:[%s1336_s17 + $0x78] sm:$0xff]   ;;  %v1096_v8 = vld [vmem:[%s1336_s17 + $0x70] sm:$0xff]   ;;  %v1095_v20 = vld [vmem:[%s1336_s17 + $0x68] sm:$0xff]   ;;  %s821_s24 = sshll.u32 %s1427_s13, 2 }
   0xf   : > { %v1113_v1 = vld [vmem:[%s1336_s17 + $0xf8] sm:$0xff]   ;;  %v889_v3 = vunpack.c.l.bf16 %v1097_v0  ;;  %v890_v4 = vunpack.c.h.bf16 %v1097_v0  ;;  %v1112_v9 = vld [vmem:[%s1336_s17 + $0xf0] sm:$0xff]   ;;  %v886_v16 = vunpack.c.h.bf16 %v1096_v8  ;;  %v1111_v21 = vld [vmem:[%s1336_s17 + $0xe8] sm:$0xff]   ;;  %v885_v22 = vunpack.c.l.bf16 %v1096_v8  ;;  %s188_s27 = scalar_lea.vmem %s1425_s3, %s821_s24 }
  0x10   : > { %v1089_v2 = vld [vmem:[%s1336_s17 + $0x38] sm:$0xff]   ;;  %v953_v5 = vunpack.c.l.bf16 %v1113_v1  ;;  %v954_v6 = vunpack.c.h.bf16 %v1113_v1  ;;  %v1088_v14 = vld [vmem:[%s1336_s17 + $0x30] sm:$0xff]   ;;  %v950_v17 = vunpack.c.h.bf16 %v1112_v9  ;;  %v949_v23 = vunpack.c.l.bf16 %v1112_v9  ;;  %v1087_v24 = vld [vmem:[%s1336_s17 + $0x28] sm:$0xff]  }
  0x11   : > { %v1105_v7 = vld [vmem:[%s1336_s17 + $0xb8] sm:$0xff]   ;;  %v857_v10 = vunpack.c.l.bf16 %v1089_v2  ;;  %v858_v11 = vunpack.c.h.bf16 %v1089_v2  ;;  %v1104_v15 = vld [vmem:[%s1336_s17 + $0xb0] sm:$0xff]   ;;  %1146 = vmatprep.subr.mxu0 %v890_v4  ;;  %v854_v18 = vunpack.c.h.bf16 %v1088_v14  ;;  %v1103_v25 = vld [vmem:[%s1336_s17 + $0xa8] sm:$0xff]   ;;  %v853_v26 = vunpack.c.l.bf16 %v1088_v14 }
  0x12   : > { %v921_v12 = vunpack.c.l.bf16 %v1105_v7  ;;  %v922_v13 = vunpack.c.h.bf16 %v1105_v7  ;;  %1181 = vmatprep.subr.mxu1 %v954_v6  ;;  %v918_v19 = vunpack.c.h.bf16 %v1104_v15  ;;  %v917_v27 = vunpack.c.l.bf16 %v1104_v15  ;;  %v1094_v32 = vld [vmem:[%s1336_s17 + $0x60] sm:$0xff]   ;;  %v1093_v44 = vld [vmem:[%s1336_s17 + $0x58] sm:$0xff]   ;;  %v1092_v56 = vld [vmem:[%s1336_s17 + $0x50] sm:$0xff]  }
  0x13   : > { %1147 = vmatpush3.msra.mxu0 %v858_v11  ;;  %v882_v28 = vunpack.c.h.bf16 %v1095_v20  ;;  %v946_v29 = vunpack.c.h.bf16 %v1111_v21  ;;  %v850_v30 = vunpack.c.h.bf16 %v1087_v24  ;;  %v914_v31 = vunpack.c.h.bf16 %v1103_v25  ;;  %v1110_v33 = vld [vmem:[%s1336_s17 + $0xe0] sm:$0xff]   ;;  %v1109_v45 = vld [vmem:[%s1336_s17 + $0xd8] sm:$0xff]   ;;  %v1108_v57 = vld [vmem:[%s1336_s17 + $0xd0] sm:$0xff]  }
  0x14   : > { %1182 = vmatpush3.msra.mxu1 %v922_v13  ;;  %1148 = vmatprep.subr.mxu0 %v889_v3  ;;  %v881_v34 = vunpack.c.l.bf16 %v1095_v20  ;;  %v945_v35 = vunpack.c.l.bf16 %v1111_v21  ;;  %v1086_v36 = vld [vmem:[%s1336_s17 + $0x20] sm:$0xff]   ;;  %v849_v38 = vunpack.c.l.bf16 %v1087_v24  ;;  %v913_v39 = vunpack.c.l.bf16 %v1103_v25  ;;  %v1085_v48 = vld [vmem:[%s1336_s17 + $0x18] sm:$0xff]   ;;  %v1084_v60 = vld [vmem:[%s1336_s17 + $0x10] sm:$0xff]  }
  0x15   : > { %1183 = vmatprep.subr.mxu1 %v953_v5  ;;  %1149 = vmatpush3.msra.mxu0 %v857_v10  ;;  %v1102_v37 = vld [vmem:[%s1336_s17 + $0xa0] sm:$0xff]   ;;  %v878_v40 = vunpack.c.h.bf16 %v1094_v32  ;;  %v942_v41 = vunpack.c.h.bf16 %v1110_v33  ;;  %v846_v42 = vunpack.c.h.bf16 %v1086_v36  ;;  %v877_v46 = vunpack.c.l.bf16 %v1094_v32  ;;  %v1101_v49 = vld [vmem:[%s1336_s17 + $0x98] sm:$0xff]   ;;  %v1100_v61 = vld [vmem:[%s1336_s17 + $0x90] sm:$0xff]  }
  0x16   : > { %1184 = vmatpush3.msra.mxu1 %v921_v12  ;;  %1150 = vmatprep.subr.mxu0 %v886_v16  ;;  %v910_v43 = vunpack.c.h.bf16 %v1102_v37  ;;  %v941_v47 = vunpack.c.l.bf16 %v1110_v33  ;;  %v845_v50 = vunpack.c.l.bf16 %v1086_v36  ;;  %v909_v51 = vunpack.c.l.bf16 %v1102_v37  ;;  %v1091_v4 = vld [vmem:[%s1336_s17 + $0x48] sm:$0xff]   ;;  %v1090_v16 = vld [vmem:[%s1336_s17 + $0x40] sm:$0xff]   ;;  %v1129_v32 = vld [vmem:[%s1336_s17 + $0x178] sm:$0xff]  }
  0x17   : > { %1185 = vmatprep.subr.mxu1 %v950_v17  ;;  %1151 = vmatpush3.msra.mxu0 %v854_v18  ;;  %v874_v52 = vunpack.c.h.bf16 %v1093_v44  ;;  %v938_v53 = vunpack.c.h.bf16 %v1109_v45  ;;  %v842_v54 = vunpack.c.h.bf16 %v1085_v48  ;;  %v906_v55 = vunpack.c.h.bf16 %v1101_v49  ;;  %v1107_v5 = vld [vmem:[%s1336_s17 + $0xc8] sm:$0xff]   ;;  %v1106_v17 = vld [vmem:[%s1336_s17 + $0xc0] sm:$0xff]  }
  0x18   : > { %1186 = vmatpush3.msra.mxu1 %v918_v19  ;;  %1152 = vmatprep.subr.mxu0 %v885_v22  ;;  %v873_v58 = vunpack.c.l.bf16 %v1093_v44  ;;  %v937_v59 = vunpack.c.l.bf16 %v1109_v45  ;;  %v841_v62 = vunpack.c.l.bf16 %v1085_v48  ;;  %v905_v63 = vunpack.c.l.bf16 %v1101_v49  ;;  %v1083_v8 = vld [vmem:[%s1336_s17 + $0x8] sm:$0xff]   ;;  %v828_v20 = vld [vmem:[%s1336_s17] sm:$0xff]  }
  0x19   : > { %1187 = vmatprep.subr.mxu1 %v949_v23  ;;  %1153 = vmatpush3.msra.mxu0 %v853_v26  ;;  %v870_v0 = vunpack.c.h.bf16 %v1092_v56  ;;  %v934_v1 = vunpack.c.h.bf16 %v1108_v57  ;;  %v838_v2 = vunpack.c.h.bf16 %v1084_v60  ;;  %v902_v3 = vunpack.c.h.bf16 %v1100_v61  ;;  %v1099_v9 = vld [vmem:[%s1336_s17 + $0x88] sm:$0xff]   ;;  %v1098_v21 = vld [vmem:[%s1336_s17 + $0x80] sm:$0xff]  }
  0x1a   : > { %1188 = vmatpush3.msra.mxu1 %v917_v27  ;;  %1154 = vmatprep.subr.mxu0 %v882_v28  ;;  %v869_v6 = vunpack.c.l.bf16 %v1092_v56  ;;  %v933_v7 = vunpack.c.l.bf16 %v1108_v57  ;;  %v837_v10 = vunpack.c.l.bf16 %v1084_v60  ;;  %v901_v11 = vunpack.c.l.bf16 %v1100_v61  ;;  %v189_v26 = vld [vmem:[%s1372_s21] sm:$0xff] }
  0x1b   : > { %1189 = vmatprep.subr.mxu1 %v946_v29  ;;  %1155 = vmatpush3.msra.mxu0 %v850_v30  ;;  %v866_v12 = vunpack.c.h.bf16 %v1091_v4  ;;  %v930_v13 = vunpack.c.h.bf16 %v1107_v5  ;;  %v834_v14 = vunpack.c.h.bf16 %v1083_v8  ;;  %v898_v15 = vunpack.c.h.bf16 %v1099_v9 }
  0x1c   : > { %1190 = vmatpush3.msra.mxu1 %v914_v31  ;;  %1156 = vmatprep.subr.mxu0 %v881_v34  ;;  %v865_v18 = vunpack.c.l.bf16 %v1091_v4  ;;  %v929_v19 = vunpack.c.l.bf16 %v1107_v5  ;;  %v833_v22 = vunpack.c.l.bf16 %v1083_v8  ;;  %v897_v23 = vunpack.c.l.bf16 %v1099_v9  ;;  %v190_v31 = vld [vmem:[%s1372_s21 + $0x8] sm:$0xff] }
  0x1d   : > { %1191 = vmatprep.subr.mxu1 %v945_v35  ;;  %1157 = vmatpush3.msra.mxu0 %v849_v38  ;;  %v862_v24 = vunpack.c.h.bf16 %v1090_v16  ;;  %v926_v25 = vunpack.c.h.bf16 %v1106_v17  ;;  %v830_v27 = vunpack.c.h.bf16 %v828_v20  ;;  %v894_v28 = vunpack.c.h.bf16 %v1098_v21  ;;  %v1145_v35 = vld [vmem:[%s1336_s17 + $0x1f8] sm:$0xff]  }
  0x1e   : > { %1192 = vmatpush3.msra.mxu1 %v913_v39  ;;  %1158 = vmatprep.subr.mxu0 %v878_v40  ;;  %v861_v29 = vunpack.c.l.bf16 %v1090_v16  ;;  %v925_v30 = vunpack.c.l.bf16 %v1106_v17  ;;  %v829_v33 = vunpack.c.l.bf16 %v828_v20  ;;  %v194_v34 = vunpack.c.h.bf16 %v189_v26  ;;  %v1121_v38 = vld [vmem:[%s1336_s17 + $0x138] sm:$0xff]  }
  0x1f   : > { %1193 = vmatprep.subr.mxu1 %v942_v41  ;;  %1159 = vmatpush3.msra.mxu0 %v846_v42  ;;  %v193_v36 = vunpack.c.l.bf16 %v189_v26  ;;  %v893_v37 = vunpack.c.l.bf16 %v1098_v21  ;;  %v1137_v39 = vld [vmem:[%s1336_s17 + $0x1b8] sm:$0xff]   ;;  %v196_v40 = vunpack.c.h.bf16 %v190_v31  ;;  %v1018_v41 = vunpack.c.h.bf16 %v1129_v32 }
  0x20   : > { %1194 = vmatpush3.msra.mxu1 %v910_v43  ;;  %1160 = vmatprep.subr.mxu0 %v877_v46  ;;  %v195_v42 = vunpack.c.l.bf16 %v190_v31  ;;  %v1082_v43 = vunpack.c.h.bf16 %v1145_v35  ;;  %v986_v44 = vunpack.c.h.bf16 %v1121_v38  ;;  %v1050_v45 = vunpack.c.h.bf16 %v1137_v39  ;;  %v1128_v46 = vld [vmem:[%s1336_s17 + $0x170] sm:$0xff]  }
  0x21   : > { %1195 = vmatprep.subr.mxu1 %v941_v47  ;;  %1161 = vmatpush3.msra.mxu0 %v845_v50  ;;  %v1144_v47 = vld [vmem:[%s1336_s17 + $0x1f0] sm:$0xff]   ;;  %v1017_v48 = vunpack.c.l.bf16 %v1129_v32  ;;  %v1081_v49 = vunpack.c.l.bf16 %v1145_v35  ;;  %v1013_v60 = vunpack.c.l.bf16 %v1128_v46 }
  0x22   : > { %1196 = vmatpush3.msra.mxu1 %v909_v51  ;;  %1162 = vmatprep.subr.mxu0 %v874_v52  ;;  %v1120_v50 = vld [vmem:[%s1336_s17 + $0x130] sm:$0xff]   ;;  %v985_v52 = vunpack.c.l.bf16 %v1121_v38  ;;  %v1077_v61 = vunpack.c.l.bf16 %v1144_v47 }
  0x23   : > { %1197 = vmatprep.subr.mxu1 %v938_v53  ;;  %1163 = vmatpush3.msra.mxu0 %v842_v54  ;;  %v1136_v51 = vld [vmem:[%s1336_s17 + $0x1b0] sm:$0xff]   ;;  %v1049_v53 = vunpack.c.l.bf16 %v1137_v39  ;;  %v1014_v54 = vunpack.c.h.bf16 %v1128_v46  ;;  %v982_v56 = vunpack.c.h.bf16 %v1120_v50  ;;  %v1115_v46 = vld [vmem:[%s1336_s17 + $0x108] sm:$0xff]  }
  0x24   : > { %1198 = vmatpush3.msra.mxu1 %v906_v55  ;;  %1164 = vmatprep.subr.mxu0 %v873_v58  ;;  %v1078_v55 = vunpack.c.h.bf16 %v1144_v47  ;;  %v1046_v57 = vunpack.c.h.bf16 %v1136_v51  ;;  %v1127_v58 = vld [vmem:[%s1336_s17 + $0x168] sm:$0xff]   ;;  %v1140_v31 = vld [vmem:[%s1336_s17 + $0x1d0] sm:$0xff]  }
  0x25   : > { %1199 = vmatprep.subr.mxu1 %v937_v59  ;;  %1165 = vmatpush3.msra.mxu0 %v841_v62  ;;  %v1143_v59 = vld [vmem:[%s1336_s17 + $0x1e8] sm:$0xff]   ;;  %v1009_v8 = vunpack.c.l.bf16 %v1127_v58  ;;  %v1132_v35 = vld [vmem:[%s1336_s17 + $0x190] sm:$0xff]   ;;  %v1062_v39 = vunpack.c.h.bf16 %v1140_v31 }
  0x26   : > { %1200 = vmatpush3.msra.mxu1 %v905_v63  ;;  %1166 = vmatprep.subr.mxu0 %v870_v0  ;;  %v1119_v62 = vld [vmem:[%s1336_s17 + $0x128] sm:$0xff]   ;;  %v981_v0 = vunpack.c.l.bf16 %v1120_v50  ;;  %v1073_v9 = vunpack.c.l.bf16 %v1143_v59 }
  0x27   : > { %1201 = vmatprep.subr.mxu1 %v934_v1  ;;  %1167 = vmatpush3.msra.mxu0 %v838_v2  ;;  %v1135_v63 = vld [vmem:[%s1336_s17 + $0x1a8] sm:$0xff]   ;;  %v1045_v1 = vunpack.c.l.bf16 %v1136_v51  ;;  %v1010_v2 = vunpack.c.h.bf16 %v1127_v58  ;;  %v978_v4 = vunpack.c.h.bf16 %v1119_v62  ;;  %v1114_v58 = vld [vmem:[%s1336_s17 + $0x100] sm:$0xff]  }
  0x28   : > { %1202 = vmatpush3.msra.mxu1 %v902_v3  ;;  %1168 = vmatprep.subr.mxu0 %v869_v6  ;;  %v1074_v3 = vunpack.c.h.bf16 %v1143_v59  ;;  %v1042_v5 = vunpack.c.h.bf16 %v1135_v63  ;;  %v1126_v6 = vld [vmem:[%s1336_s17 + $0x160] sm:$0xff]   ;;  %v1131_v47 = vld [vmem:[%s1336_s17 + $0x188] sm:$0xff]  }
  0x29   : > { %1203 = vmatprep.subr.mxu1 %v933_v7  ;;  %1169 = vmatpush3.msra.mxu0 %v837_v10  ;;  %v1142_v7 = vld [vmem:[%s1336_s17 + $0x1e0] sm:$0xff]   ;;  %v1005_v20 = vunpack.c.l.bf16 %v1126_v6 }
  0x2a   : > { %1204 = vmatpush3.msra.mxu1 %v901_v11  ;;  %1170 = vmatprep.subr.mxu0 %v866_v12  ;;  %v1118_v10 = vld [vmem:[%s1336_s17 + $0x120] sm:$0xff]   ;;  %v977_v12 = vunpack.c.l.bf16 %v1119_v62  ;;  %v1069_v21 = vunpack.c.l.bf16 %v1142_v7 }
  0x2b   : > { %1205 = vmatprep.subr.mxu1 %v930_v13  ;;  %1171 = vmatpush3.msra.mxu0 %v834_v14  ;;  %v1134_v11 = vld [vmem:[%s1336_s17 + $0x1a0] sm:$0xff]   ;;  %v1041_v13 = vunpack.c.l.bf16 %v1135_v63  ;;  %v1006_v14 = vunpack.c.h.bf16 %v1126_v6  ;;  %v974_v16 = vunpack.c.h.bf16 %v1118_v10  ;;  %v957_v6 = vunpack.c.l.bf16 %v1114_v58 }
  0x2c   : > { %1206 = vmatpush3.msra.mxu1 %v898_v15  ;;  %1172 = vmatprep.subr.mxu0 %v865_v18  ;;  %v1070_v15 = vunpack.c.h.bf16 %v1142_v7  ;;  %v1038_v17 = vunpack.c.h.bf16 %v1134_v11  ;;  %v1125_v18 = vld [vmem:[%s1336_s17 + $0x158] sm:$0xff]   ;;  %v1130_v59 = vld [vmem:[%s1336_s17 + $0x180] sm:$0xff]  }
  0x2d   : > { %1207 = vmatprep.subr.mxu1 %v929_v19  ;;  %1173 = vmatpush3.msra.mxu0 %v833_v22  ;;  %v1141_v19 = vld [vmem:[%s1336_s17 + $0x1d8] sm:$0xff]   ;;  %v1002_v26 = vunpack.c.h.bf16 %v1125_v18  ;;  %v1001_v32 = vunpack.c.l.bf16 %v1125_v18 }
  0x2e   : > { %1208 = vmatpush3.msra.mxu1 %v897_v23  ;;  %1174 = vmatprep.subr.mxu0 %v862_v24  ;;  %v1117_v22 = vld [vmem:[%s1336_s17 + $0x118] sm:$0xff]   ;;  %v973_v24 = vunpack.c.l.bf16 %v1118_v10 }
  0x2f   : > { %1209 = vmatprep.subr.mxu1 %v926_v25  ;;  %1175 = vmatpush3.msra.mxu0 %v830_v27  ;;  %v1133_v23 = vld [vmem:[%s1336_s17 + $0x198] sm:$0xff]   ;;  %v1037_v25 = vunpack.c.l.bf16 %v1134_v11  ;;  %v1066_v27 = vunpack.c.h.bf16 %v1141_v19 }
  0x30   : > { %1210 = vmatpush3.msra.mxu1 %v894_v28  ;;  %1176 = vmatprep.subr.mxu0 %v861_v29  ;;  %v970_v28 = vunpack.c.h.bf16 %v1117_v22  ;;  %v1034_v29 = vunpack.c.h.bf16 %v1133_v23 }
  0x31   : > { %1211 = vmatprep.subr.mxu1 %v925_v30  ;;  %1177 = vmatpush3.msra.mxu0 %v829_v33  ;;  %v1124_v30 = vld [vmem:[%s1336_s17 + $0x150] sm:$0xff]   ;;  %v1065_v33 = vunpack.c.l.bf16 %v1141_v19 }
  0x32   : > { %528 = vmatprep.mubr.f32.mxu0 %v194_v34  ;;  %1212 = vmatpush3.msra.mxu1 %v893_v37  ;;  %v1116_v34 = vld [vmem:[%s1336_s17 + $0x110] sm:$0xff]   ;;  %v1033_v37 = vunpack.c.l.bf16 %v1133_v23  ;;  %v998_v38 = vunpack.c.h.bf16 %v1124_v30 }
  0x33   : > { %529 = vmatmul.mubr.f32.vlgmr.msra.gmra.mxu0 %v193_v36  ;;  %598 = vmatprep.mubr.f32.mxu1 %v196_v40  ;;  %v969_v36 = vunpack.c.l.bf16 %v1117_v22  ;;  %v966_v40 = vunpack.c.h.bf16 %v1116_v34 }
  0x34   : > { %1216 = vmatprep.subr.mxu0 %v1018_v41  ;;  %1251 = vmatprep.subr.mxu1 %v1082_v43  ;;  %v1030_v41 = vunpack.c.h.bf16 %v1132_v35  ;;  %v1139_v43 = vld [vmem:[%s1336_s17 + $0x1c8] sm:$0xff]  }
  0x35   : > { %599 = vmatmul.mubr.f32.vlgmr.msra.gmra.mxu1 %v195_v42  ;;  %1217 = vmatpush3.msra.mxu0 %v986_v44  ;;  %v1123_v42 = vld [vmem:[%s1336_s17 + $0x148] sm:$0xff]   ;;  %v997_v44 = vunpack.c.l.bf16 %v1124_v30  ;;  %v1058_v51 = vunpack.c.h.bf16 %v1139_v43 }
  0x36   : > { %1252 = vmatpush3.msra.mxu1 %v1050_v45  ;;  %1218 = vmatprep.subr.mxu0 %v1017_v48  ;;  %v1061_v45 = vunpack.c.l.bf16 %v1140_v31  ;;  %v965_v48 = vunpack.c.l.bf16 %v1116_v34  ;;  %v994_v50 = vunpack.c.h.bf16 %v1123_v42 }
  0x37   : > { %1253 = vmatprep.subr.mxu1 %v1081_v49  ;;  %1219 = vmatpush3.msra.mxu0 %v985_v52  ;;  %v1029_v49 = vunpack.c.l.bf16 %v1132_v35  ;;  %v962_v52 = vunpack.c.h.bf16 %v1115_v46 }
  0x38   : > { %1254 = vmatpush3.msra.mxu1 %v1049_v53  ;;  %1220 = vmatprep.subr.mxu0 %v1014_v54  ;;  %v1026_v53 = vunpack.c.h.bf16 %v1131_v47  ;;  %v1122_v54 = vld [vmem:[%s1336_s17 + $0x140] sm:$0xff]  }
  0x39   : > { %1255 = vmatprep.subr.mxu1 %v1078_v55  ;;  %1221 = vmatpush3.msra.mxu0 %v982_v56  ;;  %v1138_v55 = vld [vmem:[%s1336_s17 + $0x1c0] sm:$0xff]   ;;  %v993_v56 = vunpack.c.l.bf16 %v1123_v42  ;;  %v990_v62 = vunpack.c.h.bf16 %v1122_v54 }
  0x3a   : > { %1256 = vmatpush3.msra.mxu1 %v1046_v57  ;;  %1222 = vmatprep.subr.mxu0 %v1013_v60  ;;  %v1057_v57 = vunpack.c.l.bf16 %v1139_v43  ;;  %v961_v60 = vunpack.c.l.bf16 %v1115_v46  ;;  %v1054_v63 = vunpack.c.h.bf16 %v1138_v55 }
  0x3b   : > { %1257 = vmatprep.subr.mxu1 %v1077_v61  ;;  %1223 = vmatpush3.msra.mxu0 %v981_v0  ;;  %v1025_v61 = vunpack.c.l.bf16 %v1131_v47  ;;  %v191_v0 = vld [vmem:[%s1372_s21 + $0x10] sm:$0xff] }
  0x3c   : > { %1258 = vmatpush3.msra.mxu1 %v1045_v1  ;;  %1224 = vmatprep.subr.mxu0 %v1010_v2  ;;  %v958_v1 = vunpack.c.h.bf16 %v1114_v58  ;;  %v1022_v2 = vunpack.c.h.bf16 %v1130_v59  ;;  %v198_v7 = vunpack.c.h.bf16 %v191_v0  ;;  %v197_v10 = vunpack.c.l.bf16 %v191_v0 }
  0x3d   : > { %1259 = vmatprep.subr.mxu1 %v1074_v3  ;;  %1225 = vmatpush3.msra.mxu0 %v978_v4  ;;  %v192_v3 = vld [vmem:[%s1372_s21 + $0x18] sm:$0xff]  ;;  %v989_v4 = vunpack.c.l.bf16 %v1122_v54 }
  0x3e   : > { %1260 = vmatpush3.msra.mxu1 %v1042_v5  ;;  %1226 = vmatprep.subr.mxu0 %v1009_v8  ;;  %v1053_v5 = vunpack.c.l.bf16 %v1138_v55  ;;  %v1021_v8 = vunpack.c.l.bf16 %v1130_v59  ;;  %v199_v11 = vunpack.c.l.bf16 %v192_v3 }
  0x3f   : > { %1261 = vmatprep.subr.mxu1 %v1073_v9  ;;  %1227 = vmatpush3.msra.mxu0 %v977_v12  ;;  %v200_v9 = vunpack.c.h.bf16 %v192_v3 }
  0x40   : > { %1262 = vmatpush3.msra.mxu1 %v1041_v13  ;;  %1228 = vmatprep.subr.mxu0 %v1006_v14 }
  0x41   : > { %1263 = vmatprep.subr.mxu1 %v1070_v15  ;;  %1229 = vmatpush3.msra.mxu0 %v974_v16  ;;  %v822_v16 = vld [vmem:[%s1424_s2] ss:$0 sm:$0xff] }
  0x42   : > { %1264 = vmatpush3.msra.mxu1 %v1038_v17  ;;  %1230 = vmatprep.subr.mxu0 %v1005_v20 }
  0x43   : > { %1265 = vmatprep.subr.mxu1 %v1069_v21  ;;  %1231 = vmatpush3.msra.mxu0 %v973_v24 }
  0x44   : > { %1266 = vmatpush3.msra.mxu1 %v1037_v25  ;;  %1232 = vmatprep.subr.mxu0 %v1002_v26 }
  0x45   : > { %1267 = vmatprep.subr.mxu1 %v1066_v27  ;;  %1233 = vmatpush3.msra.mxu0 %v970_v28 }
  0x46   : > { %1268 = vmatpush3.msra.mxu1 %v1034_v29  ;;  %1234 = vmatprep.subr.mxu0 %v1001_v32 }
  0x47   : > { %1269 = vmatprep.subr.mxu1 %v1065_v33  ;;  %1235 = vmatpush3.msra.mxu0 %v969_v36 }
  0x48   : > { %1270 = vmatpush3.msra.mxu1 %v1033_v37  ;;  %1236 = vmatprep.subr.mxu0 %v998_v38 }
  0x49   : > { %1271 = vmatprep.subr.mxu1 %v1062_v39  ;;  %1237 = vmatpush3.msra.mxu0 %v966_v40 }
  0x4a   : > { %1272 = vmatpush3.msra.mxu1 %v1030_v41  ;;  %1238 = vmatprep.subr.mxu0 %v997_v44 }
  0x4b   : > { %1273 = vmatprep.subr.mxu1 %v1061_v45  ;;  %1239 = vmatpush3.msra.mxu0 %v965_v48 }
  0x4c   : > { %1274 = vmatpush3.msra.mxu1 %v1029_v49  ;;  %1240 = vmatprep.subr.mxu0 %v994_v50 }
  0x4d   : > { %1275 = vmatprep.subr.mxu1 %v1058_v51  ;;  %1241 = vmatpush3.msra.mxu0 %v962_v52 }
  0x4e   : > { %1276 = vmatpush3.msra.mxu1 %v1026_v53  ;;  %1242 = vmatprep.subr.mxu0 %v993_v56 }
  0x4f   : > { %1277 = vmatprep.subr.mxu1 %v1057_v57  ;;  %1243 = vmatpush3.msra.mxu0 %v961_v60 }
  0x50   : > { %1278 = vmatpush3.msra.mxu1 %v1025_v61  ;;  %1244 = vmatprep.subr.mxu0 %v990_v62 }
  0x51   : > { %1279 = vmatprep.subr.mxu1 %v1054_v63  ;;  %1245 = vmatpush3.msra.mxu0 %v958_v1 }
  0x52   : > { %1280 = vmatpush3.msra.mxu1 %v1022_v2  ;;  %1246 = vmatprep.subr.mxu0 %v989_v4 }
  0x53   : > { %1281 = vmatprep.subr.mxu1 %v1053_v5  ;;  %1247 = vmatpush3.msra.mxu0 %v957_v6 }
  0x54   : > { %668 = vmatprep.mubr.f32.mxu0 %v198_v7  ;;  %1282 = vmatpush3.msra.mxu1 %v1021_v8 }
  0x55   : > { %738 = vmatprep.mubr.f32.mxu1 %v200_v9  ;;  %669 = vmatmul.mubr.f32.vlgmr.msra.gmra.mxu0 %v197_v10 }
  0x56   : > { %739 = vmatmul.mubr.f32.vlgmr.msra.gmra.mxu1 %v199_v11 }
  0xf3   : > { %v1178_v12 = vpop.f32.mrf.mxu0 }
  0xf5   : > { %v1213_v13 = vpop.f32.mrf.mxu1  ;;  %v1179_v14 = vpop.f32.mrf.mxu0 }
  0xf6   : > { %v1180_v15 = vadd.f32 %v1179_v14, %v1178_v12 }
  0xf7   : > { %v1214_v17 = vpop.f32.mrf.mxu1 }
  0xf8   : > { %v531_v18 = vadd.f32 %v1180_v15, %v822_v16  ;;  %v1215_v19 = vadd.f32 %v1214_v17, %v1213_v13 }
  0xfa   : > { %v601_v24 = vadd.f32 %v1215_v19, %v531_v18 }
 0x115   : > { %v1248_v20 = vpop.f32.mrf.mxu0 }
 0x116   : > { %v1283_v21 = vpop.f32.mrf.mxu1 }
 0x117   : > { %v1249_v22 = vpop.f32.mrf.mxu0 }
 0x118   : > { %v1284_v23 = vpop.f32.mrf.mxu1  ;;  %v1250_v25 = vadd.f32 %v1249_v22, %v1248_v20 }
 0x119   : > { %v1285_v27 = vadd.f32 %v1284_v23, %v1283_v21 }
 0x11a   : > { %v671_v26 = vadd.f32 %v1250_v25, %v601_v24 }
 0x11c   : > { %v741_v28 = vadd.f32 %v1285_v27, %v671_v26 }
 0x11e   : > { %v744_v29 = vmax.f32 %v741_v28, 0.0 }
 0x120   : > { %v745_v30 = vpack.c.bf16 %v744_v29, %v744_v29 }
 0x122   : > { %746 = vst [vmem:[%s188_s27] sm:$0xf] %v745_v30 }
 0x123 PF: > { %s13_s12 = sadd.s32 1, %s1300_s12  }
 0x124   : > { %p10_p4 = scmp.ge.s32.totalorder %s13_s12, 6  }
 0x126   :  { %12 = sbr.rel (!%p10_p4) target bundleno = 1 (0x1), region = 65 }

// kernel: autoencoder_forward.17
= control target key start
LH: loop header
LB: loop body
LE: loop exit
PB: predicated region body
PF: predicated region fallthrough
CT: control target
= control target key end

     0   :  { %s920_s12 = smov 0   ;;  %s996_s0 = inlined_call_operand.vmem [shape: bf16[4,32,512], index: 0, kind: input, shape index: {}]   ;;  %s997_s1 = inlined_call_operand.vmem [shape: bf16[4,512,64], index: 1, kind: input, shape index: {}]   ;;  %s998_s2 = inlined_call_operand.vmem [shape: f32[1,1,64], index: 2, kind: input, shape index: {}]   ;;  %s999_s3 = inlined_call_operand.vmem [shape: bf16[4,32,64], index: 3, kind: output, shape index: {}]  }
   0x1 LB: > { %s612_s13 = sadd.s32 4294967295, %s898_s12   ;;  %p616_p0 = scmp.ge.s32.totalorder %s898_s12, 1  ;;  %s898_s12 = sphi %s920_s12, %s13_s12  }
   0x2   : > { %p147_p1 = scmp.lt.s32.totalorder %s898_s12, 5 }
   0x4   : > { %p148_p2 = pnand %p616_p0, %p147_p1 }
   0x5   : > { %p176_p3 = scmp.lt.s32.totalorder (!%p148_p2), %s612_s13, 3 }
   0x6   : > { %151 = sbr.rel (%p148_p2) target bundleno = 269 (0x10d), region = 32 }
   0xb   : > { %s1001_s13 = smov (!%p176_p3, %s612_s13), 3  ;;  %vm540_vm0 = vcmask 519168  }
   0xc   : > { %s631_s14 = sshll.u32 %s1001_s13, 8  ;;  %s630_s18 = sshll.u32 %s1001_s13, 6 }
   0xd   : > { %s934_s17 = scalar_lea.vmem %s997_s1, %s631_s14  ;;  %s970_s21 = scalar_lea.vmem %s996_s0, %s630_s18 }
   0xe   : > { %v779_v0 = vld [vmem:[%s934_s17 + $0x78] sm:$0xff]   ;;  %v778_v8 = vld [vmem:[%s934_s17 + $0x70] sm:$0xff]   ;;  %v777_v20 = vld [vmem:[%s934_s17 + $0x68] sm:$0xff]   ;;  %s632_s24 = sshll.u32 %s1001_s13, 4 }
   0xf   : > { %v795_v1 = vld [vmem:[%s934_s17 + $0xf8] sm:$0xff]   ;;  %v699_v3 = vunpack.c.l.bf16 %v779_v0  ;;  %v700_v4 = vunpack.c.h.bf16 %v779_v0  ;;  %v794_v9 = vld [vmem:[%s934_s17 + $0xf0] sm:$0xff]   ;;  %v696_v16 = vunpack.c.h.bf16 %v778_v8  ;;  %v793_v21 = vld [vmem:[%s934_s17 + $0xe8] sm:$0xff]   ;;  %v695_v22 = vunpack.c.l.bf16 %v778_v8  ;;  %s190_s27 = scalar_lea.vmem %s999_s3, %s632_s24 }
  0x10   : > { %v771_v2 = vld [vmem:[%s934_s17 + $0x38] sm:$0xff]   ;;  %v763_v5 = vunpack.c.l.bf16 %v795_v1  ;;  %v764_v6 = vunpack.c.h.bf16 %v795_v1  ;;  %v770_v14 = vld [vmem:[%s934_s17 + $0x30] sm:$0xff]   ;;  %v760_v17 = vunpack.c.h.bf16 %v794_v9  ;;  %v759_v23 = vunpack.c.l.bf16 %v794_v9  ;;  %v769_v24 = vld [vmem:[%s934_s17 + $0x28] sm:$0xff]  }
  0x11   : > { %v787_v7 = vld [vmem:[%s934_s17 + $0xb8] sm:$0xff]   ;;  %v667_v10 = vunpack.c.l.bf16 %v771_v2  ;;  %v668_v11 = vunpack.c.h.bf16 %v771_v2  ;;  %v786_v15 = vld [vmem:[%s934_s17 + $0xb0] sm:$0xff]   ;;  %796 = vmatprep.subr.mxu0 %v700_v4  ;;  %v664_v18 = vunpack.c.h.bf16 %v770_v14  ;;  %v785_v25 = vld [vmem:[%s934_s17 + $0xa8] sm:$0xff]   ;;  %v663_v26 = vunpack.c.l.bf16 %v770_v14 }
  0x12   : > { %v731_v12 = vunpack.c.l.bf16 %v787_v7  ;;  %v732_v13 = vunpack.c.h.bf16 %v787_v7  ;;  %840 = vmatprep.subr.mxu1 %v764_v6  ;;  %v728_v19 = vunpack.c.h.bf16 %v786_v15  ;;  %v727_v27 = vunpack.c.l.bf16 %v786_v15  ;;  %v776_v32 = vld [vmem:[%s934_s17 + $0x60] sm:$0xff]   ;;  %v775_v44 = vld [vmem:[%s934_s17 + $0x58] sm:$0xff]   ;;  %v774_v56 = vld [vmem:[%s934_s17 + $0x50] sm:$0xff]  }
  0x13   : > { %797 = vmatpush3.msra.mxu0 %v668_v11  ;;  %v692_v28 = vunpack.c.h.bf16 %v777_v20  ;;  %v756_v29 = vunpack.c.h.bf16 %v793_v21  ;;  %v660_v30 = vunpack.c.h.bf16 %v769_v24  ;;  %v724_v31 = vunpack.c.h.bf16 %v785_v25  ;;  %v792_v33 = vld [vmem:[%s934_s17 + $0xe0] sm:$0xff]   ;;  %v791_v45 = vld [vmem:[%s934_s17 + $0xd8] sm:$0xff]   ;;  %v790_v57 = vld [vmem:[%s934_s17 + $0xd0] sm:$0xff]  }
  0x14   : > { %841 = vmatpush3.msra.mxu1 %v732_v13  ;;  %798 = vmatprep.subr.mxu0 %v699_v3  ;;  %v691_v34 = vunpack.c.l.bf16 %v777_v20  ;;  %v755_v35 = vunpack.c.l.bf16 %v793_v21  ;;  %v768_v36 = vld [vmem:[%s934_s17 + $0x20] sm:$0xff]   ;;  %v659_v38 = vunpack.c.l.bf16 %v769_v24  ;;  %v723_v39 = vunpack.c.l.bf16 %v785_v25  ;;  %v767_v48 = vld [vmem:[%s934_s17 + $0x18] sm:$0xff]   ;;  %v766_v60 = vld [vmem:[%s934_s17 + $0x10] sm:$0xff]  }
  0x15   : > { %842 = vmatprep.subr.mxu1 %v763_v5  ;;  %799 = vmatpush3.msra.mxu0 %v667_v10  ;;  %v784_v37 = vld [vmem:[%s934_s17 + $0xa0] sm:$0xff]   ;;  %v688_v40 = vunpack.c.h.bf16 %v776_v32  ;;  %v752_v41 = vunpack.c.h.bf16 %v792_v33  ;;  %v656_v42 = vunpack.c.h.bf16 %v768_v36  ;;  %v687_v46 = vunpack.c.l.bf16 %v776_v32  ;;  %v783_v49 = vld [vmem:[%s934_s17 + $0x98] sm:$0xff]   ;;  %v782_v61 = vld [vmem:[%s934_s17 + $0x90] sm:$0xff]  }
  0x16   : > { %843 = vmatpush3.msra.mxu1 %v731_v12  ;;  %800 = vmatprep.subr.mxu0 %v696_v16  ;;  %v720_v43 = vunpack.c.h.bf16 %v784_v37  ;;  %v751_v47 = vunpack.c.l.bf16 %v792_v33  ;;  %v655_v50 = vunpack.c.l.bf16 %v768_v36  ;;  %v719_v51 = vunpack.c.l.bf16 %v784_v37  ;;  %v773_v4 = vld [vmem:[%s934_s17 + $0x48] sm:$0xff]   ;;  %v772_v16 = vld [vmem:[%s934_s17 + $0x40] sm:$0xff]  }
  0x17   : > { %844 = vmatprep.subr.mxu1 %v760_v17  ;;  %801 = vmatpush3.msra.mxu0 %v664_v18  ;;  %v684_v52 = vunpack.c.h.bf16 %v775_v44  ;;  %v748_v53 = vunpack.c.h.bf16 %v791_v45  ;;  %v652_v54 = vunpack.c.h.bf16 %v767_v48  ;;  %v716_v55 = vunpack.c.h.bf16 %v783_v49  ;;  %v789_v5 = vld [vmem:[%s934_s17 + $0xc8] sm:$0xff]   ;;  %v788_v17 = vld [vmem:[%s934_s17 + $0xc0] sm:$0xff]  }
  0x18   : > { %845 = vmatpush3.msra.mxu1 %v728_v19  ;;  %802 = vmatprep.subr.mxu0 %v695_v22  ;;  %v683_v58 = vunpack.c.l.bf16 %v775_v44  ;;  %v747_v59 = vunpack.c.l.bf16 %v791_v45  ;;  %v651_v62 = vunpack.c.l.bf16 %v767_v48  ;;  %v715_v63 = vunpack.c.l.bf16 %v783_v49  ;;  %v765_v8 = vld [vmem:[%s934_s17 + $0x8] sm:$0xff]   ;;  %v638_v20 = vld [vmem:[%s934_s17] sm:$0xff]   ;;  %v197_v48 = vld [vmem:[%s970_s21 + $0x30] sm:$0xff] }
  0x19   : > { %846 = vmatprep.subr.mxu1 %v759_v23  ;;  %803 = vmatpush3.msra.mxu0 %v663_v26  ;;  %v680_v0 = vunpack.c.h.bf16 %v774_v56  ;;  %v744_v1 = vunpack.c.h.bf16 %v790_v57  ;;  %v648_v2 = vunpack.c.h.bf16 %v766_v60  ;;  %v712_v3 = vunpack.c.h.bf16 %v782_v61  ;;  %v781_v9 = vld [vmem:[%s934_s17 + $0x88] sm:$0xff]   ;;  %v780_v21 = vld [vmem:[%s934_s17 + $0x80] sm:$0xff]   ;;  %v198_v49 = vld [vmem:[%s970_s21 + $0x38] sm:$0xff] }
  0x1a   : > { %847 = vmatpush3.msra.mxu1 %v727_v27  ;;  %804 = vmatprep.subr.mxu0 %v692_v28  ;;  %v679_v6 = vunpack.c.l.bf16 %v774_v56  ;;  %v743_v7 = vunpack.c.l.bf16 %v790_v57  ;;  %v647_v10 = vunpack.c.l.bf16 %v766_v60  ;;  %v711_v11 = vunpack.c.l.bf16 %v782_v61  ;;  %v191_v26 = vld [vmem:[%s970_s21] sm:$0xff] }
  0x1b   : > { %848 = vmatprep.subr.mxu1 %v756_v29  ;;  %805 = vmatpush3.msra.mxu0 %v660_v30  ;;  %v676_v12 = vunpack.c.h.bf16 %v773_v4  ;;  %v740_v13 = vunpack.c.h.bf16 %v789_v5  ;;  %v644_v14 = vunpack.c.h.bf16 %v765_v8  ;;  %v708_v15 = vunpack.c.h.bf16 %v781_v9  ;;  %v192_v29 = vld [vmem:[%s970_s21 + $0x8] sm:$0xff] }
  0x1c   : > { %849 = vmatpush3.msra.mxu1 %v724_v31  ;;  %806 = vmatprep.subr.mxu0 %v691_v34  ;;  %v675_v18 = vunpack.c.l.bf16 %v773_v4  ;;  %v739_v19 = vunpack.c.l.bf16 %v789_v5  ;;  %v643_v22 = vunpack.c.l.bf16 %v765_v8  ;;  %v707_v23 = vunpack.c.l.bf16 %v781_v9  ;;  %v193_v34 = vld [vmem:[%s970_s21 + $0x10] sm:$0xff] }
  0x1d   : > { %850 = vmatprep.subr.mxu1 %v755_v35  ;;  %807 = vmatpush3.msra.mxu0 %v659_v38  ;;  %v672_v24 = vunpack.c.h.bf16 %v772_v16  ;;  %v736_v25 = vunpack.c.h.bf16 %v788_v17  ;;  %v640_v27 = vunpack.c.h.bf16 %v638_v20  ;;  %v704_v28 = vunpack.c.h.bf16 %v780_v21  ;;  %v194_v35 = vld [vmem:[%s970_s21 + $0x18] sm:$0xff] }
  0x1e   : > { %851 = vmatpush3.msra.mxu1 %v723_v39  ;;  %808 = vmatprep.subr.mxu0 %v688_v40  ;;  %v671_v30 = vunpack.c.l.bf16 %v772_v16  ;;  %v735_v31 = vunpack.c.l.bf16 %v788_v17  ;;  %v639_v32 = vunpack.c.l.bf16 %v638_v20  ;;  %v200_v33 = vunpack.c.h.bf16 %v191_v26 }
  0x1f   : > { %852 = vmatprep.subr.mxu1 %v752_v41  ;;  %809 = vmatpush3.msra.mxu0 %v656_v42  ;;  %v703_v36 = vunpack.c.l.bf16 %v780_v21  ;;  %v202_v37 = vunpack.c.h.bf16 %v192_v29  ;;  %v199_v38 = vunpack.c.l.bf16 %v191_v26  ;;  %v201_v39 = vunpack.c.l.bf16 %v192_v29  ;;  %v195_v42 = vld [vmem:[%s970_s21 + $0x20] sm:$0xff] }
  0x20   : > { %853 = vmatpush3.msra.mxu1 %v720_v43  ;;  %810 = vmatprep.subr.mxu0 %v687_v46  ;;  %v204_v40 = vunpack.c.h.bf16 %v193_v34  ;;  %v206_v41 = vunpack.c.h.bf16 %v194_v35  ;;  %v196_v43 = vld [vmem:[%s970_s21 + $0x28] sm:$0xff]  ;;  %v203_v44 = vunpack.c.l.bf16 %v193_v34  ;;  %v205_v45 = vunpack.c.l.bf16 %v194_v35 }
  0x21   : > { %854 = vmatprep.subr.mxu1 %v751_v47  ;;  %811 = vmatpush3.msra.mxu0 %v655_v50  ;;  %v208_v46 = vunpack.c.h.bf16 %v195_v42  ;;  %v210_v47 = vunpack.c.h.bf16 %v196_v43  ;;  %v207_v50 = vunpack.c.l.bf16 %v195_v42 }
  0x22   : > { %855 = vmatpush3.msra.mxu1 %v719_v51  ;;  %812 = vmatprep.subr.mxu0 %v684_v52  ;;  %v209_v51 = vunpack.c.l.bf16 %v196_v43  ;;  %v212_v52 = vunpack.c.h.bf16 %v197_v48 }
  0x23   : > { %856 = vmatprep.subr.mxu1 %v748_v53  ;;  %813 = vmatpush3.msra.mxu0 %v652_v54  ;;  %v214_v53 = vunpack.c.h.bf16 %v198_v49  ;;  %v211_v54 = vunpack.c.l.bf16 %v197_v48 }
  0x24   : > { %857 = vmatpush3.msra.mxu1 %v716_v55  ;;  %814 = vmatprep.subr.mxu0 %v683_v58  ;;  %v213_v55 = vunpack.c.l.bf16 %v198_v49  ;;  %v623_v58 = vld [vmem:[%s998_s2] ss:$0 sm:$0xff] }
  0x25   : > { %858 = vmatprep.subr.mxu1 %v747_v59  ;;  %815 = vmatpush3.msra.mxu0 %v651_v62 }
  0x26   : > { %859 = vmatpush3.msra.mxu1 %v715_v63  ;;  %816 = vmatprep.subr.mxu0 %v680_v0 }
  0x27   : > { %860 = vmatprep.subr.mxu1 %v744_v1  ;;  %817 = vmatpush3.msra.mxu0 %v648_v2 }
  0x28   : > { %861 = vmatpush3.msra.mxu1 %v712_v3  ;;  %818 = vmatprep.subr.mxu0 %v679_v6 }
  0x29   : > { %862 = vmatprep.subr.mxu1 %v743_v7  ;;  %819 = vmatpush3.msra.mxu0 %v647_v10 }
  0x2a   : > { %863 = vmatpush3.msra.mxu1 %v711_v11  ;;  %820 = vmatprep.subr.mxu0 %v676_v12 }
  0x2b   : > { %864 = vmatprep.subr.mxu1 %v740_v13  ;;  %821 = vmatpush3.msra.mxu0 %v644_v14 }
  0x2c   : > { %865 = vmatpush3.msra.mxu1 %v708_v15  ;;  %822 = vmatprep.subr.mxu0 %v675_v18 }
  0x2d   : > { %866 = vmatprep.subr.mxu1 %v739_v19  ;;  %823 = vmatpush3.msra.mxu0 %v643_v22 }
  0x2e   : > { %867 = vmatpush3.msra.mxu1 %v707_v23  ;;  %824 = vmatprep.subr.mxu0 %v672_v24 }
  0x2f   : > { %868 = vmatprep.subr.mxu1 %v736_v25  ;;  %825 = vmatpush3.msra.mxu0 %v640_v27 }
  0x30   : > { %869 = vmatpush3.msra.mxu1 %v704_v28  ;;  %826 = vmatprep.subr.mxu0 %v671_v30 }
  0x31   : > { %870 = vmatprep.subr.mxu1 %v735_v31  ;;  %827 = vmatpush3.msra.mxu0 %v639_v32 }
  0x32   : > { %414 = vmatprep.mubr.f32.mxu0 %v200_v33  ;;  %871 = vmatpush3.msra.mxu1 %v703_v36 }
  0x33   : > { %499 = vmatprep.mubr.f32.mxu1 %v202_v37  ;;  %415 = vmatmul.mubr.f32.vlgmr.msra.gmra.mxu0 %v199_v38 }
  0x34   : > { %500 = vmatmul.mubr.f32.vlgmr.msra.gmra.mxu1 %v201_v39  ;;  %419 = vmatprep.mubr.f32.mxu0 %v204_v40 }
  0x35   : > { %504 = vmatprep.mubr.f32.mxu1 %v206_v41 }
  0x37   : > { %420 = vmatmul.mubr.f32.gmra.mxu0 %v203_v44 }
  0x38   : > { %505 = vmatmul.mubr.f32.gmra.mxu1 %v205_v45  ;;  %424 = vmatprep.mubr.f32.mxu0 %v208_v46 }
  0x39   : > { %509 = vmatprep.mubr.f32.mxu1 %v210_v47 }
  0x3b   : > { %425 = vmatmul.mubr.f32.gmra.mxu0 %v207_v50 }
  0x3c   : > { %510 = vmatmul.mubr.f32.gmra.mxu1 %v209_v51  ;;  %429 = vmatprep.mubr.f32.mxu0 %v212_v52 }
  0x3d   : > { %514 = vmatprep.mubr.f32.mxu1 %v214_v53 }
  0x3f   : > { %430 = vmatmul.mubr.f32.gmra.mxu0 %v211_v54 }
  0x40   : > { %515 = vmatmul.mubr.f32.gmra.mxu1 %v213_v55 }
  0xf3   : > { %v828_v56 = vpop.f32.mrf.mxu0 }
  0xf4   : > { %v872_v57 = vpop.f32.mrf.mxu1 }
  0xf5   : > { %v829_v59 = vpop.f32.mrf.mxu0 }
  0xf6   : > { %v873_v60 = vpop.f32.mrf.mxu1  ;;  %v830_v61 = vadd.f32 %v829_v59, %v828_v56 }
  0xf7   : > { %v831_v62 = vpop.f32.mrf.mxu0  ;;  %v874_v1 = vadd.f32 %v873_v60, %v872_v57 }
  0xf8   : > { %v875_v63 = vpop.f32.mrf.mxu1  ;;  %v417_v0 = vadd.f32 %v830_v61, %v623_v58 }
  0xf9   : > { %v832_v2 = vpop.f32.mrf.mxu0 }
  0xfa   : > { %v876_v3 = vpop.f32.mrf.mxu1  ;;  %v502_v4 = vadd.f32 %v874_v1, %v417_v0  ;;  %v833_v5 = vadd.f32 %v832_v2, %v831_v62 }
  0xfb   : > { %v834_v6 = vpop.f32.mrf.mxu0  ;;  %v877_v10 = vadd.f32 %v876_v3, %v875_v63 }
  0xfc   : > { %v878_v7 = vpop.f32.mrf.mxu1  ;;  %v520_v8 = vmax.f32 %v502_v4, 0.0  ;;  %v422_v9 = vadd.f32 %v833_v5, %v623_v58 }
  0xfd   : > { %v835_v11 = vpop.f32.mrf.mxu0 }
  0xfe   : > { %v879_v12 = vpop.f32.mrf.mxu1  ;;  %v633_v13 = vpack.c.bf16 %v520_v8, %v520_v8  ;;  %v507_v14 = vadd.f32 %v877_v10, %v422_v9  ;;  %v836_v15 = vadd.f32 %v835_v11, %v834_v6 }
  0xff   : > { %v837_v16 = vpop.f32.mrf.mxu0  ;;  %v880_v20 = vadd.f32 %v879_v12, %v878_v7 }
 0x100   : > { %v881_v17 = vpop.f32.mrf.mxu1  ;;  %541 = vst.msk [vmem:[%s190_s27] sm:$0xf] %vm540_vm0, %v633_v13  ;;  %v521_v18 = vmax.f32 %v507_v14, 0.0  ;;  %v427_v19 = vadd.f32 %v836_v15, %v623_v58 }
 0x101   : > { %v838_v21 = vpop.f32.mrf.mxu0 }
 0x102   : > { %v882_v22 = vpop.f32.mrf.mxu1  ;;  %v634_v23 = vpack.c.bf16 %v521_v18, %v521_v18  ;;  %v512_v24 = vadd.f32 %v880_v20, %v427_v19  ;;  %v839_v25 = vadd.f32 %v838_v21, %v837_v16 }
 0x103   : > { %v883_v28 = vadd.f32 %v882_v22, %v881_v17 }
 0x104   : > { %542 = vst.msk [vmem:[%s190_s27 + $0x4] sm:$0xf] %vm540_vm0, %v634_v23  ;;  %v522_v26 = vmax.f32 %v512_v24, 0.0  ;;  %v432_v27 = vadd.f32 %v839_v25, %v623_v58 }
 0x106   : > { %v635_v29 = vpack.c.bf16 %v522_v26, %v522_v26  ;;  %v517_v30 = vadd.f32 %v883_v28, %v432_v27 }
 0x108   : > { %543 = vst.msk [vmem:[%s190_s27 + $0x8] sm:$0xf] %vm540_vm0, %v635_v29  ;;  %v523_v31 = vmax.f32 %v517_v30, 0.0 }
 0x10a   : > { %v636_v32 = vpack.c.bf16 %v523_v31, %v523_v31 }
 0x10c   : > { %544 = vst.msk [vmem:[%s190_s27 + $0xc] sm:$0xf] %vm540_vm0, %v636_v32 }
 0x10d PF: > { %s13_s12 = sadd.s32 1, %s898_s12  }
 0x10e   : > { %p10_p4 = scmp.ge.s32.totalorder %s13_s12, 6  }
 0x110   :  { %12 = sbr.rel (!%p10_p4) target bundleno = 1 (0x1), region = 65 }

// kernel: autoencoder_forward.18
= control target key start
LH: loop header
LB: loop body
LE: loop exit
PB: predicated region body
PF: predicated region fallthrough
CT: control target
= control target key end

     0   :  { %s558_s12 = smov 0   ;;  %s627_s0 = inlined_call_operand.vmem [shape: bf16[4,128,256], index: 0, kind: input, shape index: {}]   ;;  %s628_s1 = inlined_call_operand.vmem [shape: bf16[4,32,256], index: 1, kind: input, shape index: {}]   ;;  %s629_s2 = inlined_call_operand.vmem [shape: f32[1,32,1], index: 2, kind: input, shape index: {}]   ;;  %s630_s3 = inlined_call_operand.vmem [shape: bf16[4,32,128], index: 3, kind: output, shape index: {}]  }
   0x1 LB: > { %s451_s13 = sadd.s32 4294967295, %s535_s12   ;;  %p455_p0 = scmp.ge.s32.totalorder %s535_s12, 1  ;;  %s535_s12 = sphi %s558_s12, %s13_s12  }
   0x2   : > { %p147_p1 = scmp.lt.s32.totalorder %s535_s12, 5 }
   0x4   : > { %p148_p2 = pnand %p455_p0, %p147_p1 }
   0x5   : > { %p176_p3 = scmp.lt.s32.totalorder (!%p148_p2), %s451_s13, 3 }
   0x6   : > { %151 = sbr.rel (%p148_p2) target bundleno = 286 (0x11e), region = 32 }
   0xb   : > { %v253_v0 = vld [vmem:[%s629_s2 + $0x10] sm:$0xff]  ;;  %v251_v1 = vld [vmem:[%s629_s2] sm:$0xff]  ;;  %v537_v2 = vmov 0   ;;  %s632_s13 = smov (!%p176_p3, %s451_s13), 3  ;;  %v254_v3 = vld [vmem:[%s629_s2 + $0x18] sm:$0xff] }
   0xc   : > { %528 = vset.pattern.permute.xlu1 %v537_v2  ;;  %527 = vset.pattern.permute.xlu0 %v537_v2  ;;  %v252_v4 = vld [vmem:[%s629_s2 + $0x8] sm:$0xff]  ;;  %s468_s22 = sshll.u32 %s632_s13, 7  ;;  %s469_s26 = sshll.u32 %s632_s13, 5 }
   0xd   : > { %267 = vperm.xlu1 %528, %v253_v0   ;;  %257 = vperm.xlu0 %527, %v251_v1   ;;  %s584_s25 = scalar_lea.vmem %s627_s0, %s468_s22  ;;  %s593_s29 = scalar_lea.vmem %s628_s1, %s469_s26 }
   0xe   : > { %v206_v5 = vld [vmem:[%s584_s25 + $0x78] sm:$0xff]  ;;  %v205_v6 = vld [vmem:[%s584_s25 + $0x70] sm:$0xff]  ;;  %v204_v10 = vld [vmem:[%s584_s25 + $0x68] sm:$0xff]  ;;  %s470_s30 = sshll.u32 %s632_s13, 4 }
   0xf   : > { %v238_v7 = vunpack.c.h.bf16 %v206_v5  ;;  %v237_v8 = vunpack.c.l.bf16 %v206_v5  ;;  %v236_v9 = vunpack.c.h.bf16 %v205_v6  ;;  %v235_v11 = vunpack.c.l.bf16 %v205_v6  ;;  %v203_v13 = vld [vmem:[%s584_s25 + $0x60] sm:$0xff]  ;;  %v600_v15 = vld [vmem:[%s593_s29 + $0x10] sm:$0xff]  ;;  %v202_v20 = vld [vmem:[%s584_s25 + $0x58] sm:$0xff]  ;;  %s190_s6 = scalar_lea.vmem %s630_s3, %s470_s30 }
  0x10   : > { %v234_v12 = vunpack.c.h.bf16 %v204_v10  ;;  %v597_v14 = vld [vmem:[%s593_s29] sm:$0xff]  ;;  %v233_v16 = vunpack.c.l.bf16 %v204_v10  ;;  %v232_v17 = vunpack.c.h.bf16 %v203_v13  ;;  %v248_v19 = vunpack.c.h.bf16 %v600_v15  ;;  %v201_v23 = vld [vmem:[%s584_s25 + $0x50] sm:$0xff]  ;;  %v200_v26 = vld [vmem:[%s584_s25 + $0x48] sm:$0xff] }
  0x11   : > { %272 = vperm.xlu1 %528, %v254_v3   ;;  %262 = vperm.xlu0 %527, %v252_v4   ;;  %v244_v18 = vunpack.c.h.bf16 %v597_v14  ;;  %v231_v21 = vunpack.c.l.bf16 %v203_v13  ;;  %v230_v22 = vunpack.c.h.bf16 %v202_v20  ;;  %v229_v24 = vunpack.c.l.bf16 %v202_v20  ;;  %v199_v29 = vld [vmem:[%s584_s25 + $0x40] sm:$0xff]  ;;  %v198_v32 = vld [vmem:[%s584_s25 + $0x38] sm:$0xff]  ;;  %v197_v35 = vld [vmem:[%s584_s25 + $0x30] sm:$0xff] }
  0x12   : > { %275 = vmatprep.subr.mxu0 %v238_v7  ;;  %486 = vmatprep.subr.mxu1 %v238_v7  ;;  %v228_v25 = vunpack.c.h.bf16 %v201_v23  ;;  %v227_v27 = vunpack.c.l.bf16 %v201_v23  ;;  %v226_v28 = vunpack.c.h.bf16 %v200_v26  ;;  %v225_v30 = vunpack.c.l.bf16 %v200_v26  ;;  %v196_v38 = vld [vmem:[%s584_s25 + $0x28] sm:$0xff]  ;;  %v195_v41 = vld [vmem:[%s584_s25 + $0x20] sm:$0xff]  ;;  %v194_v44 = vld [vmem:[%s584_s25 + $0x18] sm:$0xff] }
  0x13   : > { %276 = vmatpush1.xpose.msra.mxu0 %v237_v8  ;;  %502 = vmatpush1.xpose.msra.mxu1 %v237_v8  ;;  %v224_v31 = vunpack.c.h.bf16 %v199_v29  ;;  %v223_v33 = vunpack.c.l.bf16 %v199_v29  ;;  %v222_v34 = vunpack.c.h.bf16 %v198_v32  ;;  %v221_v36 = vunpack.c.l.bf16 %v198_v32  ;;  %v193_v47 = vld [vmem:[%s584_s25 + $0x10] sm:$0xff]  ;;  %v192_v50 = vld [vmem:[%s584_s25 + $0x8] sm:$0xff]  ;;  %v191_v53 = vld [vmem:[%s584_s25] sm:$0xff] }
  0x14   : > { %277 = vmatprep.subr.mxu0 %v236_v9  ;;  %487 = vmatprep.subr.mxu1 %v236_v9  ;;  %v220_v37 = vunpack.c.h.bf16 %v197_v35  ;;  %v219_v39 = vunpack.c.l.bf16 %v197_v35  ;;  %v218_v40 = vunpack.c.h.bf16 %v196_v38  ;;  %v217_v42 = vunpack.c.l.bf16 %v196_v38  ;;  %v240_v57 = vld [vmem:[%s593_s29 + $0x8] sm:$0xff]  ;;  %v242_v58 = vld [vmem:[%s593_s29 + $0x18] sm:$0xff] }
  0x15   : > { %339 = vmatprep.mubr.f32.mxu0 %v244_v18  ;;  %349 = vmatprep.mubr.f32.mxu1 %v248_v19  ;;  %v216_v43 = vunpack.c.h.bf16 %v195_v41  ;;  %v215_v45 = vunpack.c.l.bf16 %v195_v41  ;;  %v214_v46 = vunpack.c.h.bf16 %v194_v44  ;;  %v213_v48 = vunpack.c.l.bf16 %v194_v44 }
  0x16   : > { %v212_v49 = vunpack.c.h.bf16 %v193_v47  ;;  %v211_v51 = vunpack.c.l.bf16 %v193_v47  ;;  %v210_v52 = vunpack.c.h.bf16 %v192_v50  ;;  %v209_v54 = vunpack.c.l.bf16 %v192_v50 }
  0x17   : > { %278 = vmatpush1.xpose.msra.mxu0 %v235_v11  ;;  %503 = vmatpush1.xpose.msra.mxu1 %v235_v11  ;;  %v208_v55 = vunpack.c.h.bf16 %v191_v53  ;;  %v207_v56 = vunpack.c.l.bf16 %v191_v53  ;;  %v243_v59 = vunpack.c.l.bf16 %v597_v14  ;;  %v247_v60 = vunpack.c.l.bf16 %v600_v15 }
  0x18   : > { %279 = vmatprep.subr.mxu0 %v234_v12  ;;  %488 = vmatprep.subr.mxu1 %v234_v12  ;;  %v246_v61 = vunpack.c.h.bf16 %v240_v57  ;;  %v250_v62 = vunpack.c.h.bf16 %v242_v58  ;;  %v245_v63 = vunpack.c.l.bf16 %v240_v57  ;;  %v249_v0 = vunpack.c.l.bf16 %v242_v58 }
  0x1b   : > { %280 = vmatpush1.xpose.msra.mxu0 %v233_v16  ;;  %504 = vmatpush1.xpose.msra.mxu1 %v233_v16 }
  0x1c   : > { %281 = vmatprep.subr.mxu0 %v232_v17  ;;  %489 = vmatprep.subr.mxu1 %v232_v17 }
  0x1f   : > { %282 = vmatpush1.xpose.msra.mxu0 %v231_v21  ;;  %505 = vmatpush1.xpose.msra.mxu1 %v231_v21 }
  0x20   : > { %283 = vmatprep.subr.mxu0 %v230_v22  ;;  %490 = vmatprep.subr.mxu1 %v230_v22 }
  0x23   : > { %284 = vmatpush1.xpose.msra.mxu0 %v229_v24  ;;  %506 = vmatpush1.xpose.msra.mxu1 %v229_v24 }
  0x24   : > { %285 = vmatprep.subr.mxu0 %v228_v25  ;;  %491 = vmatprep.subr.mxu1 %v228_v25 }
  0x27   : > { %286 = vmatpush1.xpose.msra.mxu0 %v227_v27  ;;  %507 = vmatpush1.xpose.msra.mxu1 %v227_v27 }
  0x28   : > { %287 = vmatprep.subr.mxu0 %v226_v28  ;;  %492 = vmatprep.subr.mxu1 %v226_v28 }
  0x2b   : > { %288 = vmatpush1.xpose.msra.mxu0 %v225_v30  ;;  %508 = vmatpush1.xpose.msra.mxu1 %v225_v30 }
  0x2c   : > { %289 = vmatprep.subr.mxu0 %v224_v31  ;;  %493 = vmatprep.subr.mxu1 %v224_v31 }
  0x2f   : > { %290 = vmatpush1.xpose.msra.mxu0 %v223_v33  ;;  %509 = vmatpush1.xpose.msra.mxu1 %v223_v33 }
  0x30   : > { %291 = vmatprep.subr.mxu0 %v222_v34  ;;  %494 = vmatprep.subr.mxu1 %v222_v34 }
  0x33   : > { %292 = vmatpush1.xpose.msra.mxu0 %v221_v36  ;;  %510 = vmatpush1.xpose.msra.mxu1 %v221_v36 }
  0x34   : > { %293 = vmatprep.subr.mxu0 %v220_v37  ;;  %495 = vmatprep.subr.mxu1 %v220_v37 }
  0x37   : > { %294 = vmatpush1.xpose.msra.mxu0 %v219_v39  ;;  %511 = vmatpush1.xpose.msra.mxu1 %v219_v39 }
  0x38   : > { %295 = vmatprep.subr.mxu0 %v218_v40  ;;  %496 = vmatprep.subr.mxu1 %v218_v40 }
  0x3b   : > { %296 = vmatpush1.xpose.msra.mxu0 %v217_v42  ;;  %512 = vmatpush1.xpose.msra.mxu1 %v217_v42 }
  0x3c   : > { %297 = vmatprep.subr.mxu0 %v216_v43  ;;  %497 = vmatprep.subr.mxu1 %v216_v43 }
  0x3f   : > { %298 = vmatpush1.xpose.msra.mxu0 %v215_v45  ;;  %513 = vmatpush1.xpose.msra.mxu1 %v215_v45 }
  0x40   : > { %299 = vmatprep.subr.mxu0 %v214_v46  ;;  %498 = vmatprep.subr.mxu1 %v214_v46 }
  0x43   : > { %300 = vmatpush1.xpose.msra.mxu0 %v213_v48  ;;  %514 = vmatpush1.xpose.msra.mxu1 %v213_v48 }
  0x44   : > { %301 = vmatprep.subr.mxu0 %v212_v49  ;;  %499 = vmatprep.subr.mxu1 %v212_v49 }
  0x47   : > { %302 = vmatpush1.xpose.msra.mxu0 %v211_v51  ;;  %515 = vmatpush1.xpose.msra.mxu1 %v211_v51 }
  0x48   : > { %303 = vmatprep.subr.mxu0 %v210_v52  ;;  %500 = vmatprep.subr.mxu1 %v210_v52 }
  0x4b   : > { %304 = vmatpush1.xpose.msra.mxu0 %v209_v54  ;;  %516 = vmatpush1.xpose.msra.mxu1 %v209_v54 }
  0x4c   : > { %305 = vmatprep.subr.mxu0 %v208_v55  ;;  %501 = vmatprep.subr.mxu1 %v208_v55 }
  0x4f   : > { %306 = vmatpush1.xpose.msra.mxu0 %v207_v56  ;;  %517 = vmatpush1.xpose.msra.mxu1 %v207_v56 }
  0x52   : > { %340 = vmatmul.mubr.f32.vlgmr.msra.gmra.mxu0 %v243_v59  ;;  %350 = vmatmul.mubr.f32.vlgmr.msra.gmra.mxu1 %v247_v60 }
  0x53   : > { %344 = vmatprep.mubr.f32.mxu0 %v246_v61  ;;  %354 = vmatprep.mubr.f32.mxu1 %v250_v62 }
  0x56   : > { %345 = vmatmul.mubr.f32.gmra.mxu0 %v245_v63  ;;  %355 = vmatmul.mubr.f32.gmra.mxu1 %v249_v0 }
  0x88   : > { %v268_v1 = vpop.permute.xlu1 %267  ;;  %v258_v2 = vpop.permute.xlu0 %257 }
  0x8c   : > { %v273_v7 = vpop.permute.xlu1 %272  ;;  %v263_v8 = vpop.permute.xlu0 %262 }
 0x112   : > { %v341_v3 = vpop.f32.mrf.mxu0  ;;  %v351_v4 = vpop.f32.mrf.mxu1 }
 0x113   : > { %v342_v9 = vadd.f32 %v341_v3, %v258_v2  ;;  %v352_v10 = vadd.f32 %v351_v4, %v268_v1 }
 0x114   : > { %v343_v5 = vpop.f32.mrf.mxu0  ;;  %v353_v6 = vpop.f32.mrf.mxu1 }
 0x115   : > { %v360_v17 = vmax.f32 %v342_v9, 0.0  ;;  %v362_v18 = vmax.f32 %v352_v10, 0.0 }
 0x116   : > { %v346_v11 = vpop.f32.mrf.mxu0  ;;  %v356_v12 = vpop.f32.mrf.mxu1 }
 0x117   : > { %v347_v13 = vadd.f32 %v346_v11, %v263_v8  ;;  %v357_v14 = vadd.f32 %v356_v12, %v273_v7 }
 0x118   : > { %v348_v15 = vpop.f32.mrf.mxu0  ;;  %v358_v16 = vpop.f32.mrf.mxu1 }
 0x119   : > { %v361_v19 = vmax.f32 %v347_v13, 0.0  ;;  %v363_v20 = vmax.f32 %v357_v14, 0.0 }
 0x11b   : > { %v478_v21 = vpack.c.bf16 %v361_v19, %v360_v17  ;;  %v483_v22 = vpack.c.bf16 %v363_v20, %v362_v18 }
 0x11d   : > { %479 = vst [vmem:[%s190_s6] sm:$0xff] %v478_v21   ;;  %485 = vst [vmem:[%s190_s6 + $0x8] sm:$0xff] %v483_v22  }
 0x11e PF: > { %s13_s12 = sadd.s32 1, %s535_s12  }
 0x11f   : > { %p10_p4 = scmp.ge.s32.totalorder %s13_s12, 6  }
 0x121   :  { %12 = sbr.rel (!%p10_p4) target bundleno = 1 (0x1), region = 65 }

// kernel: autoencoder_forward.19
= control target key start
LH: loop header
LB: loop body
LE: loop exit
PB: predicated region body
PF: predicated region fallthrough
CT: control target
= control target key end

     0   :  { %s835_s12 = smov 0   ;;  %s903_s0 = inlined_call_operand.vmem [shape: bf16[4,512,128], index: 0, kind: input, shape index: {}]   ;;  %s904_s1 = inlined_call_operand.vmem [shape: bf16[4,3,128], index: 1, kind: input, shape index: {}]   ;;  %s905_s2 = inlined_call_operand.vmem [shape: f32[1,3,1], index: 2, kind: input, shape index: {}]   ;;  %s906_s3 = inlined_call_operand.vmem [shape: f32[4,3,512], index: 3, kind: output, shape index: {}]  }
   0x1 LB: > { %s547_s13 = sadd.s32 4294967295, %s812_s12   ;;  %p551_p0 = scmp.ge.s32.totalorder %s812_s12, 1  ;;  %s812_s12 = sphi %s835_s12, %s13_s12  }
   0x2   : > { %p146_p1 = scmp.lt.s32.totalorder %s812_s12, 5 }
   0x4   : > { %p147_p2 = pnand %p551_p0, %p146_p1 }
   0x5   : > { %p174_p3 = scmp.lt.s32.totalorder (!%p147_p2), %s547_s13, 3 }
   0x6   : > { %150 = sbr.rel (%p147_p2) target bundleno = 297 (0x129), region = 32 }
   0xb   : > { %v318_v0 = vld [vmem:[%s905_s2] sm:$0x7]  ;;  %v814_v1 = vmov 0   ;;  %s908_s13 = smov (!%p174_p3, %s547_s13), 3 }
   0xc   : > { %797 = vset.pattern.permute.xlu0 %v814_v1  ;;  %s559_s16 = sshll.u32 %s908_s13, 8  ;;  %s554_s20 = sshll.u32 %s908_s13, 1 }
   0xd   : > { %321 = vperm.xlu0 %797, %v318_v0   ;;  %s852_s19 = scalar_lea.vmem %s903_s0, %s559_s16  ;;  %s182_s23 = scalar_lea.vmem %s904_s1, %s554_s20 }
   0xe   : > { %v703_v2 = vld [vmem:[%s852_s19 + $0x78] sm:$0xff]   ;;  %v702_v12 = vld [vmem:[%s852_s19 + $0x70] sm:$0xff]   ;;  %v701_v24 = vld [vmem:[%s852_s19 + $0x68] sm:$0xff]   ;;  %s560_s24 = sshll.u32 %s908_s13, 4 }
   0xf   : > { %v719_v3 = vld [vmem:[%s852_s19 + $0xf8] sm:$0xff]   ;;  %v623_v5 = vunpack.c.l.bf16 %v703_v2  ;;  %v624_v6 = vunpack.c.h.bf16 %v703_v2  ;;  %v718_v13 = vld [vmem:[%s852_s19 + $0xf0] sm:$0xff]   ;;  %v620_v16 = vunpack.c.h.bf16 %v702_v12  ;;  %v619_v22 = vunpack.c.l.bf16 %v702_v12  ;;  %v717_v25 = vld [vmem:[%s852_s19 + $0xe8] sm:$0xff]   ;;  %s187_s27 = scalar_lea.vmem %s906_s3, %s560_s24 }
  0x10   : > { %v695_v4 = vld [vmem:[%s852_s19 + $0x38] sm:$0xff]   ;;  %v687_v7 = vunpack.c.l.bf16 %v719_v3  ;;  %v688_v8 = vunpack.c.h.bf16 %v719_v3  ;;  %v684_v17 = vunpack.c.h.bf16 %v718_v13  ;;  %v694_v18 = vld [vmem:[%s852_s19 + $0x30] sm:$0xff]   ;;  %v683_v23 = vunpack.c.l.bf16 %v718_v13  ;;  %v693_v30 = vld [vmem:[%s852_s19 + $0x28] sm:$0xff]  }
  0x11   : > { %v711_v9 = vld [vmem:[%s852_s19 + $0xb8] sm:$0xff]   ;;  %v592_v10 = vunpack.c.h.bf16 %v695_v4  ;;  %720 = vmatprep.subr.mxu0 %v624_v6  ;;  %v591_v14 = vunpack.c.l.bf16 %v695_v4  ;;  %v710_v19 = vld [vmem:[%s852_s19 + $0xb0] sm:$0xff]   ;;  %v588_v20 = vunpack.c.h.bf16 %v694_v18  ;;  %v587_v26 = vunpack.c.l.bf16 %v694_v18  ;;  %v709_v31 = vld [vmem:[%s852_s19 + $0xa8] sm:$0xff]  }
  0x12   : > { %v656_v11 = vunpack.c.h.bf16 %v711_v9  ;;  %754 = vmatprep.subr.mxu1 %v688_v8  ;;  %v655_v15 = vunpack.c.l.bf16 %v711_v9  ;;  %v652_v21 = vunpack.c.h.bf16 %v710_v19  ;;  %v651_v27 = vunpack.c.l.bf16 %v710_v19  ;;  %v316_v32 = vld [vmem:[%s182_s23] sm:$0x3]  ;;  %v699_v50 = vld [vmem:[%s852_s19 + $0x58] sm:$0xff]   ;;  %v698_v62 = vld [vmem:[%s852_s19 + $0x50] sm:$0xff]  }
  0x13   : > { %721 = vmatpush3.xpose.msra.mxu0 %v592_v10  ;;  %v616_v28 = vunpack.c.h.bf16 %v701_v24  ;;  %v680_v29 = vunpack.c.h.bf16 %v717_v25  ;;  %v584_v33 = vunpack.c.h.bf16 %v693_v30  ;;  %v648_v34 = vunpack.c.h.bf16 %v709_v31  ;;  %v700_v38 = vld [vmem:[%s852_s19 + $0x60] sm:$0xff]   ;;  %v715_v51 = vld [vmem:[%s852_s19 + $0xd8] sm:$0xff]   ;;  %v714_v63 = vld [vmem:[%s852_s19 + $0xd0] sm:$0xff]  }
  0x14   : > { %755 = vmatpush3.xpose.msra.mxu1 %v656_v11  ;;  %722 = vmatprep.subr.mxu0 %v623_v5  ;;  %v615_v35 = vunpack.c.l.bf16 %v701_v24  ;;  %v679_v36 = vunpack.c.l.bf16 %v717_v25  ;;  %v870_v37 = vunpack.c.l.bf16 %v316_v32  ;;  %v716_v39 = vld [vmem:[%s852_s19 + $0xe0] sm:$0xff]   ;;  %v583_v40 = vunpack.c.l.bf16 %v693_v30  ;;  %v691_v56 = vld [vmem:[%s852_s19 + $0x18] sm:$0xff]   ;;  %v690_v4 = vld [vmem:[%s852_s19 + $0x10] sm:$0xff]  }
  0x15   : > { %756 = vmatprep.subr.mxu1 %v687_v7  ;;  %v647_v41 = vunpack.c.l.bf16 %v709_v31  ;;  %v612_v42 = vunpack.c.h.bf16 %v700_v38  ;;  %v676_v43 = vunpack.c.h.bf16 %v716_v39  ;;  %v692_v44 = vld [vmem:[%s852_s19 + $0x20] sm:$0xff]   ;;  %v611_v48 = vunpack.c.l.bf16 %v700_v38  ;;  %v707_v57 = vld [vmem:[%s852_s19 + $0x98] sm:$0xff]   ;;  %v706_v5 = vld [vmem:[%s852_s19 + $0x90] sm:$0xff]  }
  0x16   : > { %752 = vmatprep.mubr.f32.mxu0 %v870_v37  ;;  %786 = vmatprep.mubr.f32.mxu1 %v870_v37  ;;  %v708_v45 = vld [vmem:[%s852_s19 + $0xa0] sm:$0xff]   ;;  %v580_v46 = vunpack.c.h.bf16 %v692_v44  ;;  %v675_v49 = vunpack.c.l.bf16 %v716_v39  ;;  %v579_v52 = vunpack.c.l.bf16 %v692_v44  ;;  %v608_v54 = vunpack.c.h.bf16 %v699_v50  ;;  %v697_v10 = vld [vmem:[%s852_s19 + $0x48] sm:$0xff]  }
  0x17   : > { %723 = vmatpush3.xpose.msra.mxu0 %v591_v14  ;;  %v644_v47 = vunpack.c.h.bf16 %v708_v45  ;;  %v643_v53 = vunpack.c.l.bf16 %v708_v45  ;;  %v672_v55 = vunpack.c.h.bf16 %v715_v51  ;;  %v576_v58 = vunpack.c.h.bf16 %v691_v56  ;;  %v713_v11 = vld [vmem:[%s852_s19 + $0xc8] sm:$0xff]  }
  0x18   : > { %757 = vmatpush3.xpose.msra.mxu1 %v655_v15  ;;  %724 = vmatprep.subr.mxu0 %v620_v16  ;;  %v640_v59 = vunpack.c.h.bf16 %v707_v57  ;;  %v607_v60 = vunpack.c.l.bf16 %v699_v50  ;;  %v671_v61 = vunpack.c.l.bf16 %v715_v51  ;;  %v575_v0 = vunpack.c.l.bf16 %v691_v56  ;;  %v689_v16 = vld [vmem:[%s852_s19 + $0x8] sm:$0xff]  }
  0x19   : > { %758 = vmatprep.subr.mxu1 %v684_v17  ;;  %v639_v1 = vunpack.c.l.bf16 %v707_v57  ;;  %v604_v2 = vunpack.c.h.bf16 %v698_v62  ;;  %v668_v3 = vunpack.c.h.bf16 %v714_v63  ;;  %v572_v6 = vunpack.c.h.bf16 %v690_v4  ;;  %v705_v17 = vld [vmem:[%s852_s19 + $0x88] sm:$0xff]  }
  0x1a   : > { %v636_v7 = vunpack.c.h.bf16 %v706_v5  ;;  %v603_v8 = vunpack.c.l.bf16 %v698_v62  ;;  %v667_v9 = vunpack.c.l.bf16 %v714_v63  ;;  %v571_v12 = vunpack.c.l.bf16 %v690_v4 }
  0x1b   : > { %725 = vmatpush3.xpose.msra.mxu0 %v588_v20  ;;  %v635_v13 = vunpack.c.l.bf16 %v706_v5  ;;  %v600_v14 = vunpack.c.h.bf16 %v697_v10  ;;  %v664_v15 = vunpack.c.h.bf16 %v713_v11  ;;  %v568_v18 = vunpack.c.h.bf16 %v689_v16 }
  0x1c   : > { %759 = vmatpush3.xpose.msra.mxu1 %v652_v21  ;;  %726 = vmatprep.subr.mxu0 %v619_v22  ;;  %v632_v19 = vunpack.c.h.bf16 %v705_v17  ;;  %v599_v20 = vunpack.c.l.bf16 %v697_v10  ;;  %v663_v21 = vunpack.c.l.bf16 %v713_v11  ;;  %v696_v22 = vld [vmem:[%s852_s19 + $0x40] sm:$0xff]   ;;  %v567_v24 = vunpack.c.l.bf16 %v689_v16 }
  0x1d   : > { %760 = vmatprep.subr.mxu1 %v683_v23  ;;  %v712_v23 = vld [vmem:[%s852_s19 + $0xc0] sm:$0xff]   ;;  %v631_v25 = vunpack.c.l.bf16 %v705_v17  ;;  %v595_v32 = vunpack.c.l.bf16 %v696_v22 }
  0x1f   : > { %727 = vmatpush3.xpose.msra.mxu0 %v587_v26  ;;  %v596_v26 = vunpack.c.h.bf16 %v696_v22 }
  0x20   : > { %761 = vmatpush3.xpose.msra.mxu1 %v651_v27  ;;  %728 = vmatprep.subr.mxu0 %v616_v28  ;;  %v660_v27 = vunpack.c.h.bf16 %v712_v23  ;;  %v562_v28 = vld [vmem:[%s852_s19] sm:$0xff]  }
  0x21   : > { %762 = vmatprep.subr.mxu1 %v680_v29  ;;  %v704_v29 = vld [vmem:[%s852_s19 + $0x80] sm:$0xff]   ;;  %v564_v30 = vunpack.c.h.bf16 %v562_v28 }
  0x22   : > { %v628_v31 = vunpack.c.h.bf16 %v704_v29 }
  0x23   : > { %729 = vmatpush3.xpose.msra.mxu0 %v584_v33  ;;  %v659_v33 = vunpack.c.l.bf16 %v712_v23 }
  0x24   : > { %763 = vmatpush3.xpose.msra.mxu1 %v648_v34  ;;  %730 = vmatprep.subr.mxu0 %v615_v35  ;;  %v563_v34 = vunpack.c.l.bf16 %v562_v28  ;;  %v627_v35 = vunpack.c.l.bf16 %v704_v29 }
  0x25   : > { %764 = vmatprep.subr.mxu1 %v679_v36 }
  0x27   : > { %731 = vmatpush3.xpose.msra.mxu0 %v583_v40 }
  0x28   : > { %765 = vmatpush3.xpose.msra.mxu1 %v647_v41  ;;  %732 = vmatprep.subr.mxu0 %v612_v42 }
  0x29   : > { %766 = vmatprep.subr.mxu1 %v676_v43 }
  0x2b   : > { %733 = vmatpush3.xpose.msra.mxu0 %v580_v46 }
  0x2c   : > { %767 = vmatpush3.xpose.msra.mxu1 %v644_v47  ;;  %734 = vmatprep.subr.mxu0 %v611_v48 }
  0x2d   : > { %768 = vmatprep.subr.mxu1 %v675_v49 }
  0x2f   : > { %735 = vmatpush3.xpose.msra.mxu0 %v579_v52 }
  0x30   : > { %769 = vmatpush3.xpose.msra.mxu1 %v643_v53  ;;  %736 = vmatprep.subr.mxu0 %v608_v54 }
  0x31   : > { %770 = vmatprep.subr.mxu1 %v672_v55 }
  0x33   : > { %737 = vmatpush3.xpose.msra.mxu0 %v576_v58 }
  0x34   : > { %771 = vmatpush3.xpose.msra.mxu1 %v640_v59  ;;  %738 = vmatprep.subr.mxu0 %v607_v60 }
  0x35   : > { %772 = vmatprep.subr.mxu1 %v671_v61 }
  0x37   : > { %739 = vmatpush3.xpose.msra.mxu0 %v575_v0 }
  0x38   : > { %773 = vmatpush3.xpose.msra.mxu1 %v639_v1  ;;  %740 = vmatprep.subr.mxu0 %v604_v2 }
  0x39   : > { %774 = vmatprep.subr.mxu1 %v668_v3 }
  0x3b   : > { %741 = vmatpush3.xpose.msra.mxu0 %v572_v6 }
  0x3c   : > { %775 = vmatpush3.xpose.msra.mxu1 %v636_v7  ;;  %742 = vmatprep.subr.mxu0 %v603_v8 }
  0x3d   : > { %776 = vmatprep.subr.mxu1 %v667_v9 }
  0x3f   : > { %743 = vmatpush3.xpose.msra.mxu0 %v571_v12 }
  0x40   : > { %777 = vmatpush3.xpose.msra.mxu1 %v635_v13  ;;  %744 = vmatprep.subr.mxu0 %v600_v14 }
  0x41   : > { %778 = vmatprep.subr.mxu1 %v664_v15 }
  0x43   : > { %745 = vmatpush3.xpose.msra.mxu0 %v568_v18 }
  0x44   : > { %779 = vmatpush3.xpose.msra.mxu1 %v632_v19  ;;  %746 = vmatprep.subr.mxu0 %v599_v20 }
  0x45   : > { %780 = vmatprep.subr.mxu1 %v663_v21 }
  0x47   : > { %747 = vmatpush3.xpose.msra.mxu0 %v567_v24 }
  0x48   : > { %781 = vmatpush3.xpose.msra.mxu1 %v631_v25  ;;  %748 = vmatprep.subr.mxu0 %v596_v26 }
  0x49   : > { %782 = vmatprep.subr.mxu1 %v660_v27 }
  0x4b   : > { %749 = vmatpush3.xpose.msra.mxu0 %v564_v30 }
  0x4c   : > { %783 = vmatpush3.xpose.msra.mxu1 %v628_v31  ;;  %750 = vmatprep.subr.mxu0 %v595_v32 }
  0x4d   : > { %784 = vmatprep.subr.mxu1 %v659_v33 }
  0x4f   : > { %751 = vmatpush3.xpose.msra.mxu0 %v563_v34 }
  0x50   : > { %785 = vmatpush3.xpose.msra.mxu1 %v627_v35 }
  0x52   : > { %753 = vmatmul.mubr.f32.vlgmr.msra.gmra.mxu0 %v870_v37 }
  0x53   : > { %787 = vmatmul.mubr.f32.vlgmr.msra.gmra.mxu1 %v870_v37 }
  0x88   : > { %v322_v36 = vpop.permute.xlu0 %321 }
 0x112   : > { %v390_v38 = vpop.f32.mrf.mxu0 }
 0x113   : > { %v461_v39 = vpop.f32.mrf.mxu1  ;;  %v391_v40 = vadd.f32 %v390_v38, %v322_v36 }
 0x114   : > { %v462_v41 = vadd.f32 %v461_v39, %v322_v36  ;;  %v392_v42 = vpop.f32.mrf.mxu0 }
 0x115   : > { %v463_v43 = vpop.f32.mrf.mxu1  ;;  %798 = vtanh.f32 %v391_v40  ;;  %v393_v44 = vadd.f32 %v392_v42, %v322_v36 }
 0x116   : > { %v464_v45 = vadd.f32 %v463_v43, %v322_v36  ;;  %800 = vtanh.f32 %v462_v41 }
 0x117   : > { %802 = vtanh.f32 %v393_v44 }
 0x118   : > { %804 = vtanh.f32 %v464_v45 }
 0x122   : > { %v799_v46 = vpop.eup %798 }
 0x123   : > { %v801_v47 = vpop.eup %800 }
 0x124   : > { %v803_v48 = vpop.eup %802 }
 0x125   : > { %v805_v37 = vpop.eup %804  ;;  %v474_v49 = vcombine.low %v799_v46, %v803_v48 }
 0x126   : > { %v475_v50 = vcombine.low %v801_v47, %v805_v37 }
 0x127   : > { %478 = vst [vmem:[%s187_s27] sm:$0x77] %v474_v49 }
 0x128   : > { %479 = vst [vmem:[%s187_s27 + $0x8] sm:$0x77] %v475_v50 }
 0x129 PF: > { %s13_s12 = sadd.s32 1, %s812_s12  }
 0x12a   : > { %p10_p4 = scmp.ge.s32.totalorder %s13_s12, 6  }
 0x12c   :  { %12 = sbr.rel (!%p10_p4) target bundleno = 1 (0x1), region = 65 }

</bundles_post_ra>
